<compile_context>
chip_gen: v7x
topology: tpu7x:2x2x1
jax: 0.10.0
libtpu: 0.0.40
codegen_flags: <defaults>
</compile_context>

<pallas_src>
import jax
import jax.numpy as jnp
from jax import lax
from jax.experimental import pallas as pl
from jax.experimental.pallas import tpu as pltpu

NEG_SLOPE = 0.2  # LeakyReLU slope used by progressive-GAN critics


def _leaky_relu(x):
    return jnp.where(x >= 0.0, x, NEG_SLOPE * x)


def _vmem_limit_bytes():
    # v5e/v6e: 128 MiB physical VMEM -> raise well above the 16/32 MiB scoped default.
    # v7x    : 64 MiB per TensorCore -> cap with headroom.
    try:
        cap = int(pltpu.get_tpu_info().vmem_capacity_bytes)
    except Exception:
        cap = 64 << 20                      # conservative fallback, safe on every chip
    return max(32 << 20, min(cap - (16 << 20), 96 << 20))


# ---------------------------------------------------------------------------
# Fused Pallas kernel (factory: `first` / shapes are static)
# ---------------------------------------------------------------------------
def _make_critic_kernel(first, H, W, Cin, Cf):
    Hp, Wp2 = H + 2, W // 2 + 1          # padded rows / even (== odd) padded columns
    Ho, Wo = H // 2, W // 2
    M = H * Wo                           # im2col rows per output-column parity

    def kernel(*refs):
        if first:
            (xe_ref, xo_ref, w_in_ref, b_in_ref, w_conv_ref, b_conv_ref,
             o_ref, ye_ref, yo_ref, col_ref) = refs
        else:
            xe_ref, xo_ref, w_conv_ref, b_conv_ref, o_ref, col_ref = refs

        if first:
            # ---- in_sequence: 1x1 conv + LeakyReLU as one MXU dot per parity half ----
            # Zero the padded scratch once; compute only on the interior (no iota masks).
            ye_ref[...] = jnp.zeros_like(ye_ref)
            yo_ref[...] = jnp.zeros_like(yo_ref)

            def in_seq(x_ref, col_lo, y_ref):
                xi = x_ref[0][1:Hp - 1, col_lo:col_lo + Wo, :]      # (H, Wo, Cin) bf16
                a = jnp.dot(xi.reshape(M, Cin), w_in_ref[...],
                            preferred_element_type=jnp.float32)
                a = _leaky_relu(a + b_in_ref[...])                  # f32 epilogue
                y_ref[1:Hp - 1, col_lo:col_lo + Wo, :] = (
                    a.reshape(H, Wo, Cf).astype(y_ref.dtype))

            in_seq(xe_ref, 1, ye_ref)    # even padded cols: column 0 is the left pad
            in_seq(xo_ref, 0, yo_ref)    # odd  padded cols: last column is the right pad
            be, bo = ye_ref[...], yo_ref[...]
        else:
            be, bo = xe_ref[0], xo_ref[0]

        # ---- im2col slab: both output-column parities stacked along M ----
        def tap(parity_sum, dy):
            buf = be if parity_sum % 2 == 0 else bo
            off = parity_sum // 2
            return buf[dy:dy + H, off:off + Wo, :]                  # (H, Wo, Cf) bf16

        for p in range(2):               # output-column parity
            for dy in range(3):
                for dx in range(3):
                    j = dy * 3 + dx
                    col_ref[p * M:(p + 1) * M, j * Cf:(j + 1) * Cf] = (
                        tap(p + dx, dy).reshape(M, Cf))

        # ---- intermediate_sequence: 3x3 conv as ONE MXU dot (K = 9*Cf) ----
        z = jnp.dot(col_ref[...], w_conv_ref[...],
                    preferred_element_type=jnp.float32)             # (2M, Cf) f32
        z = _leaky_relu(z + b_conv_ref[...])

        # ---- fused 2x2 average pool (f32) ----
        zw = z[0:M, :] + z[M:2 * M, :]                   # pool over W (parity halves)
        zw = zw.reshape(Ho, 2, Wo, Cf)                   # split rows into (ho, h-parity)
        pooled = (zw[:, 0, :, :] + zw[:, 1, :, :]) * 0.25

        # ---- single lane-dense full-block store ----
        o_ref[0] = pooled.reshape(Ho, Wo * Cf).astype(o_ref.dtype)

    return kernel


# ---------------------------------------------------------------------------
# Wrapper (layout plumbing once at the block boundary)
# ---------------------------------------------------------------------------
def critic_block_forward(x_nchw, params, first=False):
    """Mirrors CriticBlock.forward: NCHW in, NCHW out."""
    B, Cin, H, W = x_nchw.shape
    Cf = params["w_conv"].shape[-1]
    # TODO(synk): odd H/W (AvgPool2d floor) unsupported; prog-GAN stages use even dims.
    assert H % 2 == 0 and W % 2 == 0
    if not first:
        assert Cin == Cf, "intermediate_sequence expects Cf input channels"
    Ho, Wo, Hp, Wp2 = H // 2, W // 2, H + 2, W // 2 + 1
    M = H * Wo

    # NCHW -> NHWC once (bf16), zero-pad for the 3x3 conv, split padded columns even/odd.
    x = jnp.transpose(x_nchw, (0, 2, 3, 1)).astype(jnp.bfloat16)
    xp = jnp.pad(x, ((0, 0), (1, 1), (1, 1), (0, 0)))
    xe = xp[:, :, 0::2, :]
    xo = xp[:, :, 1::2, :]

    # NOTE: conv weights are HWIO; raw PyTorch OIHW weights need w.transpose(2, 3, 1, 0).
    w_conv = params["w_conv"].reshape(9 * Cf, Cf).astype(jnp.bfloat16)
    b_conv = params["b_conv"].reshape(1, Cf).astype(jnp.float32)

    act_spec = pl.BlockSpec((1, Hp, Wp2, Cin), lambda b: (b, 0, 0, 0))
    wconv_spec = pl.BlockSpec((9 * Cf, Cf), lambda b: (0, 0))
    bias_spec = pl.BlockSpec((1, Cf), lambda b: (0, 0))

    scratch_shapes = [pltpu.VMEM((2 * M, 9 * Cf), jnp.bfloat16)]     # im2col slab

    if first:
        w_in = params["w_in"].astype(jnp.bfloat16)                   # (Cin, Cf), IO layout
        b_in = params["b_in"].reshape(1, Cf).astype(jnp.float32)
        inputs = (xe, xo, w_in, b_in, w_conv, b_conv)
        in_specs = [act_spec, act_spec,
                    pl.BlockSpec((Cin, Cf), lambda b: (0, 0)), bias_spec,
                    wconv_spec, bias_spec]
        scratch_shapes = [pltpu.VMEM((Hp, Wp2, Cf), jnp.bfloat16),    # padded in_seq out
                          pltpu.VMEM((Hp, Wp2, Cf), jnp.bfloat16)] + scratch_shapes
    else:
        inputs = (xe, xo, w_conv, b_conv)
        in_specs = [act_spec, act_spec, wconv_spec, bias_spec]

    kernel = _make_critic_kernel(first, H, W, Cin, Cf)
    out = pl.pallas_call(
        kernel,
        out_shape=jax.ShapeDtypeStruct((B, Ho, Wo * Cf), jnp.float32),
        grid_spec=pltpu.PrefetchScalarGridSpec(
            num_scalar_prefetch=0,
            grid=(B,),
            in_specs=in_specs,
            out_specs=pl.BlockSpec((1, Ho, Wo * Cf), lambda b: (b, 0, 0)),
            scratch_shapes=scratch_shapes,
        ),
        compiler_params=pltpu.CompilerParams(
            dimension_semantics=("parallel",),
            vmem_limit_bytes=_vmem_limit_bytes(),
        ),
    )(*inputs)

    out = out.reshape(B, Ho, Wo, Cf)
    return jnp.transpose(out, (0, 3, 1, 2))                          # NHWC -> NCHW


# ---------------------------------------------------------------------------
# Pure-JAX reference (mirrors the kernel's bf16 matmul-operand rounding)
# ---------------------------------------------------------------------------
def reference_forward(x_nchw, params, first=False):
    dn = ("NHWC", "HWIO", "NHWC")
    Cf = params["w_conv"].shape[-1]
    x = jnp.transpose(x_nchw, (0, 2, 3, 1)).astype(jnp.float32)
    x = x.astype(jnp.bfloat16).astype(jnp.float32)           # activations ship as bf16
    if first:
        Cin = params["w_in"].shape[0]
        w_in = params["w_in"].astype(jnp.bfloat16).astype(jnp.float32)
        x = lax.conv_general_dilated(x, w_in.reshape(1, 1, Cin, Cf),
                                     (1, 1), "VALID", dimension_numbers=dn)
        x = _leaky_relu(x + params["b_in"].reshape(1, 1, 1, Cf))
        x = x.astype(jnp.bfloat16).astype(jnp.float32)       # bf16 in_seq scratch
    w = params["w_conv"].astype(jnp.bfloat16).astype(jnp.float32)    # (3,3,Cf,Cf) HWIO
    y = lax.conv_general_dilated(x, w, (1, 1), ((1, 1), (1, 1)), dimension_numbers=dn)
    y = _leaky_relu(y + params["b_conv"].reshape(1, 1, 1, Cf))
    B, H, W, C = y.shape
    y = y.reshape(B, H // 2, 2, W // 2, 2, C).mean(axis=(2, 4))
    return jnp.transpose(y, (0, 3, 1, 2))


# ---------------------------------------------------------------------------
if __name__ == "__main__":
    B, Cin, H, W = 2, 4, 16, 16
    Cf = 8

    key = jax.random.PRNGKey(0)
    kx1, kx2, k1, k2, k3, k4 = jax.random.split(key, 6)

    x_first = jax.random.normal(kx1, (B, Cin, H, W), dtype=jnp.float32)
    x_mid = jax.random.normal(kx2, (B, Cf, H, W), dtype=jnp.float32)

    params = {
        "w_in":   0.3 * jax.random.normal(k1, (Cin, Cf), dtype=jnp.float32),       # 1x1 conv (IO)
        "b_in":   0.1 * jax.random.normal(k2, (1, Cf), dtype=jnp.float32),
        "w_conv": 0.1 * jax.random.normal(k3, (3, 3, Cf, Cf), dtype=jnp.float32),  # 3x3 conv (HWIO)
        "b_conv": 0.1 * jax.random.normal(k4, (1, Cf), dtype=jnp.float32),
    }

    # first=True : in_sequence + intermediate_sequence
    out1 = jax.block_until_ready(critic_block_forward(x_first, params, first=True))
    assert out1.shape == (B, Cf, H // 2, W // 2), out1.shape
    ref1 = reference_forward(x_first, params, first=True)
    err1 = float(jnp.max(jnp.abs(out1 - ref1)))
    assert jnp.allclose(out1, ref1, rtol=2e-3, atol=2e-3), err1

    # first=False : intermediate_sequence only
    out2 = jax.block_until_ready(critic_block_forward(x_mid, params, first=False))
    assert out2.shape == (B, Cf, H // 2, W // 2), out2.shape
    ref2 = reference_forward(x_mid, params, first=False)
    err2 = float(jnp.max(jnp.abs(out2 - ref2)))
    assert jnp.allclose(out2, ref2, rtol=2e-3, atol=2e-3), err2

    print("KERNEL_OK")
</pallas_src>

<mosaic_0001>
module attributes {stable_mosaic.version = 11 : i64} {
  func.func @kernel(%arg0: i32, %arg1: memref<1x18x9x4xbf16, #tpu.memory_space<vmem>>, %arg2: memref<1x18x9x4xbf16, #tpu.memory_space<vmem>>, %arg3: memref<4x8xbf16, #tpu.memory_space<vmem>>, %arg4: memref<1x8xf32, #tpu.memory_space<vmem>>, %arg5: memref<72x8xbf16, #tpu.memory_space<vmem>>, %arg6: memref<1x8xf32, #tpu.memory_space<vmem>>, %arg7: memref<1x8x64xf32, #tpu.memory_space<vmem>>, %arg8: memref<18x9x8xbf16, #tpu.memory_space<vmem>>, %arg9: memref<18x9x8xbf16, #tpu.memory_space<vmem>>, %arg10: memref<256x72xbf16, #tpu.memory_space<vmem>>) attributes {dimension_semantics = [#tpu.dimension_semantics<parallel>], iteration_bounds = array<i64: 2>, scalar_prefetch = 0 : i64, scratch_operands = 3 : i64, tpu.core_type = #tpu.core_type<tc>, window_params = [{transform_indices = @transform_0, window_bounds = array<i64: 1, 18, 9, 4>}, {transform_indices = @transform_1, window_bounds = array<i64: 1, 18, 9, 4>}, {pipeline_mode = #tpu.pipeline_mode<synchronous>, transform_indices = @transform_2, window_bounds = array<i64: 4, 8>}, {pipeline_mode = #tpu.pipeline_mode<synchronous>, transform_indices = @transform_3, window_bounds = array<i64: 1, 8>}, {pipeline_mode = #tpu.pipeline_mode<synchronous>, transform_indices = @transform_4, window_bounds = array<i64: 72, 8>}, {pipeline_mode = #tpu.pipeline_mode<synchronous>, transform_indices = @transform_5, window_bounds = array<i64: 1, 8>}, {transform_indices = @transform_6, window_bounds = array<i64: 1, 8, 64>}]} {
    %cst = arith.constant 0.000000e+00 : bf16
    %0 = vector.broadcast %cst : bf16 to vector<18x9x8xbf16>
    %c0 = arith.constant 0 : index
    %c0_0 = arith.constant 0 : index
    %c0_1 = arith.constant 0 : index
    %1 = vector.load %arg8[%c0, %c0_0, %c0_1] : memref<18x9x8xbf16, #tpu.memory_space<vmem>>, vector<18x9x8xbf16>
    tpu.vector_store %arg8[%c0, %c0_0, %c0_1], %0 {strides = array<i32>} : memref<18x9x8xbf16, #tpu.memory_space<vmem>>, vector<18x9x8xbf16>,
    %cst_2 = arith.constant 0.000000e+00 : bf16
    %2 = vector.broadcast %cst_2 : bf16 to vector<18x9x8xbf16>
    %c0_3 = arith.constant 0 : index
    %c0_4 = arith.constant 0 : index
    %c0_5 = arith.constant 0 : index
    %3 = vector.load %arg9[%c0_3, %c0_4, %c0_5] : memref<18x9x8xbf16, #tpu.memory_space<vmem>>, vector<18x9x8xbf16>
    tpu.vector_store %arg9[%c0_3, %c0_4, %c0_5], %2 {strides = array<i32>} : memref<18x9x8xbf16, #tpu.memory_space<vmem>>, vector<18x9x8xbf16>,
    %c0_6 = arith.constant 0 : index
    %c0_7 = arith.constant 0 : index
    %c0_8 = arith.constant 0 : index
    %c0_9 = arith.constant 0 : index
    %4 = vector.load %arg1[%c0_6, %c0_7, %c0_8, %c0_9] : memref<1x18x9x4xbf16, #tpu.memory_space<vmem>>, vector<1x18x9x4xbf16>
    %5 = vector.shape_cast %4 : vector<1x18x9x4xbf16> to vector<18x9x4xbf16>
    %6 = vector.extract_strided_slice %5 {offsets = [1, 1, 0], sizes = [16, 8, 4], strides = [1, 1, 1]} : vector<18x9x4xbf16> to vector<16x8x4xbf16>
    %7 = vector.shape_cast %6 : vector<16x8x4xbf16> to vector<128x4xbf16>
    %c0_10 = arith.constant 0 : index
    %c0_11 = arith.constant 0 : index
    %8 = vector.load %arg3[%c0_10, %c0_11] : memref<4x8xbf16, #tpu.memory_space<vmem>>, vector<4x8xbf16>
    %cst_12 = arith.constant dense<0.000000e+00> : vector<128x8xf32>
    %9 = tpu.matmul %7, %8, %cst_12 {dimension_numbers = #tpu.dot_dimension_numbers<[1], [0], [0], [1], [0, 0, 1, 1], [], []>} : vector<128x4xbf16>, vector<4x8xbf16>, vector<128x8xf32> -> vector<128x8xf32>
    %c0_13 = arith.constant 0 : index
    %c0_14 = arith.constant 0 : index
    %10 = vector.load %arg4[%c0_13, %c0_14] : memref<1x8xf32, #tpu.memory_space<vmem>>, vector<1x8xf32>
    %11 = vector.broadcast %10 : vector<1x8xf32> to vector<128x8xf32>
    %12 = arith.addf %9, %11 : vector<128x8xf32>
    %cst_15 = arith.constant 0.000000e+00 : f32
    %13 = vector.broadcast %cst_15 : f32 to vector<128x8xf32>
    %14 = arith.cmpf oge, %12, %13 : vector<128x8xf32>
    %cst_16 = arith.constant 2.000000e-01 : f32
    %15 = vector.broadcast %cst_16 : f32 to vector<128x8xf32>
    %16 = arith.mulf %15, %12 : vector<128x8xf32>
    %17 = arith.select %14, %12, %16 : vector<128x8xi1>, vector<128x8xf32>
    %18 = vector.shape_cast %17 : vector<128x8xf32> to vector<16x8x8xf32>
    %19 = arith.truncf %18 : vector<16x8x8xf32> to vector<16x8x8xbf16>
    %c1 = arith.constant 1 : index
    %c1_17 = arith.constant 1 : index
    %c0_18 = arith.constant 0 : index
    %20 = vector.load %arg8[%c1, %c1_17, %c0_18] : memref<18x9x8xbf16, #tpu.memory_space<vmem>>, vector<16x8x8xbf16>
    tpu.vector_store %arg8[%c1, %c1_17, %c0_18], %19 {strides = array<i32>} : memref<18x9x8xbf16, #tpu.memory_space<vmem>>, vector<16x8x8xbf16>,
    %c0_19 = arith.constant 0 : index
    %c0_20 = arith.constant 0 : index
    %c0_21 = arith.constant 0 : index
    %c0_22 = arith.constant 0 : index
    %21 = vector.load %arg2[%c0_19, %c0_20, %c0_21, %c0_22] : memref<1x18x9x4xbf16, #tpu.memory_space<vmem>>, vector<1x18x9x4xbf16>
    %22 = vector.shape_cast %21 : vector<1x18x9x4xbf16> to vector<18x9x4xbf16>
    %23 = vector.extract_strided_slice %22 {offsets = [1, 0, 0], sizes = [16, 8, 4], strides = [1, 1, 1]} : vector<18x9x4xbf16> to vector<16x8x4xbf16>
    %24 = vector.shape_cast %23 : vector<16x8x4xbf16> to vector<128x4xbf16>
    %c0_23 = arith.constant 0 : index
    %c0_24 = arith.constant 0 : index
    %25 = vector.load %arg3[%c0_23, %c0_24] : memref<4x8xbf16, #tpu.memory_space<vmem>>, vector<4x8xbf16>
    %cst_25 = arith.constant dense<0.000000e+00> : vector<128x8xf32>
    %26 = tpu.matmul %24, %25, %cst_25 {dimension_numbers = #tpu.dot_dimension_numbers<[1], [0], [0], [1], [0, 0, 1, 1], [], []>} : vector<128x4xbf16>, vector<4x8xbf16>, vector<128x8xf32> -> vector<128x8xf32>
    %c0_26 = arith.constant 0 : index
    %c0_27 = arith.constant 0 : index
    %27 = vector.load %arg4[%c0_26, %c0_27] : memref<1x8xf32, #tpu.memory_space<vmem>>, vector<1x8xf32>
    %28 = vector.broadcast %27 : vector<1x8xf32> to vector<128x8xf32>
    %29 = arith.addf %26, %28 : vector<128x8xf32>
    %cst_28 = arith.constant 0.000000e+00 : f32
    %30 = vector.broadcast %cst_28 : f32 to vector<128x8xf32>
    %31 = arith.cmpf oge, %29, %30 : vector<128x8xf32>
    %cst_29 = arith.constant 2.000000e-01 : f32
    %32 = vector.broadcast %cst_29 : f32 to vector<128x8xf32>
    %33 = arith.mulf %32, %29 : vector<128x8xf32>
    %34 = arith.select %31, %29, %33 : vector<128x8xi1>, vector<128x8xf32>
    %35 = vector.shape_cast %34 : vector<128x8xf32> to vector<16x8x8xf32>
    %36 = arith.truncf %35 : vector<16x8x8xf32> to vector<16x8x8xbf16>
    %c1_30 = arith.constant 1 : index
    %c0_31 = arith.constant 0 : index
    %c0_32 = arith.constant 0 : index
    %37 = vector.load %arg9[%c1_30, %c0_31, %c0_32] : memref<18x9x8xbf16, #tpu.memory_space<vmem>>, vector<16x8x8xbf16>
    tpu.vector_store %arg9[%c1_30, %c0_31, %c0_32], %36 {strides = array<i32>} : memref<18x9x8xbf16, #tpu.memory_space<vmem>>, vector<16x8x8xbf16>,
    %c0_33 = arith.constant 0 : index
    %c0_34 = arith.constant 0 : index
    %c0_35 = arith.constant 0 : index
    %38 = vector.load %arg8[%c0_33, %c0_34, %c0_35] : memref<18x9x8xbf16, #tpu.memory_space<vmem>>, vector<18x9x8xbf16>
    %c0_36 = arith.constant 0 : index
    %c0_37 = arith.constant 0 : index
    %c0_38 = arith.constant 0 : index
    %39 = vector.load %arg9[%c0_36, %c0_37, %c0_38] : memref<18x9x8xbf16, #tpu.memory_space<vmem>>, vector<18x9x8xbf16>
    %40 = vector.extract_strided_slice %38 {offsets = [0, 0, 0], sizes = [16, 8, 8], strides = [1, 1, 1]} : vector<18x9x8xbf16> to vector<16x8x8xbf16>
    %41 = vector.shape_cast %40 : vector<16x8x8xbf16> to vector<128x8xbf16>
    %c0_39 = arith.constant 0 : index
    %c0_40 = arith.constant 0 : index
    %42 = vector.load %arg10[%c0_39, %c0_40] : memref<256x72xbf16, #tpu.memory_space<vmem>>, vector<128x8xbf16>
    tpu.vector_store %arg10[%c0_39, %c0_40], %41 {strides = array<i32>} : memref<256x72xbf16, #tpu.memory_space<vmem>>, vector<128x8xbf16>,
    %43 = vector.extract_strided_slice %39 {offsets = [0, 0, 0], sizes = [16, 8, 8], strides = [1, 1, 1]} : vector<18x9x8xbf16> to vector<16x8x8xbf16>
    %44 = vector.shape_cast %43 : vector<16x8x8xbf16> to vector<128x8xbf16>
    %c0_41 = arith.constant 0 : index
    %c8 = arith.constant 8 : index
    %45 = vector.load %arg10[%c0_41, %c8] : memref<256x72xbf16, #tpu.memory_space<vmem>>, vector<128x8xbf16>
    tpu.vector_store %arg10[%c0_41, %c8], %44 {strides = array<i32>} : memref<256x72xbf16, #tpu.memory_space<vmem>>, vector<128x8xbf16>,
    %46 = vector.extract_strided_slice %38 {offsets = [0, 1, 0], sizes = [16, 8, 8], strides = [1, 1, 1]} : vector<18x9x8xbf16> to vector<16x8x8xbf16>
    %47 = vector.shape_cast %46 : vector<16x8x8xbf16> to vector<128x8xbf16>
    %c0_42 = arith.constant 0 : index
    %c16 = arith.constant 16 : index
    %48 = vector.load %arg10[%c0_42, %c16] : memref<256x72xbf16, #tpu.memory_space<vmem>>, vector<128x8xbf16>
    tpu.vector_store %arg10[%c0_42, %c16], %47 {strides = array<i32>} : memref<256x72xbf16, #tpu.memory_space<vmem>>, vector<128x8xbf16>,
    %49 = vector.extract_strided_slice %38 {offsets = [1, 0, 0], sizes = [16, 8, 8], strides = [1, 1, 1]} : vector<18x9x8xbf16> to vector<16x8x8xbf16>
    %50 = vector.shape_cast %49 : vector<16x8x8xbf16> to vector<128x8xbf16>
    %c0_43 = arith.constant 0 : index
    %c24 = arith.constant 24 : index
    %51 = vector.load %arg10[%c0_43, %c24] : memref<256x72xbf16, #tpu.memory_space<vmem>>, vector<128x8xbf16>
    tpu.vector_store %arg10[%c0_43, %c24], %50 {strides = array<i32>} : memref<256x72xbf16, #tpu.memory_space<vmem>>, vector<128x8xbf16>,
    %52 = vector.extract_strided_slice %39 {offsets = [1, 0, 0], sizes = [16, 8, 8], strides = [1, 1, 1]} : vector<18x9x8xbf16> to vector<16x8x8xbf16>
    %53 = vector.shape_cast %52 : vector<16x8x8xbf16> to vector<128x8xbf16>
    %c0_44 = arith.constant 0 : index
    %c32 = arith.constant 32 : index
    %54 = vector.load %arg10[%c0_44, %c32] : memref<256x72xbf16, #tpu.memory_space<vmem>>, vector<128x8xbf16>
    tpu.vector_store %arg10[%c0_44, %c32], %53 {strides = array<i32>} : memref<256x72xbf16, #tpu.memory_space<vmem>>, vector<128x8xbf16>,
    %55 = vector.extract_strided_slice %38 {offsets = [1, 1, 0], sizes = [16, 8, 8], strides = [1, 1, 1]} : vector<18x9x8xbf16> to vector<16x8x8xbf16>
    %56 = vector.shape_cast %55 : vector<16x8x8xbf16> to vector<128x8xbf16>
    %c0_45 = arith.constant 0 : index
    %c40 = arith.constant 40 : index
    %57 = vector.load %arg10[%c0_45, %c40] : memref<256x72xbf16, #tpu.memory_space<vmem>>, vector<128x8xbf16>
    tpu.vector_store %arg10[%c0_45, %c40], %56 {strides = array<i32>} : memref<256x72xbf16, #tpu.memory_space<vmem>>, vector<128x8xbf16>,
    %58 = vector.extract_strided_slice %38 {offsets = [2, 0, 0], sizes = [16, 8, 8], strides = [1, 1, 1]} : vector<18x9x8xbf16> to vector<16x8x8xbf16>
    %59 = vector.shape_cast %58 : vector<16x8x8xbf16> to vector<128x8xbf16>
    %c0_46 = arith.constant 0 : index
    %c48 = arith.constant 48 : index
    %60 = vector.load %arg10[%c0_46, %c48] : memref<256x72xbf16, #tpu.memory_space<vmem>>, vector<128x8xbf16>
    tpu.vector_store %arg10[%c0_46, %c48], %59 {strides = array<i32>} : memref<256x72xbf16, #tpu.memory_space<vmem>>, vector<128x8xbf16>,
    %61 = vector.extract_strided_slice %39 {offsets = [2, 0, 0], sizes = [16, 8, 8], strides = [1, 1, 1]} : vector<18x9x8xbf16> to vector<16x8x8xbf16>
    %62 = vector.shape_cast %61 : vector<16x8x8xbf16> to vector<128x8xbf16>
    %c0_47 = arith.constant 0 : index
    %c56 = arith.constant 56 : index
    %63 = vector.load %arg10[%c0_47, %c56] : memref<256x72xbf16, #tpu.memory_space<vmem>>, vector<128x8xbf16>
    tpu.vector_store %arg10[%c0_47, %c56], %62 {strides = array<i32>} : memref<256x72xbf16, #tpu.memory_space<vmem>>, vector<128x8xbf16>,
    %64 = vector.extract_strided_slice %38 {offsets = [2, 1, 0], sizes = [16, 8, 8], strides = [1, 1, 1]} : vector<18x9x8xbf16> to vector<16x8x8xbf16>
    %65 = vector.shape_cast %64 : vector<16x8x8xbf16> to vector<128x8xbf16>
    %c0_48 = arith.constant 0 : index
    %c64 = arith.constant 64 : index
    %66 = vector.load %arg10[%c0_48, %c64] : memref<256x72xbf16, #tpu.memory_space<vmem>>, vector<128x8xbf16>
    tpu.vector_store %arg10[%c0_48, %c64], %65 {strides = array<i32>} : memref<256x72xbf16, #tpu.memory_space<vmem>>, vector<128x8xbf16>,
    %67 = vector.extract_strided_slice %39 {offsets = [0, 0, 0], sizes = [16, 8, 8], strides = [1, 1, 1]} : vector<18x9x8xbf16> to vector<16x8x8xbf16>
    %68 = vector.shape_cast %67 : vector<16x8x8xbf16> to vector<128x8xbf16>
    %c128 = arith.constant 128 : index
    %c0_49 = arith.constant 0 : index
    %69 = vector.load %arg10[%c128, %c0_49] : memref<256x72xbf16, #tpu.memory_space<vmem>>, vector<128x8xbf16>
    tpu.vector_store %arg10[%c128, %c0_49], %68 {strides = array<i32>} : memref<256x72xbf16, #tpu.memory_space<vmem>>, vector<128x8xbf16>,
    %70 = vector.extract_strided_slice %38 {offsets = [0, 1, 0], sizes = [16, 8, 8], strides = [1, 1, 1]} : vector<18x9x8xbf16> to vector<16x8x8xbf16>
    %71 = vector.shape_cast %70 : vector<16x8x8xbf16> to vector<128x8xbf16>
    %c128_50 = arith.constant 128 : index
    %c8_51 = arith.constant 8 : index
    %72 = vector.load %arg10[%c128_50, %c8_51] : memref<256x72xbf16, #tpu.memory_space<vmem>>, vector<128x8xbf16>
    tpu.vector_store %arg10[%c128_50, %c8_51], %71 {strides = array<i32>} : memref<256x72xbf16, #tpu.memory_space<vmem>>, vector<128x8xbf16>,
    %73 = vector.extract_strided_slice %39 {offsets = [0, 1, 0], sizes = [16, 8, 8], strides = [1, 1, 1]} : vector<18x9x8xbf16> to vector<16x8x8xbf16>
    %74 = vector.shape_cast %73 : vector<16x8x8xbf16> to vector<128x8xbf16>
    %c128_52 = arith.constant 128 : index
    %c16_53 = arith.constant 16 : index
    %75 = vector.load %arg10[%c128_52, %c16_53] : memref<256x72xbf16, #tpu.memory_space<vmem>>, vector<128x8xbf16>
    tpu.vector_store %arg10[%c128_52, %c16_53], %74 {strides = array<i32>} : memref<256x72xbf16, #tpu.memory_space<vmem>>, vector<128x8xbf16>,
    %76 = vector.extract_strided_slice %39 {offsets = [1, 0, 0], sizes = [16, 8, 8], strides = [1, 1, 1]} : vector<18x9x8xbf16> to vector<16x8x8xbf16>
    %77 = vector.shape_cast %76 : vector<16x8x8xbf16> to vector<128x8xbf16>
    %c128_54 = arith.constant 128 : index
    %c24_55 = arith.constant 24 : index
    %78 = vector.load %arg10[%c128_54, %c24_55] : memref<256x72xbf16, #tpu.memory_space<vmem>>, vector<128x8xbf16>
    tpu.vector_store %arg10[%c128_54, %c24_55], %77 {strides = array<i32>} : memref<256x72xbf16, #tpu.memory_space<vmem>>, vector<128x8xbf16>,
    %79 = vector.extract_strided_slice %38 {offsets = [1, 1, 0], sizes = [16, 8, 8], strides = [1, 1, 1]} : vector<18x9x8xbf16> to vector<16x8x8xbf16>
    %80 = vector.shape_cast %79 : vector<16x8x8xbf16> to vector<128x8xbf16>
    %c128_56 = arith.constant 128 : index
    %c32_57 = arith.constant 32 : index
    %81 = vector.load %arg10[%c128_56, %c32_57] : memref<256x72xbf16, #tpu.memory_space<vmem>>, vector<128x8xbf16>
    tpu.vector_store %arg10[%c128_56, %c32_57], %80 {strides = array<i32>} : memref<256x72xbf16, #tpu.memory_space<vmem>>, vector<128x8xbf16>,
    %82 = vector.extract_strided_slice %39 {offsets = [1, 1, 0], sizes = [16, 8, 8], strides = [1, 1, 1]} : vector<18x9x8xbf16> to vector<16x8x8xbf16>
    %83 = vector.shape_cast %82 : vector<16x8x8xbf16> to vector<128x8xbf16>
    %c128_58 = arith.constant 128 : index
    %c40_59 = arith.constant 40 : index
    %84 = vector.load %arg10[%c128_58, %c40_59] : memref<256x72xbf16, #tpu.memory_space<vmem>>, vector<128x8xbf16>
    tpu.vector_store %arg10[%c128_58, %c40_59], %83 {strides = array<i32>} : memref<256x72xbf16, #tpu.memory_space<vmem>>, vector<128x8xbf16>,
    %85 = vector.extract_strided_slice %39 {offsets = [2, 0, 0], sizes = [16, 8, 8], strides = [1, 1, 1]} : vector<18x9x8xbf16> to vector<16x8x8xbf16>
    %86 = vector.shape_cast %85 : vector<16x8x8xbf16> to vector<128x8xbf16>
    %c128_60 = arith.constant 128 : index
    %c48_61 = arith.constant 48 : index
    %87 = vector.load %arg10[%c128_60, %c48_61] : memref<256x72xbf16, #tpu.memory_space<vmem>>, vector<128x8xbf16>
    tpu.vector_store %arg10[%c128_60, %c48_61], %86 {strides = array<i32>} : memref<256x72xbf16, #tpu.memory_space<vmem>>, vector<128x8xbf16>,
    %88 = vector.extract_strided_slice %38 {offsets = [2, 1, 0], sizes = [16, 8, 8], strides = [1, 1, 1]} : vector<18x9x8xbf16> to vector<16x8x8xbf16>
    %89 = vector.shape_cast %88 : vector<16x8x8xbf16> to vector<128x8xbf16>
    %c128_62 = arith.constant 128 : index
    %c56_63 = arith.constant 56 : index
    %90 = vector.load %arg10[%c128_62, %c56_63] : memref<256x72xbf16, #tpu.memory_space<vmem>>, vector<128x8xbf16>
    tpu.vector_store %arg10[%c128_62, %c56_63], %89 {strides = array<i32>} : memref<256x72xbf16, #tpu.memory_space<vmem>>, vector<128x8xbf16>,
    %91 = vector.extract_strided_slice %39 {offsets = [2, 1, 0], sizes = [16, 8, 8], strides = [1, 1, 1]} : vector<18x9x8xbf16> to vector<16x8x8xbf16>
    %92 = vector.shape_cast %91 : vector<16x8x8xbf16> to vector<128x8xbf16>
    %c128_64 = arith.constant 128 : index
    %c64_65 = arith.constant 64 : index
    %93 = vector.load %arg10[%c128_64, %c64_65] : memref<256x72xbf16, #tpu.memory_space<vmem>>, vector<128x8xbf16>
    tpu.vector_store %arg10[%c128_64, %c64_65], %92 {strides = array<i32>} : memref<256x72xbf16, #tpu.memory_space<vmem>>, vector<128x8xbf16>,
    %c0_66 = arith.constant 0 : index
    %c0_67 = arith.constant 0 : index
    %94 = vector.load %arg10[%c0_66, %c0_67] : memref<256x72xbf16, #tpu.memory_space<vmem>>, vector<256x72xbf16>
    %c0_68 = arith.constant 0 : index
    %c0_69 = arith.constant 0 : index
    %95 = vector.load %arg5[%c0_68, %c0_69] : memref<72x8xbf16, #tpu.memory_space<vmem>>, vector<72x8xbf16>
    %cst_70 = arith.constant dense<0.000000e+00> : vector<256x8xf32>
    %96 = tpu.matmul %94, %95, %cst_70 {dimension_numbers = #tpu.dot_dimension_numbers<[1], [0], [0], [1], [0, 0, 1, 1], [], []>} : vector<256x72xbf16>, vector<72x8xbf16>, vector<256x8xf32> -> vector<256x8xf32>
    %c0_71 = arith.constant 0 : index
    %c0_72 = arith.constant 0 : index
    %97 = vector.load %arg6[%c0_71, %c0_72] : memref<1x8xf32, #tpu.memory_space<vmem>>, vector<1x8xf32>
    %98 = vector.broadcast %97 : vector<1x8xf32> to vector<256x8xf32>
    %99 = arith.addf %96, %98 : vector<256x8xf32>
    %cst_73 = arith.constant 0.000000e+00 : f32
    %100 = vector.broadcast %cst_73 : f32 to vector<256x8xf32>
    %101 = arith.cmpf oge, %99, %100 : vector<256x8xf32>
    %cst_74 = arith.constant 2.000000e-01 : f32
    %102 = vector.broadcast %cst_74 : f32 to vector<256x8xf32>
    %103 = arith.mulf %102, %99 : vector<256x8xf32>
    %104 = arith.select %101, %99, %103 : vector<256x8xi1>, vector<256x8xf32>
    %105 = vector.extract_strided_slice %104 {offsets = [0, 0], sizes = [128, 8], strides = [1, 1]} : vector<256x8xf32> to vector<128x8xf32>
    %106 = vector.extract_strided_slice %104 {offsets = [128, 0], sizes = [128, 8], strides = [1, 1]} : vector<256x8xf32> to vector<128x8xf32>
    %107 = arith.addf %105, %106 : vector<128x8xf32>
    %108 = vector.shape_cast %107 : vector<128x8xf32> to vector<8x2x8x8xf32>
    %109 = vector.extract_strided_slice %108 {offsets = [0, 0, 0, 0], sizes = [8, 1, 8, 8], strides = [1, 1, 1, 1]} : vector<8x2x8x8xf32> to vector<8x1x8x8xf32>
    %110 = vector.shape_cast %109 : vector<8x1x8x8xf32> to vector<8x8x8xf32>
    %111 = vector.extract_strided_slice %108 {offsets = [0, 1, 0, 0], sizes = [8, 1, 8, 8], strides = [1, 1, 1, 1]} : vector<8x2x8x8xf32> to vector<8x1x8x8xf32>
    %112 = vector.shape_cast %111 : vector<8x1x8x8xf32> to vector<8x8x8xf32>
    %113 = arith.addf %110, %112 : vector<8x8x8xf32>
    %cst_75 = arith.constant 2.500000e-01 : f32
    %114 = vector.broadcast %cst_75 : f32 to vector<8x8x8xf32>
    %115 = arith.mulf %113, %114 : vector<8x8x8xf32>
    %116 = vector.shape_cast %115 : vector<8x8x8xf32> to vector<8x64xf32>
    %c0_76 = arith.constant 0 : index
    %c0_77 = arith.constant 0 : index
    %c0_78 = arith.constant 0 : index
    %117 = vector.load %arg7[%c0_76, %c0_77, %c0_78] : memref<1x8x64xf32, #tpu.memory_space<vmem>>, vector<1x8x64xf32>
    %118 = vector.shape_cast %117 : vector<1x8x64xf32> to vector<8x64xf32>
    %119 = vector.shape_cast %116 : vector<8x64xf32> to vector<1x8x64xf32>
    tpu.vector_store %arg7[%c0_76, %c0_77, %c0_78], %119 {strides = array<i32>} : memref<1x8x64xf32, #tpu.memory_space<vmem>>, vector<1x8x64xf32>,
    return
  }
  func.func @transform_0(%arg0: i32) -> (i32, i32, i32, i32) {
    %c0_i32 = arith.constant 0 : i32
    %c0_i32_0 = arith.constant 0 : i32
    %c0_i32_1 = arith.constant 0 : i32
    %c0_i32_2 = arith.constant 0 : i32
    return %arg0, %c0_i32, %c0_i32_0, %c0_i32_1 : i32, i32, i32, i32
  }
  func.func @transform_1(%arg0: i32) -> (i32, i32, i32, i32) {
    %c0_i32 = arith.constant 0 : i32
    %c0_i32_0 = arith.constant 0 : i32
    %c0_i32_1 = arith.constant 0 : i32
    %c0_i32_2 = arith.constant 0 : i32
    return %arg0, %c0_i32, %c0_i32_0, %c0_i32_1 : i32, i32, i32, i32
  }
  func.func @transform_2(%arg0: i32) -> (i32, i32) {
    %c0_i32 = arith.constant 0 : i32
    %c0_i32_0 = arith.constant 0 : i32
    %c0_i32_1 = arith.constant 0 : i32
    return %c0_i32, %c0_i32_0 : i32, i32
  }
  func.func @transform_3(%arg0: i32) -> (i32, i32) {
    %c0_i32 = arith.constant 0 : i32
    %c0_i32_0 = arith.constant 0 : i32
    %c0_i32_1 = arith.constant 0 : i32
    return %c0_i32, %c0_i32_0 : i32, i32
  }
  func.func @transform_4(%arg0: i32) -> (i32, i32) {
    %c0_i32 = arith.constant 0 : i32
    %c0_i32_0 = arith.constant 0 : i32
    %c0_i32_1 = arith.constant 0 : i32
    return %c0_i32, %c0_i32_0 : i32, i32
  }
  func.func @transform_5(%arg0: i32) -> (i32, i32) {
    %c0_i32 = arith.constant 0 : i32
    %c0_i32_0 = arith.constant 0 : i32
    %c0_i32_1 = arith.constant 0 : i32
    return %c0_i32, %c0_i32_0 : i32, i32
  }
  func.func @transform_6(%arg0: i32) -> (i32, i32, i32) {
    %c0_i32 = arith.constant 0 : i32
    %c0_i32_0 = arith.constant 0 : i32
    %c0_i32_1 = arith.constant 0 : i32
    return %arg0, %c0_i32, %c0_i32_0 : i32, i32, i32
  }
}

</mosaic_0001>

<bundles_post_ra>
// kernel: tpu_custom_call.1
= control target key start
LH: loop header
LB: loop body
LE: loop exit
PB: predicated region body
PF: predicated region fallthrough
CT: control target
= control target key end

     0   :  { %11 = vsyncpa [#allocation6], 0  ;;  %s5688_s0 = inlined_call_operand.vmem [shape: bf16[2,18,9,4], index: 0, kind: input, shape index: {}]   ;;  %s5689_s1 = inlined_call_operand.vmem [shape: bf16[2,18,9,4], index: 1, kind: input, shape index: {}]   ;;  %s5690_s2 = inlined_call_operand.vmem [shape: bf16[4,8], index: 2, kind: input, shape index: {}]   ;;  %s5691_s3 = inlined_call_operand.vmem [shape: f32[1,8], index: 3, kind: input, shape index: {}]   ;;  %s5692_s4 = inlined_call_operand.vmem [shape: bf16[72,8], index: 4, kind: input, shape index: {}]   ;;  %s5693_s5 = inlined_call_operand.vmem [shape: f32[1,8], index: 5, kind: input, shape index: {}]   ;;  %s5694_s6 = inlined_call_operand.hbm [shape: f32[2,8,64], index: 6, kind: output, shape index: {}]  }
   0x1   :  { %13 = vsyncpa [#allocation6 + $0x1], 0  ;;  %s3934_s21 = smov 0   ;;  %s3936_s22 = smov 0  }
   0x2   :  { %s3938_s23 = smov 0   ;;  %s3940_s24 = smov 0  }
   0x3 LB: > { %s3955_s25 = sadd.s32 4294967295, %s3885_s24   ;;  %s3447_s26 = sadd.s32 4294967294, %s3885_s24   ;;  %s3885_s24 = sphi %s3940_s24, %s5734_s24   ;;  %s3881_s23 = sphi %s3938_s23, %s5733_s23   ;;  %s3877_s22 = sphi %s3936_s22, %s5732_s22   ;;  %s3873_s21 = sphi %s3934_s21, %s5731_s21  }
   0x4   : > { %s3959_s27 = sadd.s32 1, %s3885_s24   ;;  %s162_s28 = sadd.s32 1, %s3881_s23 }
   0x5   : > { %s159_s29 = ssub.s32 %s3885_s24, %s3959_s27  ;;  %p172_p0 = scmp.ne.s32.totalorder %s3881_s23, %s3877_s22 }
   0x6   : > { %p160_p1 = scmp.eq.s32.totalorder %s159_s29, 0  ;;  %p173_p2 = scmp.eq.s32.totalorder %s3955_s25, 1 }
   0x7   : > { %p178_p3 = scmp.ne.s32.totalorder %s3877_s22, %s3873_s21  ;;  %p179_p4 = scmp.eq.s32.totalorder %s3447_s26, 1 }
   0x8   : > { %s3970_s30 = scalar_select %p160_p1, %s3881_s23, %s162_s28  }
   0x9   : > { %p3972_p5 = por %p173_p2, %p172_p0  ;;  %p3976_p6 = por %p179_p4, %p178_p3 }
   0xa   : > { %p3450_p7 = scmp.ge.s32.totalorder %s3885_s24, 1  ;;  %p225_p8 = scmp.lt.s32.totalorder %s3885_s24, 3 }
   0xc   : > { %p226_p9 = pnand %p3450_p7, %p225_p8 }
   0xe   : > { %229 = sbr.rel (%p226_p9) target bundleno = 1027 (0x403), region = 44 }
  0x15   : > { %vm735_vm0 = vcmask 1041408   ;;  %v1224_v0 = vld [vmem:[%s5690_s2] sm:$0x3]  ;;  %p260_p10 = scmp.lt.s32.totalorder %s3955_s25, 1  ;;  %vm271_vm1 = vcmask 60416   ;;  %v3887_v4 = vmov 0  }
  0x16   : > { %3742 = vmatprep.subr.msk.bf16.mxu1 %vm735_vm0, %v1224_v0  ;;  %v1297_v1 = vsel %vm735_vm0, %v1224_v0, 0  ;;  %v678_v2 = vld [vmem:[%s5690_s2] sm:$0x3]  ;;  %359 = vst.msk [vmem:[#allocation3 + $0x18] sm:$0xf] %vm271_vm1, %v3887_v4  ;;  %vm710_vm2 = vcmask 31744  }
  0x17   : > { %3672 = vmatpush3.bf16.msra.mxu1 %v1297_v1  ;;  %s3990_s13 = scalar_select %p260_p10, %s3955_s25, 1  ;;  %3741 = vmatprep.subr.msk.bf16.mxu0 %vm735_vm0, %v678_v2  ;;  %v737_v3 = vsel %vm735_vm0, %v678_v2, 0  ;;  %272 = vst.msk [vmem:[#allocation2] sm:$0xf] %vm271_vm1, %v3887_v4  ;;  %279 = vst.msk [vmem:[#allocation2 + $0x8] sm:$0xf] %vm271_vm1, %v3887_v4 }
  0x18   : > { %283 = vst.msk [vmem:[#allocation2 + $0x10] sm:$0xf] %vm271_vm1, %v3887_v4  ;;  %287 = vst.msk [vmem:[#allocation2 + $0x18] sm:$0xf] %vm271_vm1, %v3887_v4  ;;  %3654 = vmatpush3.bf16.msra.mxu0 %v737_v3  ;;  %vm451_vm3 = vsmask.f32 3328 }
  0x19   : > { %291 = vst.msk [vmem:[#allocation2 + $0x20] sm:$0xf] %vm271_vm1, %v3887_v4  ;;  %295 = vst.msk [vmem:[#allocation2 + $0x28] sm:$0xf] %vm271_vm1, %v3887_v4  ;;  %s3745_s14 = smul.u32 144, %s3990_s13  ;;  %vm273_vm6 = vcmask 57344  }
  0x1a   : > { %299 = vst.msk [vmem:[#allocation2 + $0x30] sm:$0xf] %vm271_vm1, %v3887_v4  ;;  %303 = vst.msk [vmem:[#allocation2 + $0x38] sm:$0xf] %vm271_vm1, %v3887_v4  ;;  %vm452_vm4 = vsmask.f32 7440 }
  0x1b   : > { %307 = vst.msk [vmem:[#allocation2 + $0x40] sm:$0xf] %vm271_vm1, %v3887_v4  ;;  %311 = vst.msk [vmem:[#allocation2 + $0x48] sm:$0xf] %vm271_vm1, %v3887_v4  ;;  %s4032_s17 = scalar_lea.vmem %s5689_s1, %s3745_s14  ;;  %s4041_s20 = scalar_lea.vmem %s5688_s0, %s3745_s14  ;;  %vm274_vm7 = vsmask.f32 256 }
  0x1c   : > { %315 = vst.msk [vmem:[#allocation2 + $0x50] sm:$0xf] %vm271_vm1, %v3887_v4  ;;  %319 = vst.msk [vmem:[#allocation2 + $0x58] sm:$0xf] %vm271_vm1, %v3887_v4  ;;  %v3796_v5 = vld [vmem:[%s4032_s17 + $0x8] ss:$8 sps:$4 sm:$0xff]  }
  0x1d   : > { %323 = vst.msk [vmem:[#allocation2 + $0x60] sm:$0xf] %vm271_vm1, %v3887_v4  ;;  %327 = vst.msk [vmem:[#allocation2 + $0x68] sm:$0xf] %vm271_vm1, %v3887_v4  ;;  %v3797_v6 = vld [vmem:[%s4032_s17 + $0x18] ss:$8 sps:$4 sm:$0xff]   ;;  %3673 = vmatprep.mubr.msk.bf16.mxu1 %vm710_vm2, %v3796_v5 }
  0x1e   : > { %331 = vst.msk [vmem:[#allocation2 + $0x70] sm:$0xf] %vm271_vm1, %v3887_v4  ;;  %335 = vst.msk [vmem:[#allocation2 + $0x78] sm:$0xf] %vm271_vm1, %v3887_v4  ;;  %v3798_v7 = vld [vmem:[%s4032_s17 + $0x28] ss:$8 sps:$4 sm:$0xff]   ;;  %3674 = vmatmul.mubr.msk.bf16.vlgmr.msra.gmra.mrb[0].mxu1 %vm710_vm2, %v3797_v6 }
  0x1f   : > { %339 = vst.msk [vmem:[#allocation2 + $0x80] sm:$0xf] %vm271_vm1, %v3887_v4  ;;  %343 = vst.msk [vmem:[#allocation2 + $0x88] sm:$0xf] %vm271_vm1, %v3887_v4  ;;  %3677 = vmatprep.mubr.msk.bf16.mxu1 %vm710_vm2, %v3798_v7  ;;  %v3799_v8 = vld [vmem:[%s4032_s17 + $0x38] ss:$8 sps:$4 sm:$0xff]  }
  0x20   : > { %347 = vst.msk [vmem:[#allocation3] sm:$0xf] %vm271_vm1, %v3887_v4  ;;  %351 = vst.msk [vmem:[#allocation3 + $0x8] sm:$0xf] %vm271_vm1, %v3887_v4  ;;  %v3800_v9 = vld [vmem:[%s4032_s17 + $0x48] ss:$8 sps:$4 sm:$0xff]  }
  0x21   : > { %355 = vst.msk [vmem:[#allocation3 + $0x10] sm:$0xf] %vm271_vm1, %v3887_v4  ;;  %363 = vst.msk [vmem:[#allocation3 + $0x20] sm:$0xf] %vm271_vm1, %v3887_v4  ;;  %v419_v10 = vld [vmem:[%s4041_s20 + $0x8] sm:$0xf] }
  0x22   : > { %367 = vst.msk [vmem:[#allocation3 + $0x28] sm:$0xf] %vm271_vm1, %v3887_v4  ;;  %371 = vst.msk [vmem:[#allocation3 + $0x30] sm:$0xf] %vm271_vm1, %v3887_v4  ;;  %v420_v11 = vld [vmem:[%s4041_s20 + $0xc] sm:$0x1] }
  0x23   : > { %375 = vst.msk [vmem:[#allocation3 + $0x38] sm:$0xf] %vm271_vm1, %v3887_v4  ;;  %379 = vst.msk [vmem:[#allocation3 + $0x40] sm:$0xf] %vm271_vm1, %v3887_v4  ;;  %v421_v12 = vld [vmem:[%s4041_s20 + $0x10] sm:$0xf] }
  0x24   : > { %383 = vst.msk [vmem:[#allocation3 + $0x48] sm:$0xf] %vm271_vm1, %v3887_v4  ;;  %387 = vst.msk [vmem:[#allocation3 + $0x50] sm:$0xf] %vm271_vm1, %v3887_v4  ;;  %v422_v13 = vld [vmem:[%s4041_s20 + $0x14] sm:$0x1] }
  0x25   : > { %391 = vst.msk [vmem:[#allocation3 + $0x58] sm:$0xf] %vm271_vm1, %v3887_v4  ;;  %395 = vst.msk [vmem:[#allocation3 + $0x60] sm:$0xf] %vm271_vm1, %v3887_v4  ;;  %v455_v14 = vshrl.u32 %v419_v10, 16  ;;  %v458_v15 = vshll.u32 %v419_v10, 16 }
  0x26   : > { %399 = vst.msk [vmem:[#allocation3 + $0x68] sm:$0xf] %vm271_vm1, %v3887_v4  ;;  %403 = vst.msk [vmem:[#allocation3 + $0x70] sm:$0xf] %vm271_vm1, %v3887_v4  ;;  %v464_v16 = vshll.u32 %v420_v11, 16  ;;  %v469_v17 = vshrl.u32 %v421_v12, 16  ;;  %3678 = vmatmul.mubr.msk.bf16.gmra.mrb[4].mxu1 %vm710_vm2, %v3799_v8 }
  0x27   : > { %407 = vst.msk [vmem:[#allocation3 + $0x78] sm:$0xf] %vm271_vm1, %v3887_v4  ;;  %411 = vst.msk [vmem:[#allocation3 + $0x80] sm:$0xf] %vm271_vm1, %v3887_v4  ;;  %v472_v18 = vshll.u32 %v421_v12, 16  ;;  %v478_v19 = vshll.u32 %v422_v13, 16  ;;  %3681 = vmatprep.mubr.msk.bf16.mxu1 %vm710_vm2, %v3800_v9 }
  0x28   : > { %415 = vst.msk [vmem:[#allocation3 + $0x88] sm:$0xf] %vm271_vm1, %v3887_v4  ;;  %v423_v20 = vld [vmem:[%s4041_s20 + $0x18] sm:$0xf]  ;;  %v424_v21 = vld [vmem:[%s4041_s20 + $0x1c] sm:$0x1]  ;;  %vm4060_vm5 = vmor %vm451_vm3, %vm452_vm4 }
  0x29   : > { %v457_v22 = vrot.slane %v455_v14, 4  ;;  %v460_v23 = vrot.slane %v458_v15, 5  ;;  %v466_v24 = vrot.slane %v464_v16, 5  ;;  %v471_v25 = vrot.slane %v469_v17, 4  ;;  %v425_v26 = vld [vmem:[%s4041_s20 + $0x20] sm:$0xf]  ;;  %vm4133_vm8 = vmand %vm273_vm6, %vm274_vm7 }
  0x2a   : > { %v474_v27 = vrot.slane %v472_v18, 5  ;;  %v480_v28 = vrot.slane %v478_v19, 5  ;;  %v426_v29 = vld [vmem:[%s4041_s20 + $0x24] sm:$0x1]  ;;  %v483_v30 = vshrl.u32 %v423_v20, 16  ;;  %v486_v31 = vshll.u32 %v423_v20, 16 }
  0x2b   : > { %v461_v32 = vor.u32 %v460_v23, %v457_v22  ;;  %v492_v33 = vshll.u32 %v424_v21, 16  ;;  %v497_v34 = vshrl.u32 %v425_v26, 16  ;;  %v500_v35 = vshll.u32 %v425_v26, 16  ;;  %v427_v36 = vld [vmem:[%s4041_s20 + $0x28] sm:$0xf]  ;;  %s3888_s29 = smov 8  }
  0x2c   : > { %v475_v38 = vor.u32 %v474_v27, %v471_v25  ;;  %v485_v39 = vrot.slane %v483_v30, 4  ;;  %v488_v40 = vrot.slane %v486_v31, 5  ;;  %v506_v41 = vshll.u32 %v426_v29, 16  ;;  %v428_v42 = vld [vmem:[%s4041_s20 + $0x2c] sm:$0x1]  ;;  %s3889_s9 = smov 24  }
  0x2d   : > { %v3801_v43 = vld [vmem:[%s4032_s17 + $0x58] ss:$8 sps:$4 sm:$0xff]   ;;  %v462_v44 = vrot.slane %v461_v32, 4  ;;  %v494_v45 = vrot.slane %v492_v33, 5  ;;  %v499_v46 = vrot.slane %v497_v34, 4  ;;  %v502_v47 = vrot.slane %v500_v35, 5 }
  0x2e   : > { %v429_v48 = vld [vmem:[%s4041_s20 + $0x30] sm:$0xf]  ;;  %v476_v49 = vrot.slane %v475_v38, 4  ;;  %v489_v50 = vor.u32 %v488_v40, %v485_v39  ;;  %v508_v51 = vrot.slane %v506_v41, 5  ;;  %v430_v52 = vld [vmem:[%s4041_s20 + $0x34] sm:$0x1]  ;;  %3682 = vmatmul.mubr.msk.bf16.gmra.mrb[8].mxu1 %vm710_vm2, %v3801_v43 }
  0x2f   : > { %v511_v53 = vshrl.u32 %v427_v36, 16  ;;  %v467_v54 = vsel %vm4060_vm5, %v462_v44, %v466_v24  ;;  %v503_v55 = vor.u32 %v502_v47, %v499_v46  ;;  %v514_v56 = vshll.u32 %v427_v36, 16  ;;  %v431_v58 = vld [vmem:[%s4041_s20 + $0x38] sm:$0xf]  ;;  %v432_v59 = vld [vmem:[%s4041_s20 + $0x3c] sm:$0x1] }
  0x30   : > { %v520_v57 = vshll.u32 %v428_v42, 16  ;;  %v481_v60 = vsel %vm4060_vm5, %v476_v49, %v480_v28  ;;  %v490_v61 = vrot.slane %v489_v50, 4  ;;  %v525_v63 = vshrl.u32 %v429_v48, 16  ;;  %v433_v0 = vld [vmem:[%s4041_s20 + $0x40] sm:$0xf]  ;;  %s3890_s10 = smov 32  }
  0x31   : > { %v513_v62 = vrot.slane %v511_v53, 4  ;;  %v3455_v1 = vcombine.low %v467_v54, %v481_v60  ;;  %v504_v2 = vrot.slane %v503_v55, 4  ;;  %v516_v3 = vrot.slane %v514_v56, 5  ;;  %v434_v5 = vld [vmem:[%s4041_s20 + $0x44] sm:$0x1]  ;;  %s3891_s11 = smov 48  }
  0x32   : > { %v522_v4 = vrot.slane %v520_v57, 5  ;;  %v495_v6 = vsel %vm4060_vm5, %v490_v61, %v494_v45  ;;  %v527_v7 = vrot.slane %v525_v63, 4  ;;  %v528_v8 = vshll.u32 %v429_v48, 16  ;;  %v3802_v14 = vld [vmem:[%s4032_s17 + $0x68] ss:$8 sps:$4 sm:$0xff]   ;;  %s3892_s12 = smov 56  }
  0x33   : > { %v534_v9 = vshll.u32 %v430_v52, 16  ;;  %3655 = vmatprep.mubr.msk.bf16.mxu0 %vm710_vm2, %v3455_v1  ;;  %v509_v10 = vsel %vm4060_vm5, %v504_v2, %v508_v51  ;;  %v517_v11 = vor.u32 %v516_v3, %v513_v62  ;;  %v539_v12 = vshrl.u32 %v431_v58, 16  ;;  %3685 = vmatprep.mubr.msk.bf16.mxu1 %vm710_vm2, %v3802_v14  ;;  %v3803_v26 = vld [vmem:[%s4032_s17 + $0x78] ss:$8 sps:$4 sm:$0xff]   ;;  %v435_v31 = vld [vmem:[%s4041_s20 + $0x48] sm:$0xf] }
  0x34   : > { %v542_v13 = vshll.u32 %v431_v58, 16  ;;  %v3456_v15 = vcombine.low %v495_v6, %v509_v10  ;;  %v530_v16 = vrot.slane %v528_v8, 5  ;;  %v548_v17 = vshll.u32 %v432_v59, 16  ;;  %v436_v32 = vld [vmem:[%s4041_s20 + $0x4c] sm:$0x1]  ;;  %s3893_s13 = smov 16  }
  0x35   : > { %v518_v18 = vrot.slane %v517_v11, 4  ;;  %v541_v19 = vrot.slane %v539_v12, 4  ;;  %v553_v21 = vshrl.u32 %v433_v0, 16  ;;  %v536_v23 = vrot.slane %v534_v9, 5  ;;  %v437_v36 = vld [vmem:[%s4041_s20 + $0x50] sm:$0xf] }
  0x36   : > { %v544_v20 = vrot.slane %v542_v13, 5  ;;  %3656 = vmatmul.mubr.msk.bf16.vlgmr.msra.gmra.mrb[0].mxu0 %vm710_vm2, %v3456_v15  ;;  %v531_v22 = vor.u32 %v530_v16, %v527_v7  ;;  %v556_v24 = vshll.u32 %v433_v0, 16  ;;  %v562_v25 = vshll.u32 %v434_v5, 16  ;;  %v438_v40 = vld [vmem:[%s4041_s20 + $0x54] sm:$0x1]  ;;  %3686 = vmatmul.mubr.msk.bf16.gmra.mrb[12].mxu1 %vm710_vm2, %v3803_v26  ;;  %s3894_s14 = smov 40  }
  0x37   : > { %v523_v27 = vsel %vm4060_vm5, %v518_v18, %v522_v4  ;;  %v550_v29 = vrot.slane %v548_v17, 5  ;;  %v555_v30 = vrot.slane %v553_v21, 4  ;;  %v567_v38 = vshrl.u32 %v435_v31, 16  ;;  %v439_v48 = vld [vmem:[%s4041_s20 + $0x58] sm:$0xf]  ;;  %s3895_s15 = smov 64  }
  0x38   : > { %v545_v28 = vor.u32 %v544_v20, %v541_v19  ;;  %v532_v33 = vrot.slane %v531_v22, 4  ;;  %v558_v34 = vrot.slane %v556_v24, 5  ;;  %v564_v35 = vrot.slane %v562_v25, 5  ;;  %v440_v49 = vld [vmem:[%s4041_s20 + $0x5c] sm:$0x1]  ;;  %s257_s28 = sand.u32 1, %s3877_s22  }
  0x39   : > { %v570_v41 = vshll.u32 %v435_v31, 16  ;;  %v576_v42 = vshll.u32 %v436_v32, 16  ;;  %v581_v43 = vshrl.u32 %v437_v36, 16  ;;  %v569_v46 = vrot.slane %v567_v38, 4  ;;  %v441_v54 = vld [vmem:[%s4041_s20 + $0x60] sm:$0xf] }
  0x3a   : > { %v546_v39 = vrot.slane %v545_v28, 4  ;;  %v537_v44 = vsel %vm4060_vm5, %v532_v33, %v536_v23  ;;  %v559_v45 = vor.u32 %v558_v34, %v555_v30  ;;  %v584_v47 = vshll.u32 %v437_v36, 16  ;;  %v442_v2 = vld [vmem:[%s4041_s20 + $0x64] sm:$0x1]  ;;  %v443_v4 = vld [vmem:[%s4041_s20 + $0x68] sm:$0xf] }
  0x3b   : > { %v3457_v50 = vcombine.low %v523_v27, %v537_v44  ;;  %v572_v52 = vrot.slane %v570_v41, 5  ;;  %v578_v53 = vrot.slane %v576_v42, 5  ;;  %v583_v56 = vrot.slane %v581_v43, 4  ;;  %v444_v13 = vld [vmem:[%s4041_s20 + $0x6c] sm:$0x1]  ;;  %s3363_s16 = scalar_lea.sflag [#allocation6], %s257_s28 }
  0x3c   : > { %v551_v51 = vsel %vm4060_vm5, %v546_v39, %v550_v29  ;;  %v560_v55 = vrot.slane %v559_v45, 4  ;;  %v586_v57 = vrot.slane %v584_v47, 5  ;;  %v590_v58 = vshll.u32 %v438_v40, 16  ;;  %v445_v17 = vld [vmem:[%s4041_s20 + $0x70] sm:$0xf]  ;;  %s3898_s17 = smov [#allocation5]  }
  0x3d   : > { %3659 = vmatprep.mubr.msk.bf16.mxu0 %vm710_vm2, %v3457_v50  ;;  %v573_v59 = vor.u32 %v572_v52, %v569_v46  ;;  %v595_v60 = vshrl.u32 %v439_v48, 16  ;;  %v598_v61 = vshll.u32 %v439_v48, 16  ;;  %v604_v62 = vshll.u32 %v440_v49, 16  ;;  %v446_v21 = vld [vmem:[%s4041_s20 + $0x74] sm:$0x1]  ;;  %s3827_s18 = sshll.u32 %s3898_s17, 4  ;;  %s3828_s18 = int_to_ptr.vmem [resolvable:$false] %s3827_s18 }
  0x3e   : > { %v565_v63 = vsel %vm4060_vm5, %v560_v55, %v564_v35  ;;  %v587_v0 = vor.u32 %v586_v57, %v583_v56  ;;  %v592_v1 = vrot.slane %v590_v58, 5  ;;  %v609_v3 = vshrl.u32 %v441_v54, 16  ;;  %v447_v23 = vld [vmem:[%s4041_s20 + $0x78] sm:$0xf]  ;;  %v448_v32 = vld [vmem:[%s4041_s20 + $0x7c] sm:$0x1] }
  0x3f   : > { %v3458_v5 = vcombine.low %v551_v51, %v565_v63  ;;  %v574_v6 = vrot.slane %v573_v59, 4  ;;  %v597_v7 = vrot.slane %v595_v60, 4  ;;  %v600_v8 = vrot.slane %v598_v61, 5  ;;  %v449_v36 = vld [vmem:[%s4041_s20 + $0x80] sm:$0xf]  ;;  %s3829_s19 = scalar_lea.vmem %s3828_s18, 256 }
  0x40   : > { %v588_v9 = vrot.slane %v587_v0, 4  ;;  %v606_v10 = vrot.slane %v604_v62, 5  ;;  %v611_v11 = vrot.slane %v609_v3, 4  ;;  %v612_v12 = vshll.u32 %v441_v54, 16  ;;  %v450_v45 = vld [vmem:[%s4041_s20 + $0x84] sm:$0x1] }
  0x41   : > { %3660 = vmatmul.mubr.msk.bf16.gmra.mrb[4].mxu0 %vm710_vm2, %v3458_v5  ;;  %v579_v14 = vsel %vm4060_vm5, %v574_v6, %v578_v53  ;;  %v601_v15 = vor.u32 %v600_v8, %v597_v7  ;;  %v618_v16 = vshll.u32 %v442_v2, 16  ;;  %v623_v18 = vshrl.u32 %v443_v4, 16 }
  0x42   : > { %v593_v19 = vsel %vm4060_vm5, %v588_v9, %v592_v1  ;;  %v614_v20 = vrot.slane %v612_v12, 5  ;;  %v626_v22 = vshll.u32 %v443_v4, 16  ;;  %v632_v27 = vshll.u32 %v444_v13, 16  ;;  %v348_v9 = vld [vmem:[#allocation3 + $0x4] sm:$0x1] }
  0x43   : > { %v3459_v24 = vcombine.low %v579_v14, %v593_v19  ;;  %v602_v25 = vrot.slane %v601_v15, 4  ;;  %v625_v26 = vrot.slane %v623_v18, 4  ;;  %v620_v29 = vrot.slane %v618_v16, 5  ;;  %v360_v13 = vld [vmem:[#allocation3 + $0x1c] sm:$0x1] }
  0x44   : > { %v615_v28 = vor.u32 %v614_v20, %v611_v11  ;;  %v628_v30 = vrot.slane %v626_v22, 5  ;;  %v637_v31 = vshrl.u32 %v445_v17, 16  ;;  %v640_v34 = vshll.u32 %v445_v17, 16  ;;  %v364_v15 = vld [vmem:[#allocation3 + $0x24] sm:$0x1] }
  0x45   : > { %3663 = vmatprep.mubr.msk.bf16.mxu0 %vm710_vm2, %v3459_v24  ;;  %v607_v33 = vsel %vm4060_vm5, %v602_v25, %v606_v10  ;;  %v646_v35 = vshll.u32 %v446_v21, 16  ;;  %v651_v38 = vshrl.u32 %v447_v23, 16  ;;  %v654_v42 = vshll.u32 %v447_v23, 16  ;;  %v352_v10 = vld [vmem:[#allocation3 + $0xc] sm:$0x1] }
  0x46   : > { %v616_v39 = vrot.slane %v615_v28, 4  ;;  %v629_v40 = vor.u32 %v628_v30, %v625_v26  ;;  %v639_v41 = vrot.slane %v637_v31, 4  ;;  %v634_v43 = vrot.slane %v632_v27, 5  ;;  %v288_v17 = vld [vmem:[#allocation2 + $0x1c] sm:$0x1] }
  0x47   : > { %v642_v44 = vrot.slane %v640_v34, 5  ;;  %v653_v46 = vrot.slane %v651_v38, 4  ;;  %v660_v47 = vshll.u32 %v448_v32, 16  ;;  %v656_v50 = vrot.slane %v654_v42, 5  ;;  %v280_v19 = vld [vmem:[#allocation2 + $0xc] sm:$0x1] }
  0x48   : > { %v621_v48 = vsel %vm4060_vm5, %v616_v39, %v620_v29  ;;  %v630_v49 = vrot.slane %v629_v40, 4  ;;  %v665_v51 = vshrl.u32 %v449_v36, 16  ;;  %v648_v54 = vrot.slane %v646_v35, 5  ;;  %v292_v20 = vld [vmem:[#allocation2 + $0x24] sm:$0x1] }
  0x49   : > { %v3460_v52 = vcombine.low %v607_v33, %v621_v48  ;;  %v643_v53 = vor.u32 %v642_v44, %v639_v41  ;;  %v668_v55 = vshll.u32 %v449_v36, 16  ;;  %v657_v56 = vor.u32 %v656_v50, %v653_v46  ;;  %v284_v23 = vld [vmem:[#allocation2 + $0x14] sm:$0x1]  ;;  %v356_v24 = vld [vmem:[#allocation3 + $0x14] sm:$0x1] }
  0x4a   : > { %v667_v57 = vrot.slane %v665_v51, 4  ;;  %v674_v58 = vshll.u32 %v450_v45, 16  ;;  %v635_v59 = vsel %vm4060_vm5, %v630_v49, %v634_v43  ;;  %v662_v61 = vrot.slane %v660_v47, 5  ;;  %v304_v27 = vld [vmem:[#allocation2 + $0x3c] sm:$0x1] }
  0x4b   : > { %3664 = vmatmul.mubr.msk.bf16.gmra.mrb[8].mxu0 %vm710_vm2, %v3460_v52  ;;  %v644_v60 = vrot.slane %v643_v53, 4  ;;  %v670_v62 = vrot.slane %v668_v55, 5  ;;  %v658_v63 = vrot.slane %v657_v56, 4  ;;  %v349_v11 = vsel %vm4133_vm8, 0, %v348_v9  ;;  %v296_v29 = vld [vmem:[#allocation2 + $0x2c] sm:$0x1] }
  0x4c   : > { %v676_v2 = vrot.slane %v674_v58, 5  ;;  %v353_v12 = vsel %vm4133_vm8, 0, %v352_v10  ;;  %350 = vst [vmem:[#allocation3 + $0x4] sm:$0x1] %v349_v11  ;;  %v361_v14 = vsel %vm4133_vm8, 0, %v360_v13  ;;  %v365_v16 = vsel %vm4133_vm8, 0, %v364_v15 }
  0x4d   : > { %v649_v0 = vsel %vm4060_vm5, %v644_v60, %v648_v54  ;;  %v671_v1 = vor.u32 %v670_v62, %v667_v57  ;;  %v663_v4 = vsel %vm4060_vm5, %v658_v63, %v662_v61  ;;  %354 = vst [vmem:[#allocation3 + $0xc] sm:$0x1] %v353_v12  ;;  %362 = vst [vmem:[#allocation3 + $0x1c] sm:$0x1] %v361_v14  ;;  %v289_v18 = vsel %vm4133_vm8, 0, %v288_v17 }
  0x4e   : > { %v3461_v3 = vcombine.low %v635_v59, %v649_v0  ;;  %366 = vst [vmem:[#allocation3 + $0x24] sm:$0x1] %v365_v16  ;;  %290 = vst [vmem:[#allocation2 + $0x1c] sm:$0x1] %v289_v18  ;;  %v281_v21 = vsel %vm4133_vm8, 0, %v280_v19  ;;  %v293_v22 = vsel %vm4133_vm8, 0, %v292_v20 }
  0x4f   : > { %v672_v5 = vrot.slane %v671_v1, 4  ;;  %282 = vst [vmem:[#allocation2 + $0xc] sm:$0x1] %v281_v21  ;;  %294 = vst [vmem:[#allocation2 + $0x24] sm:$0x1] %v293_v22  ;;  %v285_v25 = vsel %vm4133_vm8, 0, %v284_v23 }
  0x50   : > { %3667 = vmatprep.mubr.msk.bf16.mxu0 %vm710_vm2, %v3461_v3  ;;  %v357_v26 = vsel %vm4133_vm8, 0, %v356_v24  ;;  %286 = vst [vmem:[#allocation2 + $0x14] sm:$0x1] %v285_v25  ;;  %v305_v28 = vsel %vm4133_vm8, 0, %v304_v27  ;;  %v297_v30 = vsel %vm4133_vm8, 0, %v296_v29  ;;  %vm1597_vm13 = vcmask 64512  }
  0x51   : > { %v677_v6 = vsel %vm4060_vm5, %v672_v5, %v676_v2  ;;  %358 = vst [vmem:[#allocation3 + $0x14] sm:$0x1] %v357_v26  ;;  %306 = vst [vmem:[#allocation2 + $0x3c] sm:$0x1] %v305_v28  ;;  %v368_v31 = vld [vmem:[#allocation3 + $0x2c] sm:$0x1] }
  0x52   : > { %v3462_v7 = vcombine.low %v663_v4, %v677_v6  ;;  %298 = vst [vmem:[#allocation2 + $0x2c] sm:$0x1] %v297_v30  ;;  %v369_v32 = vsel %vm4133_vm8, 0, %v368_v31  ;;  %v376_v33 = vld [vmem:[#allocation3 + $0x3c] sm:$0x1] }
  0x53   : > { %370 = vst [vmem:[#allocation3 + $0x2c] sm:$0x1] %v369_v32  ;;  %v380_v34 = vld [vmem:[#allocation3 + $0x44] sm:$0x1]  ;;  %v377_v35 = vsel %vm4133_vm8, 0, %v376_v33 }
  0x54   : > { %3668 = vmatmul.mubr.msk.bf16.gmra.mrb[12].mxu0 %vm710_vm2, %v3462_v7  ;;  %v381_v36 = vsel %vm4133_vm8, 0, %v380_v34  ;;  %378 = vst [vmem:[#allocation3 + $0x3c] sm:$0x1] %v377_v35  ;;  %v372_v38 = vld [vmem:[#allocation3 + $0x34] sm:$0x1] }
  0x55   : > { %382 = vst [vmem:[#allocation3 + $0x44] sm:$0x1] %v381_v36  ;;  %v308_v39 = vld [vmem:[#allocation2 + $0x44] sm:$0x1]  ;;  %v373_v40 = vsel %vm4133_vm8, 0, %v372_v38 }
  0x56   : > { %v309_v41 = vsel %vm4133_vm8, 0, %v308_v39  ;;  %374 = vst [vmem:[#allocation3 + $0x34] sm:$0x1] %v373_v40  ;;  %v300_v42 = vld [vmem:[#allocation2 + $0x34] sm:$0x1] }
  0x57   : > { %310 = vst [vmem:[#allocation2 + $0x44] sm:$0x1] %v309_v41  ;;  %v320_v43 = vld [vmem:[#allocation2 + $0x5c] sm:$0x1]  ;;  %v301_v44 = vsel %vm4133_vm8, 0, %v300_v42 }
  0x58   : > { %v321_v45 = vsel %vm4133_vm8, 0, %v320_v43  ;;  %v312_v46 = vld [vmem:[#allocation2 + $0x4c] sm:$0x1]  ;;  %302 = vst [vmem:[#allocation2 + $0x34] sm:$0x1] %v301_v44 }
  0x59   : > { %322 = vst [vmem:[#allocation2 + $0x5c] sm:$0x1] %v321_v45  ;;  %v313_v47 = vsel %vm4133_vm8, 0, %v312_v46  ;;  %v384_v48 = vld [vmem:[#allocation3 + $0x4c] sm:$0x1] }
  0x5a   : > { %314 = vst [vmem:[#allocation2 + $0x4c] sm:$0x1] %v313_v47  ;;  %v385_v49 = vsel %vm4133_vm8, 0, %v384_v48  ;;  %v392_v50 = vld [vmem:[#allocation3 + $0x5c] sm:$0x1] }
  0x5b   : > { %386 = vst [vmem:[#allocation3 + $0x4c] sm:$0x1] %v385_v49  ;;  %v396_v51 = vld [vmem:[#allocation3 + $0x64] sm:$0x1]  ;;  %v388_v52 = vld [vmem:[#allocation3 + $0x54] sm:$0x1] }
  0x5c   : > { %v393_v53 = vsel %vm4133_vm8, 0, %v392_v50  ;;  %v397_v54 = vsel %vm4133_vm8, 0, %v396_v51  ;;  %v389_v55 = vsel %vm4133_vm8, 0, %v388_v52  ;;  %v400_v56 = vld [vmem:[#allocation3 + $0x6c] sm:$0x1] }
  0x5d   : > { %394 = vst [vmem:[#allocation3 + $0x5c] sm:$0x1] %v393_v53  ;;  %398 = vst [vmem:[#allocation3 + $0x64] sm:$0x1] %v397_v54  ;;  %v401_v57 = vsel %vm4133_vm8, 0, %v400_v56 }
  0x5e   : > { %390 = vst [vmem:[#allocation3 + $0x54] sm:$0x1] %v389_v55  ;;  %402 = vst [vmem:[#allocation3 + $0x6c] sm:$0x1] %v401_v57  ;;  %v276_v58 = vld [vmem:[#allocation2 + $0x4] sm:$0x1] }
  0x5f   : > { %v277_v59 = vsel %vm4133_vm8, 0, %v276_v58  ;;  %v4187_v60 = vld [vmem:[#allocation3] sm:$0xf]  ;;  %v4194_v63 = vld [vmem:[%s5691_s3] ss:$0 sm:$0xff] }
  0x60   : > { %278 = vst [vmem:[#allocation2 + $0x4] sm:$0x1] %v277_v59  ;;  %v2272_v61 = vshrl.u32 %v4187_v60, 16  ;;  %v2275_v62 = vshll.u32 %v4187_v60, 16  ;;  %v1514_v3 = vld [vmem:[#allocation3 + $0x4] sm:$0x1] }
  0x61   : > { %v1516_v6 = vld [vmem:[#allocation3 + $0xc] sm:$0x1]  ;;  %v1520_v11 = vld [vmem:[#allocation3 + $0x1c] sm:$0x1]  ;;  %v2281_v15 = vshll.u32 %v1514_v3, 16 }
  0x62   : > { %v2274_v0 = vrot.slane %v2272_v61, 4  ;;  %v2277_v1 = vrot.slane %v2275_v62, 5  ;;  %v2295_v18 = vshll.u32 %v1516_v6, 16  ;;  %v2323_v21 = vshll.u32 %v1520_v11, 16  ;;  %v1522_v32 = vld [vmem:[#allocation3 + $0x24] sm:$0x1] }
  0x63   : > { %v4203_v31 = vrot.slane %v2281_v15, 5  ;;  %v324_v33 = vld [vmem:[#allocation2 + $0x64] sm:$0x1]  ;;  %v316_v40 = vld [vmem:[#allocation2 + $0x54] sm:$0x1]  ;;  %v2337_v49 = vshll.u32 %v1522_v32, 16 }
  0x64   : > { %v2278_v10 = vor.u32 %v2277_v1, %v2274_v0  ;;  %v1518_v38 = vld [vmem:[#allocation3 + $0x14] sm:$0x1]  ;;  %v325_v39 = vsel %vm4133_vm8, 0, %v324_v33  ;;  %v4211_v43 = vrot.slane %v2295_v18, 5  ;;  %v4213_v44 = vrot.slane %v2323_v21, 5 }
  0x65   : > { %326 = vst [vmem:[#allocation2 + $0x64] sm:$0x1] %v325_v39  ;;  %v317_v45 = vsel %vm4133_vm8, 0, %v316_v40  ;;  %v2309_v52 = vshll.u32 %v1518_v38, 16  ;;  %v336_v53 = vld [vmem:[#allocation2 + $0x7c] sm:$0x1] }
  0x66   : > { %v4200_v27 = vrot.slane %v2278_v10, 4  ;;  %318 = vst [vmem:[#allocation2 + $0x54] sm:$0x1] %v317_v45  ;;  %v4220_v56 = vld [vmem:[#allocation3 + $0x2c] sm:$0x1]  ;;  %v337_v57 = vsel %vm4133_vm8, 0, %v336_v53 }
  0x67   : > { %338 = vst [vmem:[#allocation2 + $0x7c] sm:$0x1] %v337_v57  ;;  %v328_v62 = vld [vmem:[#allocation2 + $0x6c] sm:$0x1]  ;;  %v2351_v10 = vshll.u32 %v4220_v56, 16 }
  0x68   : > { %v329_v3 = vsel %vm4133_vm8, 0, %v328_v62  ;;  %vm1110_vm6 = vsmask.f32 7938 }
  0x69   : > { %330 = vst [vmem:[#allocation2 + $0x6c] sm:$0x1] %v329_v3 }
  0xf1   : > { %v3675_v2 = vpop.f32.mrb[0].mxu1 }
  0xf2   : > { %v1342_v4 = vadd.f32 %v3675_v2, %v4194_v63  ;;  %v1333_v5 = vpop.f32.mrb[1].mxu1  ;;  %v4224_v2 = vrot.slane %v2337_v49, 5 }
  0xf3   : > { %v1334_v7 = vadd.f32 %v4194_v63, %v1333_v5  ;;  %v3676_v9 = vpop.f32.mrb[2].mxu1 }
  0xf4   : > { %vm1398_vm9 = vcmp.ge.f32.partialorder %v1342_v4, 0.0  ;;  %v1414_v12 = vmul.f32 0.2, %v1342_v4  ;;  %v1345_v13 = vadd.f32 %v3676_v9, %v4194_v63  ;;  %v1336_v14 = vpop.f32.mrb[3].mxu1  ;;  %v4229_v9 = vrot.slane %v2309_v52, 5 }
  0xf5   : > { %vm1396_vm10 = vcmp.ge.f32.partialorder %v1334_v7, 0.0  ;;  %v1412_v16 = vmul.f32 0.2, %v1334_v7  ;;  %v1337_v17 = vadd.f32 %v4194_v63, %v1336_v14 }
  0xf6   : > { %v1430_v19 = vsel %vm1398_vm9, %v1342_v4, %v1414_v12  ;;  %vm1399_vm11 = vcmp.ge.f32.partialorder %v1345_v13, 0.0  ;;  %v1415_v20 = vmul.f32 0.2, %v1345_v13 }
  0xf7   : > { %v1446_v22 = vpack.c.bf16 %v1430_v19, %v1430_v19  ;;  %v1428_v23 = vsel %vm1396_vm10, %v1334_v7, %v1412_v16  ;;  %vm1397_vm12 = vcmp.ge.f32.partialorder %v1337_v17, 0.0  ;;  %v1413_v24 = vmul.f32 0.2, %v1337_v17 }
  0xf8   : > { %v1444_v25 = vpack.c.bf16 %v1428_v23, %v1428_v23  ;;  %v1431_v26 = vsel %vm1399_vm11, %v1345_v13, %v1415_v20 }
  0xf9   : > { %1463 = vst.msk [vmem:[#allocation3 + $0x18] sm:$0xf] %vm271_vm1, %v1446_v22  ;;  %v1447_v28 = vpack.c.bf16 %v1431_v26, %v1431_v26  ;;  %v1429_v29 = vsel %vm1397_vm12, %v1337_v17, %v1413_v24  ;;  %v3679_v30 = vpop.f32.mrb[4].mxu1  ;;  %v2284_v22 = vsel %vm4060_vm5, %v4200_v27, %v4203_v31 }
  0xfa   : > { %1461 = vst.msk [vmem:[#allocation3 + $0x8] sm:$0xf] %vm271_vm1, %v1444_v25  ;;  %v1445_v34 = vpack.c.bf16 %v1429_v29, %v1429_v29  ;;  %v1358_v35 = vadd.f32 %v3679_v30, %v4194_v63  ;;  %v1349_v36 = vpop.f32.mrb[5].mxu1 }
  0xfb   : > { %1464 = vst.msk [vmem:[#allocation3 + $0x20] sm:$0xf] %vm271_vm1, %v1447_v28  ;;  %v1350_v41 = vadd.f32 %v4194_v63, %v1349_v36  ;;  %v3680_v42 = vpop.f32.mrb[6].mxu1 }
  0xfc   : > { %1462 = vst.msk [vmem:[#allocation3 + $0x10] sm:$0xf] %vm271_vm1, %v1445_v34  ;;  %vm1402_vm14 = vcmp.ge.f32.partialorder %v1358_v35, 0.0  ;;  %v1418_v46 = vmul.f32 0.2, %v1358_v35  ;;  %v1361_v47 = vadd.f32 %v3680_v42, %v4194_v63  ;;  %v1352_v48 = vpop.f32.mrb[7].mxu1 }
  0xfd   : > { %vm1400_vm15 = vcmp.ge.f32.partialorder %v1350_v41, 0.0  ;;  %v1416_v50 = vmul.f32 0.2, %v1350_v41  ;;  %v1353_v51 = vadd.f32 %v4194_v63, %v1352_v48 }
  0xfe   : > { %v1434_v54 = vsel %vm1402_vm14, %v1358_v35, %v1418_v46  ;;  %vm1403_vm0 = vcmp.ge.f32.partialorder %v1361_v47, 0.0  ;;  %v1419_v55 = vmul.f32 0.2, %v1361_v47  ;;  %vm4305_vm14 = vmand %vm271_vm1, %vm1110_vm6 }
  0xff   : > { %v1450_v58 = vpack.c.bf16 %v1434_v54, %v1434_v54  ;;  %v1432_v59 = vsel %vm1400_vm15, %v1350_v41, %v1416_v50  ;;  %vm1401_vm2 = vcmp.ge.f32.partialorder %v1353_v51, 0.0  ;;  %v1417_v61 = vmul.f32 0.2, %v1353_v51 }
 0x100   : > { %v1448_v0 = vpack.c.bf16 %v1432_v59, %v1432_v59  ;;  %v1435_v1 = vsel %vm1403_vm0, %v1361_v47, %v1419_v55  ;;  %v4241_v20 = vld [vmem:[#allocation3 + $0x18] sm:$0xf] }
 0x101   : > { %1467 = vst.msk [vmem:[#allocation3 + $0x38] sm:$0xf] %vm271_vm1, %v1450_v58  ;;  %v1451_v4 = vpack.c.bf16 %v1435_v1, %v1435_v1  ;;  %v1433_v5 = vsel %vm1401_vm2, %v1353_v51, %v1417_v61  ;;  %v3683_v6 = vpop.f32.mrb[8].mxu1  ;;  %v1515_v7 = vld [vmem:[#allocation3 + $0x8] sm:$0xf] }
 0x102   : > { %1465 = vst.msk [vmem:[#allocation3 + $0x28] sm:$0xf] %vm271_vm1, %v1448_v0  ;;  %v1449_v11 = vpack.c.bf16 %v1433_v5, %v1433_v5  ;;  %v1374_v12 = vadd.f32 %v3683_v6, %v4194_v63  ;;  %v1365_v13 = vpop.f32.mrb[9].mxu1  ;;  %v3512_v14 = vcombine.low %v4187_v60, %v1515_v7  ;;  %v2286_v15 = vshrl.u32 %v1515_v7, 16  ;;  %v4235_v16 = vld [vmem:[#allocation3 + $0x20] sm:$0xf] }
 0x103   : > { %1468 = vst.msk [vmem:[#allocation3 + $0x40] sm:$0xf] %vm271_vm1, %v1451_v4  ;;  %v1366_v17 = vadd.f32 %v4194_v63, %v1365_v13  ;;  %v2289_v18 = vshll.u32 %v1515_v7, 16  ;;  %v4239_v19 = vld [vmem:[#allocation3 + $0x10] sm:$0xf]  ;;  %v3684_v21 = vpop.f32.mrb[10].mxu1  ;;  %v3537_v24 = vcombine.low %v4241_v20, %v4235_v16 }
 0x104   : > { %1466 = vst.msk [vmem:[#allocation3 + $0x30] sm:$0xf] %vm271_vm1, %v1449_v11  ;;  %vm1406_vm3 = vcmp.ge.f32.partialorder %v1374_v12, 0.0  ;;  %v1422_v60 = vmul.f32 0.2, %v1374_v12  ;;  %1646 = vrot.lane.b32.xlu0 %v3512_v14, %s3888_s29  ;;  %v4252_v23 = vcombine.low %v4239_v19, %v4241_v20  ;;  %v1368_v26 = vpop.f32.mrb[11].mxu1  ;;  %v3536_v34 = vcombine.low %v1515_v7, %v4239_v19 }
 0x105   : > { %2231 = vst.msk [vmem:[#allocation4 + $0x40] sm:$0xff] %vm1597_vm13, %v3512_v14  ;;  %vm1404_vm4 = vcmp.ge.f32.partialorder %v1366_v17, 0.0  ;;  %v1420_v28 = vmul.f32 0.2, %v1366_v17  ;;  %v2288_v29 = vrot.slane %v2286_v15, 4  ;;  %v2291_v30 = vrot.slane %v2289_v18, 5 }
 0x106   : > { %v1438_v33 = vsel %vm1406_vm3, %v1374_v12, %v1422_v60  ;;  %1648 = vrot.lane.b32.xlu1 %v4252_v23, %s3888_s29  ;;  %2232 = vst.msk [vmem:[#allocation4 + $0x48] sm:$0xff] %vm1597_vm13, %v4252_v23  ;;  %v1377_v42 = vadd.f32 %v3684_v21, %v4194_v63  ;;  %v1369_v4 = vadd.f32 %v4194_v63, %v1368_v26  ;;  %v1124_v14 = vld [vmem:[#allocation2 + $0x18] sm:$0xf]  ;;  %v1127_v15 = vld [vmem:[#allocation2 + $0x1c] sm:$0x1]  ;;  %v4298_v60 = vrot.slane %v2351_v10, 5 }
 0x107   : > { %v1454_v39 = vpack.c.bf16 %v1438_v33, %v1438_v33  ;;  %v1436_v40 = vsel %vm1404_vm4, %v1366_v17, %v1420_v28  ;;  %v2292_v50 = vor.u32 %v2291_v30, %v2288_v29  ;;  %v1130_v10 = vld [vmem:[#allocation2 + $0x20] sm:$0xf] }
 0x108   : > { %v1452_v46 = vpack.c.bf16 %v1436_v40, %v1436_v40  ;;  %2553 = vrot.lane.b32.xlu0 %v3537_v24, %s3889_s9  ;;  %vm1407_vm11 = vcmp.ge.f32.partialorder %v1377_v42, 0.0  ;;  %v1423_v54 = vmul.f32 0.2, %v1377_v42  ;;  %vm1405_vm15 = vcmp.ge.f32.partialorder %v1369_v4, 0.0 }
 0x109   : > { %v3657_v25 = vpop.f32.mrb[0].mxu0  ;;  %1471 = vst.msk [vmem:[#allocation3 + $0x58] sm:$0xf] %vm271_vm1, %v1454_v39  ;;  %v4267_v48 = vld [vmem:[#allocation3 + $0x28] sm:$0xf]  ;;  %v4275_v55 = vpop.f32.mrb[12].mxu1 }
 0x10a   : > { %v773_v32 = vpop.f32.mrb[1].mxu0  ;;  %v782_v35 = vadd.f32 %v3657_v25, %v4194_v63  ;;  %1469 = vst.msk [vmem:[#allocation3 + $0x48] sm:$0xf] %vm271_vm1, %v1452_v46  ;;  %2551 = vrot.lane.b32.xlu1 %v3536_v34, %s3889_s9  ;;  %v4273_v51 = vcombine.low %v4235_v16, %v4267_v48  ;;  %v2293_v59 = vrot.slane %v2292_v50, 4  ;;  %v4278_v62 = vpop.f32.mrb[13].mxu1  ;;  %v1439_v3 = vsel %vm1407_vm11, %v1377_v42, %v1423_v54 }
 0x10b   : > { %v774_v36 = vadd.f32 %v4194_v63, %v773_v32  ;;  %v3658_v38 = vpop.f32.mrb[2].mxu0  ;;  %v4286_v5 = vpop.f32.mrb[14].mxu1  ;;  %v1455_v12 = vpack.c.bf16 %v1439_v3, %v1439_v3  ;;  %v1112_v25 = vld [vmem:[#allocation2 + $0x8] sm:$0xf]  ;;  %v1421_v39 = vmul.f32 0.2, %v1369_v4  ;;  %v1390_v3 = vadd.f32 %v4275_v55, %v4194_v63 }
 0x10c   : > { %v785_v41 = vadd.f32 %v3658_v38, %v4194_v63  ;;  %v776_v45 = vpop.f32.mrb[3].mxu0  ;;  %vm838_vm7 = vcmp.ge.f32.partialorder %v782_v35, 0.0  ;;  %v854_v47 = vmul.f32 0.2, %v782_v35  ;;  %2015 = vrot.lane.b32.xlu0 %v3537_v24, %s3890_s10  ;;  %2233 = vst.msk [vmem:[#allocation4 + $0x50] sm:$0xff] %vm1597_vm13, %v4273_v51  ;;  %v4288_v13 = vpop.f32.mrb[15].mxu1  ;;  %v4294_v21 = vsel %vm4060_vm5, %v2293_v59, %v4211_v43 }
 0x10d   : > { %vm836_vm9 = vcmp.ge.f32.partialorder %v774_v36, 0.0  ;;  %v852_v49 = vmul.f32 0.2, %v774_v36  ;;  %v777_v61 = vadd.f32 %v4194_v63, %v776_v45  ;;  %1472 = vst.msk [vmem:[#allocation3 + $0x60] sm:$0xf] %vm271_vm1, %v1455_v12  ;;  %vm1410_vm2 = vcmp.ge.f32.partialorder %v1390_v3, 0.0 }
 0x10e   : > { %vm839_vm10 = vcmp.ge.f32.partialorder %v785_v41, 0.0  ;;  %v870_v52 = vsel %vm838_vm7, %v782_v35, %v854_v47  ;;  %v855_v53 = vmul.f32 0.2, %v785_v41  ;;  %2013 = vrot.lane.b32.xlu1 %v3536_v34, %s3890_s10  ;;  %v1133_v42 = vld [vmem:[#allocation2 + $0x24] sm:$0x1]  ;;  %v2314_v55 = vshrl.u32 %v4241_v20, 16 }
 0x10f   : > { %v3600_v57 = vpack.c.bf16 %v870_v52, %v870_v52  ;;  %v868_v58 = vsel %vm836_vm9, %v774_v36, %v852_v49  ;;  %vm837_vm12 = vcmp.ge.f32.partialorder %v777_v61, 0.0  ;;  %v853_v30 = vmul.f32 0.2, %v777_v61  ;;  %v1115_v36 = vld [vmem:[#allocation2 + $0xc] sm:$0x1] }
 0x110   : > { %v3598_v0 = vpack.c.bf16 %v868_v58, %v868_v58  ;;  %v871_v1 = vsel %vm839_vm10, %v785_v41, %v855_v53  ;;  %2672 = vrot.lane.b32.xlu0 %v4273_v51, %s3891_s11 }
 0x111   : > { %v965_v6 = vshrl.u32 %v3600_v57, 16  ;;  %v968_v7 = vshll.u32 %v3600_v57, 16  ;;  %v3601_v11 = vpack.c.bf16 %v871_v1, %v871_v1  ;;  %v869_v45 = vsel %vm837_vm12, %v777_v61, %v853_v30 }
 0x112   : > { %v949_v17 = vshrl.u32 %v3598_v0, 16  ;;  %v952_v18 = vshll.u32 %v3598_v0, 16  ;;  %2670 = vrot.lane.b32.xlu1 %v4252_v23, %s3891_s11  ;;  %v3599_v58 = vpack.c.bf16 %v869_v45, %v869_v45  ;;  %v1437_v1 = vsel %vm1405_vm15, %v1369_v4, %v1421_v39 }
 0x113   : > { %v967_v24 = vrot.slane %v965_v6, 7  ;;  %v973_v26 = vshrl.u32 %v3601_v11, 16  ;;  %v976_v28 = vshll.u32 %v3601_v11, 16  ;;  %v1453_v12 = vpack.c.bf16 %v1437_v1, %v1437_v1 }
 0x114   : > { %v3661_v29 = vpop.f32.mrb[4].mxu0  ;;  %v951_v56 = vrot.slane %v949_v17, 7  ;;  %2143 = vrot.lane.b32.xlu0 %v4273_v51, %s3892_s12  ;;  %v957_v6 = vshrl.u32 %v3599_v58, 16  ;;  %v1118_v17 = vld [vmem:[#allocation2 + $0x10] sm:$0xf]  ;;  %v1382_v39 = vadd.f32 %v4194_v63, %v4278_v62 }
 0x115   : > { %v798_v32 = vadd.f32 %v3661_v29, %v4194_v63  ;;  %v4310_v33 = vpop.f32.mrb[5].mxu0  ;;  %v970_v34 = vor.u32 %v968_v7, %v967_v24  ;;  %v971_v35 = vrot.slane %v967_v24, 4  ;;  %v975_v38 = vrot.slane %v973_v26, 7  ;;  %1470 = vst.msk [vmem:[#allocation3 + $0x50] sm:$0xf] %vm271_vm1, %v1453_v12 }
 0x116   : > { %v954_v40 = vor.u32 %v952_v18, %v951_v56  ;;  %v955_v41 = vrot.slane %v951_v56, 4  ;;  %v4315_v46 = vpop.f32.mrb[6].mxu0  ;;  %2141 = vrot.lane.b32.xlu1 %v4252_v23, %s3892_s12  ;;  %v960_v7 = vshll.u32 %v3599_v58, 16  ;;  %v1426_v4 = vmul.f32 0.2, %v1390_v3 }
 0x117   : > { %vm842_vm0 = vcmp.ge.f32.partialorder %v798_v32, 0.0  ;;  %v1125_v47 = vsel %vm4305_vm14, %v970_v34, %v1124_v14  ;;  %v1128_v49 = vsel %vm4133_vm8, %v971_v35, %v1127_v15  ;;  %v978_v50 = vor.u32 %v976_v28, %v975_v38  ;;  %v4321_v53 = vpop.f32.mrb[7].mxu0  ;;  %v4339_v14 = vld [vmem:[#allocation3 + $0x38] sm:$0xf]  ;;  %v4341_v15 = vld [vmem:[#allocation3 + $0x40] sm:$0xf] }
 0x118   : > { %v979_v52 = vrot.slane %v975_v38, 4  ;;  %1126 = vst [vmem:[#allocation2 + $0x18] sm:$0xf] %v1125_v47  ;;  %1129 = vst [vmem:[#allocation2 + $0x1c] sm:$0x1] %v1128_v49  ;;  %v1113_v54 = vsel %vm4305_vm14, %v954_v40, %v1112_v25  ;;  %v1116_v57 = vsel %vm4133_vm8, %v955_v41, %v1115_v36  ;;  %v2328_v24 = vshrl.u32 %v4235_v16, 16  ;;  %1650 = vrot.lane.b32.xlu0 %v4273_v51, %s3888_s29 }
 0x119   : > { %v858_v59 = vmul.f32 0.2, %v798_v32  ;;  %1114 = vst [vmem:[#allocation2 + $0x8] sm:$0xf] %v1113_v54  ;;  %1117 = vst [vmem:[#allocation2 + $0xc] sm:$0x1] %v1116_v57  ;;  %v1131_v61 = vsel %vm4305_vm14, %v978_v50, %v1130_v10  ;;  %v3555_v23 = vcombine.low %v2284_v22, %v4294_v21  ;;  %v1442_v30 = vsel %vm1410_vm2, %v1390_v3, %v1426_v4 }
 0x11a   : > { %v1134_v0 = vsel %vm4133_vm8, %v979_v52, %v1133_v42  ;;  %1132 = vst [vmem:[#allocation2 + $0x20] sm:$0xf] %v1131_v61  ;;  %v959_v25 = vrot.slane %v957_v6, 7  ;;  %v4354_v26 = vld [vmem:[#allocation3 + $0x30] sm:$0xf]  ;;  %v2317_v28 = vshll.u32 %v4241_v20, 16  ;;  %v3539_v51 = vcombine.low %v4339_v14, %v4341_v15 }
 0x11b   : > { %1135 = vst [vmem:[#allocation2 + $0x24] sm:$0x1] %v1134_v0  ;;  %v874_v11 = vsel %vm842_vm0, %v798_v32, %v858_v59  ;;  %v1121_v29 = vld [vmem:[#allocation2 + $0x14] sm:$0x1]  ;;  %2519 = vrot.lane.b32.xlu1 %v3555_v23, %s3893_s13  ;;  %v1148_v22 = vld [vmem:[#allocation2 + $0x38] sm:$0xf]  ;;  %v1458_v34 = vpack.c.bf16 %v1442_v30, %v1442_v30  ;;  %v790_v35 = vadd.f32 %v4194_v63, %v4310_v33 }
 0x11c   : > { %v3604_v18 = vpack.c.bf16 %v874_v11, %v874_v11  ;;  %v962_v27 = vor.u32 %v960_v7, %v959_v25  ;;  %v963_v31 = vrot.slane %v959_v25, 4  ;;  %v2331_v36 = vshll.u32 %v4235_v16, 16  ;;  %v4371_v41 = vld [vmem:[#allocation2] sm:$0xf]  ;;  %v1151_v47 = vld [vmem:[#allocation2 + $0x3c] sm:$0x1]  ;;  %2557 = vrot.lane.b32.xlu0 %v3539_v51, %s3889_s9 }
 0x11d   : > { %v3538_v40 = vcombine.low %v4267_v48, %v4354_v26  ;;  %1475 = vst.msk [vmem:[#allocation3 + $0x78] sm:$0xf] %vm271_vm1, %v1458_v34  ;;  %vm840_vm3 = vcmp.ge.f32.partialorder %v790_v35, 0.0  ;;  %v856_v16 = vmul.f32 0.2, %v790_v35  ;;  %vm1408_vm4 = vcmp.ge.f32.partialorder %v1382_v39, 0.0 }
 0x11e   : > { %v997_v56 = vshrl.u32 %v3604_v18, 16  ;;  %v1000_v10 = vshll.u32 %v3604_v18, 16  ;;  %v4359_v32 = vpop.f32.mrb[8].mxu0  ;;  %v1119_v45 = vsel %vm4305_vm14, %v962_v27, %v1118_v17  ;;  %v1122_v33 = vsel %vm4133_vm8, %v963_v31, %v1121_v29  ;;  %v4389_v6 = vld [vmem:[#allocation3 + $0x48] sm:$0xf] }
 0x11f   : > { %v4364_v20 = vpop.f32.mrb[9].mxu0  ;;  %1120 = vst [vmem:[#allocation2 + $0x10] sm:$0xf] %v1119_v45  ;;  %1123 = vst [vmem:[#allocation2 + $0x14] sm:$0x1] %v1122_v33  ;;  %v872_v54 = vsel %vm840_vm3, %v790_v35, %v856_v16  ;;  %2555 = vrot.lane.b32.xlu1 %v3538_v40, %s3889_s9  ;;  %v2316_v57 = vrot.slane %v2314_v55, 4  ;;  %v3515_v55 = vcombine.low %v4354_v26, %v4339_v14 }
 0x120   : > { %v999_v38 = vrot.slane %v997_v56, 7  ;;  %v4373_v42 = vpop.f32.mrb[10].mxu0  ;;  %v1424_v52 = vmul.f32 0.2, %v1382_v39  ;;  %v2319_v58 = vrot.slane %v2317_v28, 5  ;;  %v1680_v59 = vshrl.u32 %v4371_v41, 16  ;;  %2019 = vrot.lane.b32.xlu0 %v3539_v51, %s3890_s10 }
 0x121   : > { %v4381_v62 = vpop.f32.mrb[11].mxu0  ;;  %v3602_v1 = vpack.c.bf16 %v872_v54, %v872_v54  ;;  %v2330_v12 = vrot.slane %v2328_v24, 4  ;;  %v2333_v17 = vrot.slane %v2331_v36, 5  ;;  %v2300_v23 = vshrl.u32 %v4239_v19, 16  ;;  %2234 = vst.msk [vmem:[#allocation4 + $0x58] sm:$0xff] %vm1597_vm13, %v3515_v55 }
 0x122   : > { %v1002_v49 = vor.u32 %v1000_v10, %v999_v38  ;;  %v1003_v50 = vrot.slane %v999_v38, 4  ;;  %v1440_v3 = vsel %vm1408_vm4, %v1382_v39, %v1424_v52  ;;  %v2320_v11 = vor.u32 %v2319_v58, %v2316_v57 }
 0x123   : > { %v1456_v7 = vpack.c.bf16 %v1440_v3, %v1440_v3  ;;  %v981_v18 = vshrl.u32 %v3602_v1, 16  ;;  %v984_v4 = vshll.u32 %v3602_v1, 16  ;;  %2017 = vrot.lane.b32.xlu1 %v3538_v40, %s3890_s10  ;;  %v2334_v28 = vor.u32 %v2333_v17, %v2330_v12 }
 0x124   : > { %v1149_v61 = vsel %vm4305_vm14, %v1002_v49, %v1148_v22  ;;  %v1152_v0 = vsel %vm4133_vm8, %v1003_v50, %v1151_v47  ;;  %v2321_v25 = vrot.slane %v2320_v11, 4  ;;  %v2303_v29 = vshll.u32 %v4239_v19, 16  ;;  %v1136_v22 = vld [vmem:[#allocation2 + $0x28] sm:$0xf]  ;;  %v1139_v19 = vld [vmem:[#allocation2 + $0x2c] sm:$0x1] }
 0x125   : > { %1150 = vst [vmem:[#allocation2 + $0x38] sm:$0xf] %v1149_v61  ;;  %1153 = vst [vmem:[#allocation2 + $0x3c] sm:$0x1] %v1152_v0  ;;  %v4400_v56 = vcombine.low %v4341_v15, %v4389_v6  ;;  %v983_v10 = vrot.slane %v981_v18, 7  ;;  %v2302_v30 = vrot.slane %v2300_v23, 4  ;;  %v801_v51 = vadd.f32 %v4315_v46, %v4194_v63 }
 0x126   : > { %1473 = vst.msk [vmem:[#allocation3 + $0x68] sm:$0xf] %vm271_vm1, %v1456_v7  ;;  %v793_v27 = vadd.f32 %v4194_v63, %v4321_v53  ;;  %v2326_v34 = vsel %vm4060_vm5, %v2321_v25, %v4213_v44  ;;  %v2335_v35 = vrot.slane %v2334_v28, 4  ;;  %v2305_v36 = vrot.slane %v2303_v29, 5  ;;  %v1154_v25 = vld [vmem:[#allocation2 + $0x40] sm:$0xf] }
 0x127   : > { %v4402_v24 = vpop.f32.mrb[12].mxu0  ;;  %2235 = vst.msk [vmem:[#allocation4 + $0x60] sm:$0xff] %vm1597_vm13, %v4400_v56  ;;  %v814_v38 = vadd.f32 %v4359_v32, %v4194_v63  ;;  %v986_v46 = vor.u32 %v984_v4, %v983_v10  ;;  %v987_v39 = vrot.slane %v983_v10, 4  ;;  %vm843_vm6 = vcmp.ge.f32.partialorder %v801_v51, 0.0  ;;  %2674 = vrot.lane.b32.xlu1 %v3515_v55, %s3891_s11 }
 0x128   : > { %v4409_v31 = vpop.f32.mrb[13].mxu0  ;;  %v859_v53 = vmul.f32 0.2, %v801_v51  ;;  %v4421_v40 = vsel %vm4060_vm5, %v2335_v35, %v4224_v2  ;;  %v2306_v44 = vor.u32 %v2305_v36, %v2302_v30  ;;  %vm841_vm7 = vcmp.ge.f32.partialorder %v793_v27, 0.0 }
 0x129   : > { %v857_v45 = vmul.f32 0.2, %v793_v27  ;;  %v4424_v33 = vpop.f32.mrb[14].mxu0  ;;  %v1137_v47 = vsel %vm4305_vm14, %v986_v46, %v1136_v22  ;;  %v1140_v32 = vsel %vm4133_vm8, %v987_v39, %v1139_v19  ;;  %v3564_v16 = vcombine.low %v2326_v34, %v4421_v40  ;;  %v1142_v22 = vld [vmem:[#allocation2 + $0x30] sm:$0xf] }
 0x12a   : > { %v875_v49 = vsel %vm843_vm6, %v801_v51, %v859_v53  ;;  %v4431_v50 = vpop.f32.mrb[15].mxu0  ;;  %1138 = vst [vmem:[#allocation2 + $0x28] sm:$0xf] %v1137_v47  ;;  %1141 = vst [vmem:[#allocation2 + $0x2c] sm:$0x1] %v1140_v32  ;;  %v2307_v2 = vrot.slane %v2306_v44, 4  ;;  %v806_v11 = vadd.f32 %v4194_v63, %v4364_v20 }
 0x12b   : > { %v3605_v52 = vpack.c.bf16 %v875_v49, %v875_v49  ;;  %v873_v54 = vsel %vm841_vm7, %v793_v27, %v857_v45  ;;  %vm846_vm9 = vcmp.ge.f32.partialorder %v814_v38, 0.0  ;;  %2640 = vrot.lane.b32.xlu0 %v3564_v16, %s3894_s14  ;;  %v862_v58 = vmul.f32 0.2, %v814_v38  ;;  %2145 = vrot.lane.b32.xlu1 %v3515_v55, %s3892_s12  ;;  %v1145_v19 = vld [vmem:[#allocation2 + $0x34] sm:$0x1] }
 0x12c   : > { %v3603_v57 = vpack.c.bf16 %v873_v54, %v873_v54  ;;  %v2342_v61 = vshrl.u32 %v4267_v48, 16  ;;  %v2345_v0 = vshll.u32 %v4267_v48, 16  ;;  %v2312_v1 = vsel %vm4060_vm5, %v2307_v2, %v4229_v9  ;;  %v1157_v9 = vld [vmem:[#allocation2 + $0x44] sm:$0x1]  ;;  %v4447_v53 = vld [vmem:[#allocation3 + $0x3c] sm:$0x1] }
 0x12d   : > { %v1005_v3 = vshrl.u32 %v3605_v52, 16  ;;  %v1008_v7 = vshll.u32 %v3605_v52, 16  ;;  %v3563_v12 = vcombine.low %v4294_v21, %v2312_v1  ;;  %v1683_v4 = vshll.u32 %v4371_v41, 16  ;;  %v4454_v32 = vld [vmem:[#allocation3 + $0x44] sm:$0x1] }
 0x12e   : > { %v989_v17 = vshrl.u32 %v3603_v57, 16  ;;  %v992_v18 = vshll.u32 %v3603_v57, 16  ;;  %v878_v48 = vsel %vm846_vm9, %v814_v38, %v862_v58  ;;  %v2344_v28 = vrot.slane %v2342_v61, 4  ;;  %v1175_v52 = vld [vmem:[#allocation2 + $0x5c] sm:$0x1] }
 0x12f   : > { %v1007_v23 = vrot.slane %v1005_v3, 7  ;;  %v2347_v29 = vrot.slane %v2345_v0, 5  ;;  %1652 = vrot.lane.b32.xlu0 %v3515_v55, %s3888_s29  ;;  %v3608_v30 = vpack.c.bf16 %v878_v48, %v878_v48  ;;  %vm844_vm10 = vcmp.ge.f32.partialorder %v806_v11, 0.0  ;;  %2638 = vrot.lane.b32.xlu1 %v3563_v12, %s3894_s14  ;;  %v4461_v57 = vld [vmem:[#allocation3 + $0x34] sm:$0x1] }
 0x130   : > { %v991_v10 = vrot.slane %v989_v17, 7  ;;  %v860_v51 = vmul.f32 0.2, %v806_v11  ;;  %v3556_v20 = vcombine.low %v2312_v1, %v2326_v34  ;;  %v1172_v34 = vld [vmem:[#allocation2 + $0x58] sm:$0xf]  ;;  %v2379_v61 = vshll.u32 %v4447_v53, 16 }
 0x131   : > { %v1010_v21 = vor.u32 %v1008_v7, %v1007_v23  ;;  %v1011_v27 = vrot.slane %v1007_v23, 4  ;;  %v2348_v35 = vor.u32 %v2347_v29, %v2344_v28  ;;  %v1029_v38 = vshrl.u32 %v3608_v30, 16  ;;  %v4474_v1 = vld [vmem:[#allocation3 + $0x4c] sm:$0x1]  ;;  %v4476_v3 = vld [vmem:[#allocation3 + $0x5c] sm:$0x1] }
 0x132   : > { %v994_v36 = vor.u32 %v992_v18, %v991_v10  ;;  %v995_v46 = vrot.slane %v991_v10, 4  ;;  %v1032_v39 = vshll.u32 %v3608_v30, 16  ;;  %v876_v47 = vsel %vm844_vm10, %v806_v11, %v860_v51  ;;  %v4478_v17 = vld [vmem:[#allocation2 + $0x4] sm:$0x1]  ;;  %v1163_v30 = vld [vmem:[#allocation2 + $0x4c] sm:$0x1] }
 0x133   : > { %v1155_v55 = vsel %vm4305_vm14, %v1010_v21, %v1154_v25  ;;  %v1158_v44 = vsel %vm4133_vm8, %v1011_v27, %v1157_v9  ;;  %v2349_v45 = vrot.slane %v2348_v35, 4  ;;  %2521 = vrot.lane.b32.xlu0 %v3556_v20, %s3893_s13  ;;  %v1031_v2 = vrot.slane %v1029_v38, 7  ;;  %2750 = vrot.lane.b32.xlu1 %v3556_v20, %s3895_s15  ;;  %v4501_v35 = vld [vmem:[#allocation2 + $0x10] sm:$0xf] }
 0x134   : > { %1156 = vst [vmem:[#allocation2 + $0x40] sm:$0xf] %v1155_v55  ;;  %1159 = vst [vmem:[#allocation2 + $0x44] sm:$0x1] %v1158_v44  ;;  %v1143_v16 = vsel %vm4305_vm14, %v994_v36, %v1142_v22  ;;  %v1146_v49 = vsel %vm4133_vm8, %v995_v46, %v1145_v19  ;;  %v3606_v54 = vpack.c.bf16 %v876_v47, %v876_v47  ;;  %v4472_v0 = vrot.slane %v1680_v59, 4 }
 0x135   : > { %1144 = vst [vmem:[#allocation2 + $0x30] sm:$0xf] %v1143_v16  ;;  %1147 = vst [vmem:[#allocation2 + $0x34] sm:$0x1] %v1146_v49  ;;  %v4467_v58 = vsel %vm4060_vm5, %v2349_v45, %v4298_v60  ;;  %v1034_v7 = vor.u32 %v1032_v39, %v1031_v2  ;;  %v1035_v11 = vrot.slane %v1031_v2, 4  ;;  %v4480_v18 = vrot.slane %v1683_v4, 5 }
 0x136   : > { %v1013_v12 = vshrl.u32 %v3606_v54, 16  ;;  %v3557_v60 = vcombine.low %v4421_v40, %v4467_v58  ;;  %v1016_v23 = vshll.u32 %v3606_v54, 16  ;;  %v2393_v25 = vshll.u32 %v4454_v32, 16  ;;  %v1160_v4 = vld [vmem:[#allocation2 + $0x48] sm:$0xf] }
 0x137   : > { %v2365_v59 = vshll.u32 %v4461_v57, 16  ;;  %2676 = vrot.lane.b32.xlu0 %v4400_v56, %s3891_s11  ;;  %v1173_v48 = vsel %vm4305_vm14, %v1034_v7, %v1172_v34  ;;  %v1176_v28 = vsel %vm4133_vm8, %v1035_v11, %v1175_v52  ;;  %v2407_v9 = vshll.u32 %v4474_v1, 16  ;;  %v4499_v19 = vld [vmem:[#allocation2 + $0x18] sm:$0xf]  ;;  %v4506_v46 = vld [vmem:[#allocation3 + $0x58] sm:$0xf] }
 0x138   : > { %v1015_v29 = vrot.slane %v1013_v12, 7  ;;  %v2370_v40 = vshrl.u32 %v4339_v14, 16  ;;  %v2373_v10 = vshll.u32 %v4339_v14, 16  ;;  %1174 = vst [vmem:[#allocation2 + $0x58] sm:$0xf] %v1173_v48  ;;  %2752 = vrot.lane.b32.xlu1 %v3557_v60, %s3895_s15  ;;  %v1689_v51 = vshll.u32 %v4478_v17, 16 }
 0x139   : > { %1177 = vst [vmem:[#allocation2 + $0x5c] sm:$0x1] %v1176_v28  ;;  %v2435_v20 = vshll.u32 %v4476_v3, 16  ;;  %v2384_v21 = vshrl.u32 %v4341_v15, 16  ;;  %v1686_v14 = vor.u32 %v4480_v18, %v4472_v0  ;;  %v2387_v36 = vshll.u32 %v4341_v15, 16 }
 0x13a   : > { %v1018_v27 = vor.u32 %v1016_v23, %v1015_v29  ;;  %v1019_v22 = vrot.slane %v1015_v29, 4  ;;  %v3505_v38 = vcombine.low %v4501_v35, %v4499_v19  ;;  %v1393_v39 = vadd.f32 %v4286_v5, %v4194_v63  ;;  %v1538_v44 = vld [vmem:[#allocation3 + $0x64] sm:$0x1]  ;;  %v1534_v34 = vld [vmem:[#allocation3 + $0x54] sm:$0x1] }
 0x13b   : > { %v1385_v55 = vadd.f32 %v4194_v63, %v4288_v13  ;;  %v2356_v45 = vshrl.u32 %v4354_v26, 16  ;;  %v2359_v47 = vshll.u32 %v4354_v26, 16  ;;  %2147 = vrot.lane.b32.xlu0 %v4400_v56, %s3892_s12  ;;  %v4522_v49 = vld [vmem:[#allocation2 + $0x8] sm:$0xf]  ;;  %v4524_v5 = vld [vmem:[#allocation3 + $0x50] sm:$0xf] }
 0x13c   : > { %v1161_v15 = vsel %vm4305_vm14, %v1018_v27, %v1160_v4  ;;  %v1164_v16 = vsel %vm4133_vm8, %v1019_v22, %v1163_v30  ;;  %2523 = vrot.lane.b32.xlu1 %v3557_v60, %s3893_s13  ;;  %1599 = vst.msk [vmem:[#allocation4 + $0x8] sm:$0xff] %vm1597_vm13, %v3505_v38  ;;  %vm1411_vm11 = vcmp.ge.f32.partialorder %v1393_v39, 0.0  ;;  %v1427_v63 = vmul.f32 0.2, %v1393_v39  ;;  %v1540_v0 = vld [vmem:[#allocation3 + $0x6c] sm:$0x1] }
 0x13d   : > { %1162 = vst [vmem:[#allocation2 + $0x48] sm:$0xf] %v1161_v15  ;;  %1165 = vst [vmem:[#allocation2 + $0x4c] sm:$0x1] %v1164_v16  ;;  %vm1409_vm12 = vcmp.ge.f32.partialorder %v1385_v55, 0.0  ;;  %v3528_v26 = vcombine.low %v4522_v49, %v4501_v35  ;;  %v2372_v2 = vrot.slane %v2370_v40, 4  ;;  %v4534_v18 = vcombine.low %v4524_v5, %v4506_v46 }
 0x13e   : > { %v1425_v13 = vmul.f32 0.2, %v1385_v55  ;;  %v2375_v52 = vrot.slane %v2373_v10, 5  ;;  %v2386_v54 = vrot.slane %v2384_v21, 4  ;;  %v4530_v7 = vld [vmem:[#allocation3 + $0x60] sm:$0xf]  ;;  %v1443_v11 = vsel %vm1411_vm11, %v1393_v39, %v1427_v63 }
 0x13f   : > { %v2389_v17 = vrot.slane %v2387_v36, 5  ;;  %v4536_v60 = vld [vmem:[#allocation3 + $0x68] sm:$0xf]  ;;  %1654 = vrot.lane.b32.xlu0 %v4400_v56, %s3888_s29  ;;  %v4540_v23 = vld [vmem:[#allocation2 + $0x20] sm:$0xf]  ;;  %v1459_v48 = vpack.c.bf16 %v1443_v11, %v1443_v11  ;;  %v2449_v4 = vshll.u32 %v1538_v44, 16  ;;  %v3541_v3 = vcombine.low %v4506_v46, %v4530_v7 }
 0x140   : > { %v1441_v12 = vsel %vm1409_vm12, %v1385_v55, %v1425_v13  ;;  %v4542_v29 = vld [vmem:[#allocation2 + $0x28] sm:$0xf]  ;;  %v2421_v40 = vshll.u32 %v1534_v34, 16  ;;  %1970 = vrot.lane.b32.xlu1 %v3528_v26, %s3889_s9  ;;  %2236 = vst.msk [vmem:[#allocation4 + $0x68] sm:$0xff] %vm1597_vm13, %v4534_v18  ;;  %v4551_v30 = vrot.slane %v1686_v14, 4  ;;  %v4553_v56 = vrot.slane %v1689_v51, 5 }
 0x141   : > { %v1457_v28 = vpack.c.bf16 %v1441_v12, %v1441_v12  ;;  %v4549_v10 = vcombine.low %v4540_v23, %v4542_v29  ;;  %v2463_v21 = vshll.u32 %v1540_v0, 16  ;;  %v3529_v27 = vcombine.low %v4499_v19, %v4540_v23  ;;  %1476 = vst.msk [vmem:[#allocation3 + $0x80] sm:$0xf] %vm271_vm1, %v1459_v48  ;;  %v1480_v0 = vld [vmem:[#allocation2 + $0xc] sm:$0x1] }
 0x142   : > { %v2376_v22 = vor.u32 %v2375_v52, %v2372_v2  ;;  %v2390_v36 = vor.u32 %v2389_v17, %v2386_v54  ;;  %v4561_v39 = vcombine.low %v4530_v7, %v4536_v60  ;;  %v2381_v14 = vrot.slane %v2379_v61, 5  ;;  %v4645_v17 = vld [vmem:[%s5691_s3] ss:$0 sm:$0xff] }
 0x143   : > { %1474 = vst.msk [vmem:[#allocation3 + $0x70] sm:$0xf] %vm271_vm1, %v1457_v28  ;;  %v2395_v51 = vrot.slane %v2393_v25, 5  ;;  %v2358_v55 = vrot.slane %v2356_v45, 4  ;;  %v2361_v44 = vrot.slane %v2359_v47, 5  ;;  %1972 = vrot.lane.b32.xlu0 %v3529_v27, %s3889_s9  ;;  %v2367_v34 = vrot.slane %v2365_v59, 5 }
 0x144   : > { %1600 = vst.msk [vmem:[#allocation4 + $0x10] sm:$0xff] %vm1597_vm13, %v4549_v10  ;;  %2237 = vst.msk [vmem:[#allocation4 + $0x70] sm:$0xff] %vm1597_vm13, %v4561_v39  ;;  %v4576_v53 = vrot.slane %v2407_v9, 5  ;;  %v4580_v32 = vrot.slane %v2435_v20, 5  ;;  %v4582_v61 = vrot.slane %v2449_v4, 5  ;;  %v1694_v25 = vshrl.u32 %v4522_v49, 16  ;;  %2105 = vrot.lane.b32.xlu1 %v3505_v38, %s3891_s11 }
 0x145   : > { %v1697_v45 = vshll.u32 %v4522_v49, 16  ;;  %v4591_v1 = vrot.slane %v2421_v40, 5  ;;  %v2377_v59 = vrot.slane %v2376_v22, 4  ;;  %v2391_v9 = vrot.slane %v2390_v36, 4  ;;  %v4617_v40 = vld [vmem:[#allocation2 + $0x38] sm:$0xf] }
 0x146   : > { %v4595_v20 = vrot.slane %v2463_v21, 5  ;;  %v3540_v38 = vcombine.low %v4389_v6, %v4524_v5  ;;  %v2362_v16 = vor.u32 %v2361_v44, %v2358_v55  ;;  %v1696_v11 = vrot.slane %v1694_v25, 4  ;;  %v4619_v21 = vld [vmem:[#allocation3 + $0x78] sm:$0xf]  ;;  %v4624_v44 = vld [vmem:[#allocation2 + $0x30] sm:$0xf] }
 0x147   : > { %2561 = vrot.lane.b32.xlu0 %v3541_v3, %s3889_s9  ;;  %v1699_v12 = vrot.slane %v1697_v45, 5  ;;  %v2382_v48 = vsel %vm4060_vm5, %v2377_v59, %v2381_v14  ;;  %v4614_v28 = vsel %vm4060_vm5, %v2391_v9, %v2395_v51  ;;  %v2398_v4 = vshrl.u32 %v4389_v6, 16 }
 0x148   : > { %5703 = vst [vmem:[#allocation8_spill] sm:$0xff] %v4595_v20  ;;  %2559 = vrot.lane.b32.xlu1 %v3540_v38, %s3889_s9  ;;  %v2363_v36 = vrot.slane %v2362_v16, 4  ;;  %v2401_v55 = vshll.u32 %v4389_v6, 16  ;;  %v1750_v51 = vshrl.u32 %v4542_v29, 16  ;;  %v4632_v45 = vcombine.low %v4624_v44, %v4617_v40  ;;  %v4680_v20 = vld [vmem:[#allocation2 + $0x40] sm:$0xf] }
 0x149   : > { %v3566_v9 = vcombine.low %v2382_v48, %v4614_v28  ;;  %v1700_v6 = vor.u32 %v1699_v12, %v1696_v11  ;;  %v1703_v16 = vshll.u32 %v1480_v0, 16  ;;  %v2400_v27 = vrot.slane %v2398_v4, 4 }
 0x14a   : > { %v4634_v59 = vld [vmem:[#allocation3 + $0x70] sm:$0xf]  ;;  %1601 = vst.msk [vmem:[#allocation4 + $0x18] sm:$0xff] %vm1597_vm13, %v4632_v45  ;;  %v817_v2 = vadd.f32 %v4645_v17, %v4373_v42  ;;  %v830_v0 = vadd.f32 %v4645_v17, %v4402_v24  ;;  %v822_v11 = vadd.f32 %v4645_v17, %v4409_v31  ;;  %vm1670_vm6 = vcmask 130112  }
 0x14b   : > { %2023 = vrot.lane.b32.xlu0 %v3541_v3, %s3890_s10  ;;  %v3504_v3 = vcombine.low %v4371_v41, %v4522_v49  ;;  %v2368_v41 = vsel %vm4060_vm5, %v2363_v36, %v2367_v34  ;;  %v2403_v49 = vrot.slane %v2401_v55, 5  ;;  %v4660_v12 = vcombine.low %v4634_v59, %v4619_v21 }
 0x14c   : > { %2021 = vrot.lane.b32.xlu1 %v3540_v38, %s3890_s10  ;;  %v809_v38 = vadd.f32 %v4645_v17, %v4381_v62  ;;  %vm847_vm1 = vcmp.ge.f32.partialorder %v817_v2, 0.0  ;;  %v863_v42 = vmul.f32 0.2, %v817_v2  ;;  %vm850_vm0 = vcmp.ge.f32.partialorder %v830_v0, 0.0 }
 0x14d   : > { %1598 = vst.msk [vmem:[#allocation4] sm:$0xff] %vm1597_vm13, %v3504_v3  ;;  %v866_v24 = vmul.f32 0.2, %v830_v0  ;;  %vm848_vm2 = vcmp.ge.f32.partialorder %v822_v11, 0.0  ;;  %v864_v34 = vmul.f32 0.2, %v822_v11  ;;  %v3558_v13 = vcombine.low %v2368_v41, %v2382_v48 }
 0x14e   : > { %vm845_vm15 = vcmp.ge.f32.partialorder %v809_v38, 0.0  ;;  %v861_v62 = vmul.f32 0.2, %v809_v38  ;;  %2238 = vst.msk [vmem:[#allocation4 + $0x78] sm:$0xff] %vm1597_vm13, %v4660_v12  ;;  %v1701_v31 = vrot.slane %v1700_v6, 4  ;;  %v1705_v4 = vrot.slane %v1703_v16, 5 }
 0x14f   : > { %2644 = vrot.lane.b32.xlu0 %v3566_v9, %s3894_s14  ;;  %v879_v36 = vsel %vm847_vm1, %v817_v2, %v863_v42  ;;  %v882_v26 = vsel %vm850_vm0, %v830_v0, %v866_v24  ;;  %v880_v14 = vsel %vm848_vm2, %v822_v11, %v864_v34  ;;  %v2404_v63 = vor.u32 %v2403_v49, %v2400_v27  ;;  %v1178_v2 = vld [vmem:[#allocation2 + $0x60] sm:$0xf]  ;;  %v1196_v49 = vld [vmem:[#allocation2 + $0x78] sm:$0xf]  ;;  %v1184_v34 = vld [vmem:[#allocation2 + $0x68] sm:$0xf] }
 0x150   : > { %2678 = vrot.lane.b32.xlu1 %v4534_v18, %s3891_s11  ;;  %v877_v55 = vsel %vm845_vm15, %v809_v38, %v861_v62  ;;  %v3609_v3 = vpack.c.bf16 %v879_v36, %v879_v36  ;;  %v3612_v22 = vpack.c.bf16 %v882_v26, %v882_v26  ;;  %v3610_v54 = vpack.c.bf16 %v880_v14, %v880_v14  ;;  %v1166_v38 = vld [vmem:[#allocation2 + $0x50] sm:$0xf]  ;;  %v1181_v26 = vld [vmem:[#allocation2 + $0x64] sm:$0x1] }
 0x151   : > { %v3607_v9 = vpack.c.bf16 %v877_v55, %v877_v55  ;;  %v4671_v24 = vrot.slane %v1750_v51, 4  ;;  %v3565_v48 = vcombine.low %v4467_v58, %v2368_v41  ;;  %v2405_v36 = vrot.slane %v2404_v63, 4  ;;  %v1169_v55 = vld [vmem:[#allocation2 + $0x54] sm:$0x1]  ;;  %v1199_v41 = vld [vmem:[#allocation2 + $0x7c] sm:$0x1] }
 0x152   : > { %v1037_v57 = vshrl.u32 %v3609_v3, 16  ;;  %v1040_v52 = vshll.u32 %v3609_v3, 16  ;;  %v1061_v42 = vshrl.u32 %v3612_v22, 16  ;;  %v1064_v62 = vshll.u32 %v3612_v22, 16 }
 0x153   : > { %1656 = vrot.lane.b32.xlu0 %v4534_v18, %s3888_s29  ;;  %v1021_v6 = vshrl.u32 %v3607_v9, 16  ;;  %v1024_v16 = vshll.u32 %v3607_v9, 16  ;;  %v1045_v0 = vshrl.u32 %v3610_v54, 16  ;;  %v1048_v11 = vshll.u32 %v3610_v54, 16  ;;  %v1187_v9 = vld [vmem:[#allocation2 + $0x6c] sm:$0x1] }
 0x154   : > { %2149 = vrot.lane.b32.xlu1 %v4534_v18, %s3892_s12  ;;  %v1039_v27 = vrot.slane %v1037_v57, 7  ;;  %v4677_v18 = vsel %vm4060_vm5, %v1701_v31, %v1705_v4  ;;  %v1063_v22 = vrot.slane %v1061_v42, 7  ;;  %vm1994_vm7 = vcmask 261312  }
 0x155   : > { %v1023_v14 = vrot.slane %v1021_v6, 7  ;;  %v1047_v3 = vrot.slane %v1045_v0, 7  ;;  %vm2037_vm9 = vcmask 326912   ;;  %vm2093_vm10 = vcmask 392512  }
 0x156   : > { %v1042_v54 = vor.u32 %v1040_v52, %v1039_v27  ;;  %v1043_v51 = vrot.slane %v1039_v27, 4  ;;  %v1066_v6 = vor.u32 %v1064_v62, %v1063_v22  ;;  %v1067_v15 = vrot.slane %v1063_v22, 4 }
 0x157   : > { %2525 = vrot.lane.b32.xlu0 %v3558_v13, %s3893_s13  ;;  %v1026_v58 = vor.u32 %v1024_v16, %v1023_v14  ;;  %v1027_v57 = vrot.slane %v1023_v14, 4  ;;  %v1050_v47 = vor.u32 %v1048_v11, %v1047_v3  ;;  %v1051_v25 = vrot.slane %v1047_v3, 4  ;;  %v4706_v11 = vld [vmem:[#allocation3 + $0x80] sm:$0xf]  ;;  %v1484_v14 = vld [vmem:[#allocation2 + $0x1c] sm:$0x1] }
 0x158   : > { %2642 = vrot.lane.b32.xlu1 %v3565_v48, %s3894_s14  ;;  %v1179_v63 = vsel %vm4305_vm14, %v1042_v54, %v1178_v2  ;;  %v1182_v31 = vsel %vm4133_vm8, %v1043_v51, %v1181_v26  ;;  %v1197_v16 = vsel %vm4305_vm14, %v1066_v6, %v1196_v49  ;;  %v1200_v2 = vsel %vm4133_vm8, %v1067_v15, %v1199_v41 }
 0x159   : > { %v1167_v52 = vsel %vm4305_vm14, %v1026_v58, %v1166_v38  ;;  %v1170_v4 = vsel %vm4133_vm8, %v1027_v57, %v1169_v55  ;;  %1180 = vst [vmem:[#allocation2 + $0x60] sm:$0xf] %v1179_v63  ;;  %1183 = vst [vmem:[#allocation2 + $0x64] sm:$0x1] %v1182_v31  ;;  %v1185_v42 = vsel %vm4305_vm14, %v1050_v47, %v1184_v34  ;;  %v5704_v62 = vshll.u32 %v4542_v29, 16 }
 0x15a   : > { %1168 = vst [vmem:[#allocation2 + $0x50] sm:$0xf] %v1167_v52  ;;  %1171 = vst [vmem:[#allocation2 + $0x54] sm:$0x1] %v1170_v4  ;;  %v1188_v38 = vsel %vm4133_vm8, %v1051_v25, %v1187_v9  ;;  %v5705_v15 = vshrl.u32 %v4499_v19, 16  ;;  %v5706_v48 = vshll.u32 %v4499_v19, 16  ;;  %v5708_v55 = vsel %vm4060_vm5, %v4551_v30, %v4553_v56 }
 0x15b   : > { %2107 = vrot.lane.b32.xlu0 %v4549_v10, %s3891_s11  ;;  %v4702_v0 = vrot.slane %v5704_v62, 5  ;;  %v1778_v10 = vshrl.u32 %v4617_v40, 16  ;;  %1198 = vst [vmem:[#allocation2 + $0x78] sm:$0xf] %v1197_v16  ;;  %1201 = vst [vmem:[#allocation2 + $0x7c] sm:$0x1] %v1200_v2  ;;  %v4723_v22 = vcombine.low %v5708_v55, %v4677_v18  ;;  %v3531_v19 = vcombine.low %v4617_v40, %v4680_v20 }
 0x15c   : > { %2754 = vrot.lane.b32.xlu1 %v3558_v13, %s3895_s15  ;;  %1186 = vst [vmem:[#allocation2 + $0x68] sm:$0xf] %v1185_v42  ;;  %1189 = vst [vmem:[#allocation2 + $0x6c] sm:$0x1] %v1188_v38  ;;  %v1724_v47 = vrot.slane %v5705_v15, 4  ;;  %v1727_v25 = vrot.slane %v5706_v48, 5  ;;  %v4735_v58 = vsel %vm4060_vm5, %v2405_v36, %v4576_v53  ;;  %v3530_v56 = vcombine.low %v4542_v29, %v4624_v44 }
 0x15d   : > { %v1781_v27 = vshll.u32 %v4617_v40, 16  ;;  %v1792_v26 = vshrl.u32 %v4680_v20, 16  ;;  %v1795_v13 = vshll.u32 %v4680_v20, 16  ;;  %v5707_v49 = vshrl.u32 %v4506_v46, 16  ;;  %v340_v63 = vld [vmem:[#allocation2 + $0x84] sm:$0x1] }
 0x15e   : > { %v1764_v3 = vshrl.u32 %v4624_v44, 16  ;;  %v5709_v54 = vshll.u32 %v4506_v46, 16  ;;  %v1767_v30 = vshll.u32 %v4624_v44, 16  ;;  %v4742_v57 = vcombine.low %v4619_v21, %v4706_v11  ;;  %v4746_v46 = vld [vmem:[#allocation3 + $0x88] sm:$0xf] }
 0x15f   : > { %v2428_v34 = vrot.slane %v5707_v49, 4  ;;  %2680 = vrot.lane.b32.xlu0 %v4561_v39, %s3891_s11  ;;  %v1728_v41 = vor.u32 %v1727_v25, %v1724_v47  ;;  %v1731_v9 = vshll.u32 %v1484_v14, 16  ;;  %v5710_v53 = vshrl.u32 %v4524_v5, 16  ;;  %v4756_v38 = vld [vmem:[#allocation2 + $0x48] sm:$0xf] }
 0x160   : > { %v2431_v51 = vrot.slane %v5709_v54, 5  ;;  %1927 = vrot.lane.b32.xlu1 %v4723_v22, %s3893_s13  ;;  %v2482_v31 = vshrl.u32 %v4619_v21, 16  ;;  %v2485_v52 = vshll.u32 %v4619_v21, 16  ;;  %v5711_v4 = vshrl.u32 %v4540_v23, 16  ;;  %v1486_v15 = vld [vmem:[#allocation2 + $0x24] sm:$0x1] }
 0x161   : > { %v2414_v36 = vrot.slane %v5710_v53, 4  ;;  %v5712_v2 = vshll.u32 %v4540_v23, 16  ;;  %v3559_v62 = vcombine.low %v4614_v28, %v4735_v58  ;;  %v5713_v48 = vshll.u32 %v4524_v5, 16  ;;  %v332_v5 = vld [vmem:[#allocation2 + $0x74] sm:$0x1] }
 0x162   : > { %v2432_v6 = vor.u32 %v2431_v51, %v2428_v34  ;;  %v1738_v16 = vrot.slane %v5711_v4, 4  ;;  %v4764_v14 = vcombine.low %v4680_v20, %v4756_v38  ;;  %v4770_v23 = vcombine.low %v4536_v60, %v4634_v59  ;;  %v1488_v54 = vld [vmem:[#allocation2 + $0x2c] sm:$0x1] }
 0x163   : > { %v1741_v42 = vrot.slane %v5712_v2, 5  ;;  %v2417_v25 = vrot.slane %v5713_v48, 5  ;;  %2151 = vrot.lane.b32.xlu0 %v4561_v39, %s3892_s12  ;;  %v2468_v49 = vshrl.u32 %v4634_v59, 16  ;;  %v341_v34 = vsel %vm4133_vm8, 0, %v340_v63 }
 0x164   : > { %v2433_v47 = vrot.slane %v2432_v6, 4  ;;  %2756 = vrot.lane.b32.xlu1 %v3559_v62, %s3895_s15  ;;  %v4779_v55 = vcombine.low %v4706_v11, %v4746_v46  ;;  %v1729_v51 = vrot.slane %v1728_v41, 4  ;;  %v1733_v6 = vrot.slane %v1731_v9, 5  ;;  %1602 = vst.msk [vmem:[#allocation4 + $0x20] sm:$0xff] %vm1597_vm13, %v4764_v14  ;;  %342 = vst [vmem:[#allocation2 + $0x84] sm:$0x1] %v341_v34 }
 0x165   : > { %v2418_v53 = vor.u32 %v2417_v25, %v2414_v36  ;;  %v1742_v4 = vor.u32 %v1741_v42, %v1738_v16  ;;  %v1745_v2 = vshll.u32 %v1486_v15, 16  ;;  %v1756_v63 = vor.u32 %v4702_v0, %v4671_v24 }
 0x166   : > { %v833_v48 = vadd.f32 %v4645_v17, %v4424_v33  ;;  %v4790_v28 = vsel %vm4060_vm5, %v2433_v47, %v4580_v32  ;;  %v333_v9 = vsel %vm4133_vm8, 0, %v332_v5  ;;  %v825_v36 = vadd.f32 %v4645_v17, %v4431_v50  ;;  %v4803_v32 = vld [vmem:[#allocation2 + $0x14] sm:$0x1] }
 0x167   : > { %v2419_v41 = vrot.slane %v2418_v53, 4  ;;  %1658 = vrot.lane.b32.xlu0 %v4561_v39, %s3888_s29  ;;  %v1759_v16 = vshll.u32 %v1488_v54, 16  ;;  %v5714_v24 = vshrl.u32 %v4501_v35, 16  ;;  %334 = vst [vmem:[#allocation2 + $0x74] sm:$0x1] %v333_v9  ;;  %v5715_v42 = vshll.u32 %v4501_v35, 16 }
 0x168   : > { %vm851_vm3 = vcmp.ge.f32.partialorder %v833_v48, 0.0  ;;  %v867_v33 = vmul.f32 0.2, %v833_v48  ;;  %2527 = vrot.lane.b32.xlu1 %v3559_v62, %s3893_s13  ;;  %vm849_vm4 = vcmp.ge.f32.partialorder %v825_v36, 0.0  ;;  %v865_v39 = vmul.f32 0.2, %v825_v36 }
 0x169   : > { %v4800_v0 = vrot.slane %v5714_v24, 4  ;;  %v4807_v15 = vrot.slane %v5715_v42, 5  ;;  %v4812_v50 = vsel %vm4060_vm5, %v2419_v41, %v4591_v1  ;;  %v4816_v17 = vsel %vm4060_vm5, %v1729_v51, %v1733_v6 }
 0x16a   : > { %v4818_v47 = vrot.slane %v1745_v2, 5  ;;  %v4822_v62 = vcombine.low %v4812_v50, %v4790_v28  ;;  %v883_v35 = vsel %vm851_vm3, %v833_v48, %v867_v33  ;;  %v1806_v25 = vshrl.u32 %v4756_v38, 16  ;;  %v1202_v33 = vld [vmem:[#allocation2 + $0x80] sm:$0xf] }
 0x16b   : > { %v1809_v34 = vshll.u32 %v4756_v38, 16  ;;  %v3613_v5 = vpack.c.bf16 %v883_v35, %v883_v35  ;;  %v881_v1 = vsel %vm849_vm4, %v825_v36, %v865_v39  ;;  %2239 = vrot.lane.b32.xlu0 %v4723_v22, %s3888_s29  ;;  %v4828_v54 = vrot.slane %v1742_v4, 4  ;;  %v1492_v22 = vld [vmem:[#allocation2 + $0x3c] sm:$0x1]  ;;  %v1190_v39 = vld [vmem:[#allocation2 + $0x70] sm:$0xf] }
 0x16c   : > { %v4830_v51 = vrot.slane %v1756_v63, 4  ;;  %v1717_v6 = vshll.u32 %v4803_v32, 16  ;;  %v3611_v53 = vpack.c.bf16 %v881_v1, %v881_v1  ;;  %1974 = vrot.lane.b32.xlu1 %v3530_v56, %s3889_s9  ;;  %v4837_v2 = vrot.slane %v1759_v16, 5 }
 0x16d   : > { %v1714_v48 = vor.u32 %v4807_v15, %v4800_v0  ;;  %v1069_v41 = vshrl.u32 %v3613_v5, 16  ;;  %v1072_v9 = vshll.u32 %v3613_v5, 16  ;;  %v5716_v4 = vshrl.u32 %v4530_v7, 16  ;;  %v1494_v0 = vld [vmem:[#allocation2 + $0x44] sm:$0x1] }
 0x16e   : > { %v5717_v36 = vshll.u32 %v4530_v7, 16  ;;  %v1053_v32 = vshrl.u32 %v3611_v53, 16  ;;  %v1056_v29 = vshll.u32 %v3611_v53, 16  ;;  %v1808_v56 = vrot.slane %v1806_v25, 4  ;;  %v1205_v7 = vld [vmem:[#allocation2 + $0x84] sm:$0x1] }
 0x16f   : > { %v4843_v63 = vrot.slane %v5716_v4, 4  ;;  %v1811_v16 = vrot.slane %v1809_v34, 5  ;;  %v1071_v42 = vrot.slane %v1069_v41, 7  ;;  %v1780_v15 = vrot.slane %v1778_v10, 4  ;;  %1976 = vrot.lane.b32.xlu0 %v3531_v19, %s3889_s9  ;;  %v1193_v10 = vld [vmem:[#allocation2 + $0x74] sm:$0x1] }
 0x170   : > { %v4847_v24 = vrot.slane %v5717_v36, 5  ;;  %v1055_v35 = vrot.slane %v1053_v32, 7  ;;  %v1783_v5 = vrot.slane %v1781_v27, 5  ;;  %v1787_v1 = vshll.u32 %v1492_v22, 16  ;;  %2109 = vrot.lane.b32.xlu1 %v4632_v45, %s3891_s11  ;;  %v1496_v27 = vld [vmem:[#allocation2 + $0x4c] sm:$0x1] }
 0x171   : > { %v1794_v25 = vrot.slane %v1792_v26, 4  ;;  %v1074_v34 = vor.u32 %v1072_v9, %v1071_v42  ;;  %v1075_v53 = vrot.slane %v1071_v42, 4  ;;  %v2454_v41 = vshrl.u32 %v4536_v60, 16  ;;  %v408_v42 = vld [vmem:[#allocation3 + $0x7c] sm:$0x1] }
 0x172   : > { %v1797_v19 = vrot.slane %v1795_v13, 5  ;;  %v1058_v4 = vor.u32 %v1056_v29, %v1055_v35  ;;  %v1059_v36 = vrot.slane %v1055_v35, 4  ;;  %v2457_v40 = vshll.u32 %v4536_v60, 16 }
 0x173   : > { %v1784_v22 = vor.u32 %v1783_v5, %v1780_v15  ;;  %v1203_v26 = vsel %vm4305_vm14, %v1074_v34, %v1202_v33  ;;  %v1206_v45 = vsel %vm4133_vm8, %v1075_v53, %v1205_v7  ;;  %v1789_v9 = vrot.slane %v1787_v1, 5  ;;  %2565 = vrot.lane.b32.xlu0 %v4742_v57, %s3889_s9  ;;  %v412_v33 = vld [vmem:[#allocation3 + $0x84] sm:$0x1]  ;;  %v416_v1 = vld [vmem:[#allocation3 + $0x8c] sm:$0x1] }
 0x174   : > { %v1798_v32 = vor.u32 %v1797_v19, %v1794_v25  ;;  %1204 = vst [vmem:[#allocation2 + $0x80] sm:$0xf] %v1203_v26  ;;  %1207 = vst [vmem:[#allocation2 + $0x84] sm:$0x1] %v1206_v45  ;;  %v1191_v20 = vsel %vm4305_vm14, %v1058_v4, %v1190_v39  ;;  %v1194_v60 = vsel %vm4133_vm8, %v1059_v36, %v1193_v10  ;;  %v1801_v29 = vshll.u32 %v1494_v0, 16 }
 0x175   : > { %v1785_v13 = vrot.slane %v1784_v22, 4  ;;  %2563 = vrot.lane.b32.xlu1 %v4770_v23, %s3889_s9  ;;  %v1719_v15 = vrot.slane %v1717_v6, 5  ;;  %1192 = vst [vmem:[#allocation2 + $0x70] sm:$0xf] %v1191_v20  ;;  %1195 = vst [vmem:[#allocation2 + $0x74] sm:$0x1] %v1194_v60  ;;  %v1812_v35 = vor.u32 %v1811_v16, %v1808_v56  ;;  %v2446_v43 = vor.u32 %v4847_v24, %v4843_v63 }
 0x176   : > { %v1799_v7 = vrot.slane %v1798_v32, 4  ;;  %v1815_v5 = vshll.u32 %v1496_v27, 16  ;;  %v1715_v25 = vrot.slane %v1714_v48, 4  ;;  %v4879_v39 = vld [vmem:[#allocation2 + $0x58] sm:$0xf]  ;;  %v1803_v34 = vrot.slane %v1801_v29, 5  ;;  %v1647_v4 = vpop.permute.xlu0 %1646 }
 0x177   : > { %v4883_v0 = vsel %vm4060_vm5, %v1785_v13, %v1789_v9  ;;  %v4885_v53 = vld [vmem:[#allocation2 + $0x50] sm:$0xf]  ;;  %v2456_v6 = vrot.slane %v2454_v41, 4  ;;  %v1813_v10 = vrot.slane %v1812_v35, 4  ;;  %2027 = vrot.lane.b32.xlu0 %v4742_v57, %s3890_s10  ;;  %v2459_v48 = vrot.slane %v2457_v40, 5  ;;  %1671 = vst.msk [vmem:[#allocation4] sm:$0xff] %vm1670_vm6, %v1647_v4 }
 0x178   : > { %v1817_v19 = vrot.slane %v1815_v5, 5  ;;  %v4889_v56 = vcombine.low %v4885_v53, %v4879_v39  ;;  %v1804_v63 = vsel %vm4060_vm5, %v1799_v7, %v1803_v34  ;;  %v409_v24 = vsel %vm4133_vm8, 0, %v408_v42  ;;  %v1490_v41 = vld [vmem:[#allocation2 + $0x34] sm:$0x1]  ;;  %v404_v27 = vld [vmem:[#allocation3 + $0x74] sm:$0x1]  ;;  %v1649_v45 = vpop.permute.xlu1 %1648 }
 0x179   : > { %v413_v16 = vsel %vm4133_vm8, 0, %v412_v33  ;;  %2025 = vrot.lane.b32.xlu1 %v4770_v23, %s3890_s10  ;;  %v4905_v57 = vsel %vm4060_vm5, %v4828_v54, %v4818_v47  ;;  %v4912_v40 = vcombine.low %v4883_v0, %v1804_v63  ;;  %410 = vst [vmem:[#allocation3 + $0x7c] sm:$0x1] %v409_v24  ;;  %v417_v23 = vsel %vm4133_vm8, 0, %v416_v1  ;;  %1672 = vst.msk [vmem:[#allocation4 + $0x8] sm:$0xff] %vm1670_vm6, %v1649_v45 }
 0x17a   : > { %v4909_v36 = vsel %vm4060_vm5, %v1813_v10, %v1817_v19  ;;  %1603 = vst.msk [vmem:[#allocation4 + $0x28] sm:$0xff] %vm1597_vm13, %v4889_v56  ;;  %414 = vst [vmem:[#allocation3 + $0x84] sm:$0x1] %v413_v16  ;;  %v1720_v47 = vsel %vm4060_vm5, %v1715_v25, %v1719_v15  ;;  %v2447_v54 = vrot.slane %v2446_v43, 4  ;;  %v2484_v26 = vrot.slane %v2482_v31, 4  ;;  %v4949_v13 = vpop.permute.xlu0 %2553 }
 0x17b   : > { %v4922_v22 = vcombine.low %v1804_v63, %v4909_v36  ;;  %418 = vst [vmem:[#allocation3 + $0x8c] sm:$0x1] %v417_v23  ;;  %v2487_v9 = vrot.slane %v2485_v52, 5  ;;  %v1766_v32 = vrot.slane %v1764_v3, 4  ;;  %v1769_v20 = vrot.slane %v1767_v30, 5  ;;  %2684 = vrot.lane.b32.xlu0 %v4779_v55, %s3891_s11 }
 0x17c   : > { %v1773_v60 = vshll.u32 %v1490_v41, 16  ;;  %v4939_v31 = vsel %vm4060_vm5, %v4830_v51, %v4837_v2  ;;  %v2460_v21 = vor.u32 %v2459_v48, %v2456_v6  ;;  %v4941_v52 = vld [vmem:[#allocation2 + $0x60] sm:$0xf]  ;;  %v405_v3 = vsel %vm4133_vm8, 0, %v404_v27  ;;  %v4947_v30 = vld [vmem:[#allocation2 + $0x68] sm:$0xf]  ;;  %v4968_v5 = vpop.permute.xlu1 %2551 }
 0x17d   : > { %v2470_v44 = vrot.slane %v2468_v49, 4  ;;  %2682 = vrot.lane.b32.xlu1 %v4660_v12, %s3891_s11  ;;  %v1770_v29 = vor.u32 %v1769_v20, %v1766_v32  ;;  %406 = vst [vmem:[#allocation3 + $0x74] sm:$0x1] %v405_v3  ;;  %v5718_v51 = vshll.u32 %v4634_v59, 16  ;;  %v4957_v33 = vcombine.low %v4941_v52, %v4947_v30  ;;  %v4974_v34 = vld [vmem:[#allocation2 + $0x70] sm:$0xf] }
 0x17e   : > { %v1775_v42 = vrot.slane %v1773_v60, 5  ;;  %v3545_v49 = vcombine.low %v4816_v17, %v4905_v57  ;;  %v3544_v15 = vcombine.low %v4677_v18, %v1720_v47  ;;  %v4965_v7 = vsel %vm4060_vm5, %v2447_v54, %v4582_v61  ;;  %v4982_v48 = vpop.permute.xlu0 %2015  ;;  %v4999_v20 = vld [vmem:[#allocation2 + $0x78] sm:$0xf] }
 0x17f   : > { %v2473_v2 = vrot.slane %v5718_v51, 5  ;;  %v1834_v35 = vshrl.u32 %v4879_v39, 16  ;;  %v1837_v59 = vshll.u32 %v4879_v39, 16  ;;  %v1848_v1 = vshrl.u32 %v4941_v52, 16  ;;  %1604 = vst.msk [vmem:[#allocation4 + $0x30] sm:$0xff] %vm1597_vm13, %v4957_v33  ;;  %2155 = vrot.lane.b32.xlu0 %v4779_v55, %s3892_s12 }
 0x180   : > { %v2488_v25 = vor.u32 %v2487_v9, %v2484_v26  ;;  %v1771_v43 = vrot.slane %v1770_v29, 4  ;;  %v2461_v61 = vrot.slane %v2460_v21, 4  ;;  %v1851_v18 = vshll.u32 %v4941_v52, 16  ;;  %v1544_v10 = vld [vmem:[#allocation3 + $0x7c] sm:$0x1]  ;;  %v4997_v54 = vpop.permute.xlu1 %2013 }
 0x181   : > { %v1820_v6 = vshrl.u32 %v4885_v53, 16  ;;  %2153 = vrot.lane.b32.xlu1 %v4660_v12, %s3892_s12  ;;  %v1823_v63 = vshll.u32 %v4885_v53, 16  ;;  %v2491_v24 = vshll.u32 %v1544_v10, 16  ;;  %v2474_v16 = vor.u32 %v2473_v2, %v2470_v44 }
 0x182   : > { %v1776_v55 = vsel %vm4060_vm5, %v1771_v43, %v1775_v42  ;;  %v1862_v23 = vshrl.u32 %v4947_v30, 16  ;;  %v1865_v27 = vshll.u32 %v4947_v30, 16  ;;  %v1836_v26 = vrot.slane %v1834_v35, 4  ;;  %v5007_v29 = vpop.permute.xlu0 %2672 }
 0x183   : > { %v4990_v41 = vcombine.low %v1776_v55, %v4883_v0  ;;  %v4993_v4 = vcombine.low %v4939_v31, %v1776_v55  ;;  %v1839_v45 = vrot.slane %v1837_v59, 5  ;;  %v2489_v9 = vrot.slane %v2488_v25, 4  ;;  %2585 = vrot.lane.b32.xlu0 %v3545_v49, %s3890_s10  ;;  %v1500_v59 = vld [vmem:[#allocation2 + $0x5c] sm:$0x1]  ;;  %v5719_v25 = vld [vmem:[#allocation8_spill] sm:$0xff] }
 0x184   : > { %v2493_v32 = vrot.slane %v2491_v24, 5  ;;  %v5003_v0 = vcombine.low %v1720_v47, %v4816_v17  ;;  %v3568_v60 = vcombine.low %v4790_v28, %v4965_v7  ;;  %v1850_v21 = vrot.slane %v1848_v1, 4  ;;  %v1542_v44 = vld [vmem:[#allocation3 + $0x74] sm:$0x1] }
 0x185   : > { %v1853_v3 = vrot.slane %v1851_v18, 5  ;;  %2583 = vrot.lane.b32.xlu1 %v3544_v15, %s3890_s10  ;;  %v1822_v42 = vrot.slane %v1820_v6, 4  ;;  %v1825_v51 = vrot.slane %v1823_v63, 5  ;;  %v2475_v2 = vrot.slane %v2474_v16, 4  ;;  %v1502_v1 = vld [vmem:[#allocation2 + $0x64] sm:$0x1]  ;;  %v5016_v18 = vpop.permute.xlu1 %2670 }
 0x186   : > { %v2477_v35 = vshll.u32 %v1542_v44, 16  ;;  %v5013_v17 = vsel %vm4060_vm5, %v2461_v61, %v5719_v25  ;;  %v1864_v47 = vrot.slane %v1862_v23, 4  ;;  %v1867_v43 = vrot.slane %v1865_v27, 5  ;;  %v1498_v27 = vld [vmem:[#allocation2 + $0x54] sm:$0x1]  ;;  %v5029_v44 = vpop.permute.xlu0 %2143 }
 0x187   : > { %v1890_v28 = vshrl.u32 %v4999_v20, 16  ;;  %v5020_v10 = vsel %vm4060_vm5, %v2489_v9, %v2493_v32  ;;  %v5024_v63 = vcombine.low %v4974_v34, %v4999_v20  ;;  %v1840_v24 = vor.u32 %v1839_v45, %v1836_v26  ;;  %2071 = vrot.lane.b32.xlu0 %v3545_v49, %s3894_s14  ;;  %5720 = vst [vmem:[#allocation8_spill] sm:$0xff] %v5029_v44  ;;  %v1504_v32 = vld [vmem:[#allocation2 + $0x6c] sm:$0x1]  ;;  %v1508_v44 = vld [vmem:[#allocation2 + $0x7c] sm:$0x1] }
 0x188   : > { %v2479_v6 = vrot.slane %v2477_v35, 5  ;;  %v1893_v61 = vshll.u32 %v4999_v20, 16  ;;  %v1876_v55 = vshrl.u32 %v4974_v34, 16  ;;  %v1843_v16 = vshll.u32 %v1500_v59, 16 }
 0x189   : > { %v1854_v23 = vor.u32 %v1853_v3, %v1850_v21  ;;  %2069 = vrot.lane.b32.xlu1 %v3544_v15, %s3894_s14  ;;  %1605 = vst.msk [vmem:[#allocation4 + $0x38] sm:$0xff] %vm1597_vm13, %v5024_v63  ;;  %v1841_v26 = vrot.slane %v1840_v24, 4  ;;  %v1857_v49 = vshll.u32 %v1502_v1, 16  ;;  %v1826_v45 = vor.u32 %v1825_v51, %v1822_v42  ;;  %v5044_v59 = vpop.permute.xlu1 %2141 }
 0x18a   : > { %v5034_v9 = vsel %vm4060_vm5, %v2475_v2, %v2479_v6  ;;  %v1845_v3 = vrot.slane %v1843_v16, 5  ;;  %v1829_v6 = vshll.u32 %v1498_v27, 16  ;;  %v1868_v19 = vor.u32 %v1867_v43, %v1864_v47  ;;  %v3817_v16 = vld [vmem:[%s5692_s4] sm:$0xff]  }
 0x18b   : > { %v5040_v35 = vcombine.low %v5034_v9, %v5020_v10  ;;  %v3569_v21 = vcombine.low %v5013_v17, %v5034_v9  ;;  %v1855_v15 = vrot.slane %v1854_v23, 4  ;;  %v1859_v2 = vrot.slane %v1857_v49, 5  ;;  %2648 = vrot.lane.b32.xlu0 %v3568_v60, %s3894_s14  ;;  %v1651_v23 = vpop.permute.xlu0 %1650  ;;  %3689 = vmatprep.subr.bf16.mxu0 %v3817_v16 }
 0x18c   : > { %v1827_v25 = vrot.slane %v1826_v45, 4  ;;  %v1846_v42 = vsel %vm4060_vm5, %v1841_v26, %v1845_v3  ;;  %v1871_v51 = vshll.u32 %v1504_v32, 16  ;;  %v1892_v1 = vrot.slane %v1890_v28, 4  ;;  %1673 = vst.msk [vmem:[#allocation4 + $0x10] sm:$0xff] %vm1670_vm6, %v1651_v23  ;;  %3731 = vmatprep.subr.bf16.mxu1 %v3817_v16  ;;  %v1506_v3 = vld [vmem:[#allocation2 + $0x74] sm:$0x1]  ;;  %3690 = vmatpush3.bf16.msra.mxu0 %v3817_v16 }
 0x18d   : > { %v1895_v24 = vrot.slane %v1893_v61, 5  ;;  %2702 = vrot.lane.b32.xlu1 %v5003_v0, %s3892_s12  ;;  %v1879_v27 = vshll.u32 %v4974_v34, 16  ;;  %v1860_v47 = vsel %vm4060_vm5, %v1855_v15, %v1859_v2  ;;  %v1831_v60 = vrot.slane %v1829_v6, 5  ;;  %v5060_v45 = vpop.permute.xlu1 %2519  ;;  %3736 = vmatpush3.bf16.msra.mxu1 %v3817_v16  ;;  %v3818_v2 = vld [vmem:[%s5692_s4 + $0x8] sm:$0xff]  }
 0x18e   : > { %v1869_v43 = vrot.slane %v1868_v19, 4  ;;  %v5058_v26 = vcombine.low %v1846_v42, %v1860_v47  ;;  %v1873_v28 = vrot.slane %v1871_v51, 5  ;;  %v1899_v49 = vshll.u32 %v1508_v44, 16  ;;  %v344_v6 = vld [vmem:[#allocation2 + $0x8c] sm:$0x1]  ;;  %3691 = vmatprep.subr.bf16.mxu0 %v3818_v2  ;;  %3732 = vmatprep.subr.bf16.mxu1 %v3818_v2 }
 0x18f   : > { %v1896_v61 = vor.u32 %v1895_v24, %v1892_v1  ;;  %v1832_v32 = vsel %vm4060_vm5, %v1827_v25, %v1831_v60  ;;  %1660 = vrot.lane.b32.xlu0 %v4660_v12, %s3888_s29  ;;  %v3819_v25 = vld [vmem:[%s5692_s4 + $0x10] sm:$0xff]   ;;  %v1881_v24 = vrot.slane %v1879_v27, 5  ;;  %v1885_v16 = vshll.u32 %v1506_v3, 16  ;;  %v3820_v27 = vld [vmem:[%s5692_s4 + $0x18] sm:$0xff]  }
 0x190   : > { %v5067_v19 = vcombine.low %v4909_v36, %v1832_v32  ;;  %v5069_v15 = vcombine.low %v1832_v32, %v1846_v42  ;;  %v1874_v44 = vsel %vm4060_vm5, %v1869_v43, %v1873_v28  ;;  %v1878_v36 = vrot.slane %v1876_v55, 4  ;;  %v5083_v42 = vpop.permute.xlu0 %2557  ;;  %3692 = vmatpush3.bf16.msra.mxu0 %v3818_v2 }
 0x191   : > { %2190 = vrot.lane.b32.xlu1 %v5003_v0, %s3895_s15  ;;  %v5081_v12 = vcombine.low %v1860_v47, %v1874_v44  ;;  %v1897_v51 = vrot.slane %v1896_v61, 4  ;;  %v1901_v1 = vrot.slane %v1899_v49, 5  ;;  %v5085_v23 = vpop.permute.xlu1 %2555  ;;  %v3567_v60 = vcombine.low %v4735_v58, %v4812_v50  ;;  %3737 = vmatpush3.bf16.msra.mxu1 %v3818_v2  ;;  %v3821_v49 = vld [vmem:[%s5692_s4 + $0x20] ss:$0 sps:$4 sm:$0xff]  }
 0x192   : > { %v1882_v55 = vor.u32 %v1881_v24, %v1878_v36  ;;  %v1887_v47 = vrot.slane %v1885_v16, 5  ;;  %v345_v43 = vsel %vm4133_vm8, 0, %v344_v6  ;;  %3693 = vmatprep.subr.bf16.mxu0 %v3819_v25  ;;  %3733 = vmatprep.subr.bf16.mxu1 %v3819_v25  ;;  %vm2890_vm8 = vcmask 1043456  }
 0x193   : > { %2241 = vrot.lane.b32.xlu0 %v5003_v0, %s3888_s29  ;;  %346 = vst [vmem:[#allocation2 + $0x8c] sm:$0x1] %v345_v43  ;;  %v5099_v58 = vsel %vm4060_vm5, %v1897_v51, %v1901_v1  ;;  %v3561_v51 = vcombine.low %v4965_v7, %v5013_v17  ;;  %v3533_v7 = vcombine.low %v4879_v39, %v4941_v52  ;;  %vm1951_vm14 = vcmask 195712  }
 0x194   : > { %v1883_v50 = vrot.slane %v1882_v55, 4  ;;  %3694 = vmatpush3.bf16.msra.mxu0 %v3819_v25  ;;  %v5105_v8 = vpop.permute.xlu0 %2019  ;;  %vm2129_vm11 = vcmask 458112   ;;  %vm2165_vm12 = vcmask 523712   ;;  %vm2214_vm1 = vcmask 589312  }
 0x195   : > { %2646 = vrot.lane.b32.xlu1 %v3567_v60, %s3894_s14  ;;  %v5101_v28 = vpop.permute.xlu1 %2017  ;;  %3738 = vmatpush3.bf16.msra.mxu1 %v3819_v25  ;;  %v2892_v25 = vsel %vm2890_vm8, %v3821_v49, 0 }
 0x196   : > { %v1888_v61 = vsel %vm4060_vm5, %v1883_v50, %v1887_v47  ;;  %3695 = vmatprep.subr.bf16.mxu0 %v3820_v27  ;;  %3734 = vmatprep.subr.bf16.mxu1 %v3820_v27  ;;  %v3532_v47 = vcombine.low %v4756_v38, %v4885_v53 }
 0x197   : > { %1929 = vrot.lane.b32.xlu0 %v5003_v0, %s3893_s13  ;;  %v5114_v32 = vcombine.low %v1874_v44, %v1888_v61  ;;  %v5117_v3 = vcombine.low %v1888_v61, %v5099_v58  ;;  %v3522_v0 = vcombine.low %v4905_v57, %v4939_v31  ;;  %v2616_v31 = vshrl.u32 %v4706_v11, 16 }
 0x198   : > { %3696 = vmatpush3.bf16.msra.mxu0 %v3820_v27 }
 0x199   : > { %2758 = vrot.lane.b32.xlu1 %v4822_v62, %s3895_s15  ;;  %v5121_v2 = vpop.permute.xlu1 %2674  ;;  %3739 = vmatpush3.bf16.msra.mxu1 %v3820_v27  ;;  %v2618_v24 = vrot.slane %v2616_v31, 4 }
 0x19a   : > { %3743 = vmatprep.subr.msk.bf16.mxu0 %vm2890_vm8, %v3821_v49  ;;  %3744 = vmatprep.subr.msk.bf16.mxu1 %vm2890_vm8, %v3821_v49 }
 0x19b   : > { %2529 = vrot.lane.b32.xlu0 %v4822_v62, %s3893_s13  ;;  %v2619_v62 = vshll.u32 %v4706_v11, 16  ;;  %v1546_v11 = vld [vmem:[#allocation3 + $0x84] sm:$0x1] }
 0x19c   : > { %3698 = vmatpush3.bf16.msra.mxu0 %v2892_v25  ;;  %v2625_v27 = vshll.u32 %v1546_v11, 16 }
 0x19d   : > { %2192 = vrot.lane.b32.xlu1 %v3522_v0, %s3895_s15  ;;  %v5126_v44 = vpop.permute.xlu0 %2640  ;;  %v5128_v36 = vpop.permute.xlu1 %2145  ;;  %3740 = vmatpush3.bf16.msra.mxu1 %v2892_v25  ;;  %v2621_v16 = vrot.slane %v2619_v62, 5 }
 0x19f   : > { %2111 = vrot.lane.b32.xlu0 %v4764_v14, %s3891_s11  ;;  %v2622_v43 = vor.u32 %v2621_v16, %v2618_v24 }
 0x1a1   : > { %1931 = vrot.lane.b32.xlu1 %v3522_v0, %s3893_s13  ;;  %v1653_v57 = vpop.permute.xlu0 %1652  ;;  %v5136_v6 = vpop.permute.xlu1 %2638  ;;  %v2623_v49 = vrot.slane %v2622_v43, 4 }
 0x1a2   : > { %1674 = vst.msk [vmem:[#allocation4 + $0x18] sm:$0xff] %vm1670_vm6, %v1653_v57 }
 0x1a3   : > { %2704 = vrot.lane.b32.xlu0 %v3522_v0, %s3892_s12 }
 0x1a5   : > { %2760 = vrot.lane.b32.xlu1 %v3561_v51, %s3895_s15  ;;  %v5142_v1 = vpop.permute.xlu0 %2521  ;;  %v5144_v14 = vpop.permute.xlu1 %2750 }
 0x1a7   : > { %2243 = vrot.lane.b32.xlu0 %v3522_v0, %s3888_s29  ;;  %v2627_v0 = vrot.slane %v2625_v27, 5 }
 0x1a9   : > { %2531 = vrot.lane.b32.xlu1 %v3561_v51, %s3893_s13  ;;  %v5148_v60 = vpop.permute.xlu0 %2676  ;;  %v5169_v53 = vsel %vm4060_vm5, %v2623_v49, %v2627_v0 }
 0x1aa   : > { %v5152_v55 = vpop.permute.xlu1 %2752  ;;  %v3570_v25 = vcombine.low %v5020_v10, %v5169_v53 }
 0x1ab   : > { %1980 = vrot.lane.b32.xlu0 %v3533_v7, %s3889_s9 }
 0x1ad   : > { %1978 = vrot.lane.b32.xlu1 %v3532_v47, %s3889_s9  ;;  %v5158_v50 = vpop.permute.xlu0 %2147 }
 0x1ae   : > { %v5160_v61 = vpop.permute.xlu1 %2523 }
 0x1af   : > { %2589 = vrot.lane.b32.xlu0 %v4912_v40, %s3890_s10 }
 0x1b1   : > { %2113 = vrot.lane.b32.xlu1 %v4889_v56, %s3891_s11  ;;  %v1655_v39 = vpop.permute.xlu0 %1654 }
 0x1b2   : > { %1675 = vst.msk [vmem:[#allocation4 + $0x20] sm:$0xff] %vm1670_vm6, %v1655_v39  ;;  %v1971_v38 = vpop.permute.xlu1 %1970 }
 0x1b3   : > { %2075 = vrot.lane.b32.xlu0 %v4912_v40, %s3894_s14 }
 0x1b5   : > { %2587 = vrot.lane.b32.xlu1 %v4993_v4, %s3890_s10  ;;  %v5175_v52 = vpop.permute.xlu0 %1972 }
 0x1b6   : > { %v5179_v56 = vpop.permute.xlu1 %2105 }
 0x1b7   : > { %2652 = vrot.lane.b32.xlu0 %v3570_v25, %s3894_s14 }
 0x1b9   : > { %2073 = vrot.lane.b32.xlu1 %v4993_v4, %s3894_s14  ;;  %v5184_v57 = vpop.permute.xlu0 %2561 }
 0x1ba   : > { %v5186_v31 = vpop.permute.xlu1 %2559 }
 0x1bb   : > { %2245 = vrot.lane.b32.xlu0 %v4990_v41, %s3888_s29 }
 0x1bd   : > { %2706 = vrot.lane.b32.xlu1 %v4990_v41, %s3892_s12  ;;  %v5192_v40 = vpop.permute.xlu0 %2023 }
 0x1be   : > { %v5194_v10 = vpop.permute.xlu1 %2021 }
 0x1bf   : > { %1933 = vrot.lane.b32.xlu0 %v4990_v41, %s3893_s13 }
 0x1c1   : > { %2194 = vrot.lane.b32.xlu1 %v4990_v41, %s3895_s15  ;;  %v5200_v4 = vpop.permute.xlu0 %2644 }
 0x1c2   : > { %v5202_v62 = vpop.permute.xlu1 %2678 }
 0x1c3   : > { %2533 = vrot.lane.b32.xlu0 %v5040_v35, %s3893_s13 }
 0x1c5   : > { %2650 = vrot.lane.b32.xlu1 %v3569_v21, %s3894_s14  ;;  %v1657_v51 = vpop.permute.xlu0 %1656  ;;  %v5721_v21 = vcombine.low %v4947_v30, %v4974_v34 }
 0x1c6   : > { %1676 = vst.msk [vmem:[#allocation4 + $0x28] sm:$0xff] %vm1670_vm6, %v1657_v51  ;;  %v5211_v24 = vpop.permute.xlu1 %2149  ;;  %v1510_v51 = vld [vmem:[#allocation2 + $0x84] sm:$0x1] }
 0x1c7   : > { %2115 = vrot.lane.b32.xlu0 %v4957_v33, %s3891_s11  ;;  %v1509_v33 = vld [vmem:[#allocation2 + $0x80] sm:$0xf] }
 0x1c8   : > { %v3535_v7 = vcombine.low %v4999_v20, %v1509_v33  ;;  %v2050_v49 = vshll.u32 %v1509_v33, 16 }
 0x1c9   : > { %2196 = vrot.lane.b32.xlu1 %v4922_v22, %s3895_s15  ;;  %v5217_v41 = vpop.permute.xlu0 %2525 }
 0x1ca   : > { %v5219_v16 = vpop.permute.xlu1 %2642  ;;  %v2052_v25 = vrot.slane %v2050_v49, 5 }
 0x1cb   : > { %2708 = vrot.lane.b32.xlu0 %v4922_v22, %s3892_s12 }
 0x1cd   : > { %1935 = vrot.lane.b32.xlu1 %v4922_v22, %s3893_s13  ;;  %v5225_v17 = vpop.permute.xlu0 %2107 }
 0x1ce   : > { %v5227_v9 = vpop.permute.xlu1 %2754 }
 0x1cf   : > { %2247 = vrot.lane.b32.xlu0 %v4922_v22, %s3888_s29  ;;  %v1511_v22 = vld [vmem:[#allocation2 + $0x88] sm:$0xf] }
 0x1d0   : > { %v3552_v34 = vcombine.low %v1509_v33, %v1511_v22 }
 0x1d1   : > { %1982 = vrot.lane.b32.xlu1 %v5721_v21, %s3889_s9  ;;  %v5235_v11 = vpop.permute.xlu0 %2680 }
 0x1d2   : > { %v1928_v47 = vpop.permute.xlu1 %1927 }
 0x1d3   : > { %1984 = vrot.lane.b32.xlu0 %v3535_v7, %s3889_s9  ;;  %1952 = vst.msk [vmem:[#allocation4] sm:$0xff] %vm1951_vm14, %v1928_v47 }
 0x1d4   : > { %1995 = vst.msk [vmem:[#allocation4] sm:$0xff] %vm1994_vm7, %v1971_v38 }
 0x1d5   : > { %2117 = vrot.lane.b32.xlu1 %v5024_v63, %s3891_s11  ;;  %v5243_v30 = vpop.permute.xlu0 %2151  ;;  %2038 = vst.msk [vmem:[#allocation4] sm:$0xff] %vm2037_vm9, %v4997_v54  ;;  %v2047_v54 = vshrl.u32 %v1509_v33, 16  ;;  %v2056_v33 = vshll.u32 %v1510_v51, 16 }
 0x1d6   : > { %v5247_v20 = vpop.permute.xlu1 %2756 }
 0x1d7   : > { %2119 = vrot.lane.b32.xlu0 %v3552_v34, %s3891_s11  ;;  %v2049_v38 = vrot.slane %v2047_v54, 4  ;;  %v2058_v34 = vrot.slane %v2056_v33, 5  ;;  %v2178_v54 = vshll.u32 %v1511_v22, 16 }
 0x1d9   : > { %2591 = vrot.lane.b32.xlu1 %v5067_v19, %s3890_s10  ;;  %v1659_v43 = vpop.permute.xlu0 %1658  ;;  %v2180_v33 = vrot.slane %v2178_v54, 5 }
 0x1da   : > { %1677 = vst.msk [vmem:[#allocation4 + $0x30] sm:$0xff] %vm1670_vm6, %v1659_v43  ;;  %v5253_v27 = vpop.permute.xlu1 %2527 }
 0x1db   : > { %2593 = vrot.lane.b32.xlu0 %v5058_v26, %s3890_s10 }
 0x1dd   : > { %2077 = vrot.lane.b32.xlu1 %v5067_v19, %s3894_s14  ;;  %v2240_v63 = vpop.permute.xlu0 %2239 }
 0x1de   : > { %2263 = vst.msk [vmem:[#allocation4 + $0x40] sm:$0xff] %vm1670_vm6, %v2240_v63  ;;  %v5260_v0 = vpop.permute.xlu1 %1974  ;;  %v2175_v63 = vshrl.u32 %v1511_v22, 16 }
 0x1df   : > { %2543 = vst.msk [vmem:[#allocation4 + $0x40] sm:$0xff] %vm1951_vm14, %v5060_v45  ;;  %2079 = vrot.lane.b32.xlu0 %v5058_v26, %s3894_s14 }
 0x1e0   : > { %2575 = vst.msk [vmem:[#allocation4 + $0x40] sm:$0xff] %vm1994_vm7, %v4968_v5  ;;  %v2053_v5 = vor.u32 %v2052_v25, %v2049_v38  ;;  %v2735_v38 = vshrl.u32 %v4746_v46, 16  ;;  %v2738_v25 = vshll.u32 %v4746_v46, 16  ;;  %v2177_v22 = vrot.slane %v2175_v63, 4  ;;  %v1548_v46 = vld [vmem:[#allocation3 + $0x8c] sm:$0x1] }
 0x1e1   : > { %2710 = vrot.lane.b32.xlu1 %v5069_v15, %s3892_s12  ;;  %v5270_v19 = vpop.permute.xlu0 %1976  ;;  %v2744_v63 = vshll.u32 %v1548_v46, 16 }
 0x1e2   : > { %v5272_v39 = vpop.permute.xlu1 %2109  ;;  %v2054_v47 = vrot.slane %v2053_v5, 4 }
 0x1e3   : > { %2249 = vrot.lane.b32.xlu0 %v5069_v15, %s3888_s29 }
 0x1e4   : > { %v2059_v49 = vsel %vm4060_vm5, %v2054_v47, %v2058_v34  ;;  %v2740_v47 = vrot.slane %v2738_v25, 5  ;;  %v1512_v34 = vld [vmem:[#allocation2 + $0x8c] sm:$0x1] }
 0x1e5   : > { %2198 = vrot.lane.b32.xlu1 %v5069_v15, %s3895_s15  ;;  %v5278_v26 = vpop.permute.xlu0 %2565  ;;  %v3551_v5 = vcombine.low %v5099_v58, %v2059_v49 }
 0x1e6   : > { %5722 = vst [vmem:[#allocation9_spill] sm:$0xff] %v5278_v26  ;;  %v2184_v26 = vshll.u32 %v1512_v34, 16 }
 0x1e7   : > { %v5280_v45 = vpop.permute.xlu1 %2563  ;;  %1937 = vrot.lane.b32.xlu0 %v5069_v15, %s3893_s13 }
 0x1e9   : > { %2200 = vrot.lane.b32.xlu1 %v5081_v12, %s3895_s15  ;;  %v5286_v21 = vpop.permute.xlu0 %2027 }
 0x1ea   : > { %5723 = vst [vmem:[#allocation10_spill] sm:$0xff] %v5286_v21 }
 0x1eb   : > { %v5288_v7 = vpop.permute.xlu1 %2025  ;;  %2712 = vrot.lane.b32.xlu0 %v5081_v12, %s3892_s12 }
 0x1ed   : > { %1939 = vrot.lane.b32.xlu1 %v5081_v12, %s3893_s13  ;;  %v5294_v43 = vpop.permute.xlu0 %2684 }
 0x1ee   : > { %5724 = vst [vmem:[#allocation11_spill] sm:$0xff] %v5294_v43  ;;  %v2737_v43 = vrot.slane %v2735_v38, 4 }
 0x1ef   : > { %v5296_v15 = vpop.permute.xlu1 %2682  ;;  %2251 = vrot.lane.b32.xlu0 %v5081_v12, %s3888_s29 }
 0x1f0   : > { %v2741_v58 = vor.u32 %v2740_v47, %v2737_v43 }
 0x1f1   : > { %2762 = vrot.lane.b32.xlu1 %v5040_v35, %s3895_s15  ;;  %v5306_v51 = vpop.permute.xlu0 %2155 }
 0x1f2   : > { %5725 = vst [vmem:[#allocation12_spill] sm:$0xff] %v5306_v51  ;;  %v2181_v51 = vor.u32 %v2180_v33, %v2177_v22  ;;  %v2186_v22 = vrot.slane %v2184_v26, 5  ;;  %v2742_v43 = vrot.slane %v2741_v58, 4  ;;  %v2746_v33 = vrot.slane %v2744_v63, 5 }
 0x1f3   : > { %v5309_v21 = vpop.permute.xlu1 %2153  ;;  %2597 = vrot.lane.b32.xlu0 %v3551_v5, %s3890_s10 }
 0x1f4   : > { %v2182_v25 = vrot.slane %v2181_v51, 4  ;;  %v2747_v26 = vsel %vm4060_vm5, %v2742_v43, %v2746_v33 }
 0x1f5   : > { %2595 = vrot.lane.b32.xlu1 %v5114_v32, %s3890_s10  ;;  %v2586_v12 = vpop.permute.xlu0 %2585  ;;  %v3571_v51 = vcombine.low %v5169_v53, %v2747_v26 }
 0x1f7   : > { %v2584_v35 = vpop.permute.xlu1 %2583  ;;  %2083 = vrot.lane.b32.xlu0 %v3551_v5, %s3894_s14 }
 0x1f8   : > { %2607 = vst.msk [vmem:[#allocation4 + $0x40] sm:$0xff] %vm2037_vm9, %v2584_v35 }
 0x1f9   : > { %2662 = vst.msk [vmem:[#allocation4 + $0x40] sm:$0xff] %vm2093_vm10, %v5136_v6  ;;  %2081 = vrot.lane.b32.xlu1 %v5114_v32, %s3894_s14  ;;  %v2072_v54 = vpop.permute.xlu0 %2071  ;;  %v2187_v6 = vsel %vm4060_vm5, %v2182_v25, %v2186_v22  ;;  %vm2841_vm5 = vcmask 588800  }
 0x1fa   : > { %2694 = vst.msk [vmem:[#allocation4 + $0x40] sm:$0xff] %vm2129_vm11, %v5016_v18 }
 0x1fb   : > { %v2070_v38 = vpop.permute.xlu1 %2069  ;;  %2253 = vrot.lane.b32.xlu0 %v5117_v3, %s3888_s29 }
 0x1fc   : > { %2094 = vst.msk [vmem:[#allocation4] sm:$0xff] %vm2093_vm10, %v2070_v38 }
 0x1fd   : > { %2130 = vst.msk [vmem:[#allocation4] sm:$0xff] %vm2129_vm11, %v5179_v56  ;;  %2714 = vrot.lane.b32.xlu1 %v5117_v3, %s3892_s12  ;;  %v5329_v32 = vpop.permute.xlu0 %2648 }
 0x1fe   : > { %2166 = vst.msk [vmem:[#allocation4] sm:$0xff] %vm2165_vm12, %v5044_v59  ;;  %v3554_v59 = vcombine.low %v2059_v49, %v2187_v6 }
 0x1ff   : > { %v2703_v18 = vpop.permute.xlu1 %2702  ;;  %1941 = vrot.lane.b32.xlu0 %v5117_v3, %s3893_s13 }
 0x200   : > { %2726 = vst.msk [vmem:[#allocation4 + $0x40] sm:$0xff] %vm2165_vm12, %v2703_v18 }
 0x201   : > { %2774 = vst.msk [vmem:[#allocation4 + $0x40] sm:$0xff] %vm2214_vm1, %v5144_v14  ;;  %2202 = vrot.lane.b32.xlu1 %v5117_v3, %s3895_s15  ;;  %v1661_v56 = vpop.permute.xlu0 %1660 }
 0x202   : > { %1678 = vst.msk [vmem:[#allocation4 + $0x38] sm:$0xff] %vm1670_vm6, %v1661_v56 }
 0x203   : > { %v2191_v5 = vpop.permute.xlu1 %2190  ;;  %2716 = vrot.lane.b32.xlu0 %v3554_v59, %s3892_s12 }
 0x204   : > { %2215 = vst.msk [vmem:[#allocation4] sm:$0xff] %vm2214_vm1, %v2191_v5 }
 0x205   : > { %2764 = vrot.lane.b32.xlu1 %v3571_v51, %s3895_s15  ;;  %v2242_v37 = vpop.permute.xlu0 %2241 }
 0x206   : > { %2264 = vst.msk [vmem:[#allocation4 + $0x48] sm:$0xff] %vm1670_vm6, %v2242_v37 }
 0x207   : > { %v5350_v14 = vpop.permute.xlu1 %2646  ;;  %2544 = vst.msk [vmem:[#allocation4 + $0x48] sm:$0xff] %vm1951_vm14, %v5142_v1  ;;  %2204 = vrot.lane.b32.xlu0 %v3554_v59, %s3895_s15  ;;  %v5726_v1 = vld [vmem:[#allocation8_spill] sm:$0xff] }
 0x208   : > { %v2790_v3 = vld [vmem:[#allocation4 + $0x40] sm:$0xff]  ;;  %2576 = vst.msk [vmem:[#allocation4 + $0x48] sm:$0xff] %vm1994_vm7, %v4949_v13 }
 0x209   : > { %3715 = vmatprep.mubr.msk.bf16.mxu1 %vm2841_vm5, %v2790_v3  ;;  %2608 = vst.msk [vmem:[#allocation4 + $0x48] sm:$0xff] %vm2037_vm9, %v2586_v12  ;;  %v1930_v53 = vpop.permute.xlu0 %1929 }
 0x20a   : > { %2663 = vst.msk [vmem:[#allocation4 + $0x48] sm:$0xff] %vm2093_vm10, %v5126_v44 }
 0x20b   : > { %1953 = vst.msk [vmem:[#allocation4 + $0x8] sm:$0xff] %vm1951_vm14, %v1930_v53  ;;  %v5362_v49 = vpop.permute.xlu1 %2758  ;;  %v2782_v47 = vld [vmem:[#allocation4] sm:$0xff] }
 0x20c   : > { %2695 = vst.msk [vmem:[#allocation4 + $0x48] sm:$0xff] %vm2129_vm11, %v5007_v29  ;;  %3699 = vmatprep.mubr.msk.bf16.mxu0 %vm2841_vm5, %v2782_v47  ;;  %v5727_v47 = vld [vmem:[#allocation9_spill] sm:$0xff] }
 0x20d   : > { %1996 = vst.msk [vmem:[#allocation4 + $0x8] sm:$0xff] %vm1994_vm7, %v5175_v52  ;;  %v5372_v13 = vpop.permute.xlu0 %2529 }
 0x20e   : > { %2039 = vst.msk [vmem:[#allocation4 + $0x8] sm:$0xff] %vm2037_vm9, %v4982_v48 }
 0x20f   : > { %2095 = vst.msk [vmem:[#allocation4 + $0x8] sm:$0xff] %vm2093_vm10, %v2072_v54  ;;  %v2193_v44 = vpop.permute.xlu1 %2192 }
 0x210   : > { %2131 = vst.msk [vmem:[#allocation4 + $0x8] sm:$0xff] %vm2129_vm11, %v5225_v17 }
 0x211   : > { %2167 = vst.msk [vmem:[#allocation4 + $0x8] sm:$0xff] %vm2165_vm12, %v5726_v1  ;;  %v2112_v29 = vpop.permute.xlu0 %2111 }
 0x212   : > { %2216 = vst.msk [vmem:[#allocation4 + $0x8] sm:$0xff] %vm2214_vm1, %v2193_v44  ;;  %v5729_v44 = vld [vmem:[#allocation10_spill] sm:$0xff] }
 0x213   : > { %v1932_v52 = vpop.permute.xlu1 %1931 }
 0x214   : > { %1954 = vst.msk [vmem:[#allocation4 + $0x10] sm:$0xff] %vm1951_vm14, %v1932_v52  ;;  %v5730_v52 = vld [vmem:[#allocation12_spill] sm:$0xff] }
 0x215   : > { %1997 = vst.msk [vmem:[#allocation4 + $0x10] sm:$0xff] %vm1994_vm7, %v5260_v0  ;;  %v2705_v48 = vpop.permute.xlu0 %2704 }
 0x216   : > { %2040 = vst.msk [vmem:[#allocation4 + $0x10] sm:$0xff] %vm2037_vm9, %v5101_v28 }
 0x217   : > { %2727 = vst.msk [vmem:[#allocation4 + $0x48] sm:$0xff] %vm2165_vm12, %v2705_v48  ;;  %v5385_v17 = vpop.permute.xlu1 %2760 }
 0x218   : > { %2775 = vst.msk [vmem:[#allocation4 + $0x48] sm:$0xff] %vm2214_vm1, %v5152_v55 }
 0x219   : > { %v2783_v34 = vld [vmem:[#allocation4 + $0x8] sm:$0xff]  ;;  %v2244_v46 = vpop.permute.xlu0 %2243 }
 0x21a   : > { %3700 = vmatmul.mubr.msk.bf16.vlgmr.msra.gmra.mrb[16].mxu0 %vm2841_vm5, %v2783_v34  ;;  %2265 = vst.msk [vmem:[#allocation4 + $0x50] sm:$0xff] %vm1670_vm6, %v2244_v46 }
 0x21b   : > { %v5391_v12 = vpop.permute.xlu1 %2531  ;;  %2545 = vst.msk [vmem:[#allocation4 + $0x50] sm:$0xff] %vm1951_vm14, %v5160_v61 }
 0x21c   : > { %2577 = vst.msk [vmem:[#allocation4 + $0x50] sm:$0xff] %vm1994_vm7, %v5085_v23 }
 0x21d   : > { %v5397_v28 = vpop.permute.xlu0 %1980 }
 0x21f   : > { %v2791_v0 = vld [vmem:[#allocation4 + $0x48] sm:$0xff]  ;;  %v1979_v35 = vpop.permute.xlu1 %1978 }
 0x220   : > { %3716 = vmatmul.mubr.msk.bf16.vlgmr.msra.gmra.mrb[16].mxu1 %vm2841_vm5, %v2791_v0 }
 0x221   : > { %v2590_v55 = vpop.permute.xlu0 %2589 }
 0x223   : > { %v5400_v58 = vpop.permute.xlu1 %2113 }
 0x225   : > { %v2076_v63 = vpop.permute.xlu0 %2075 }
 0x227   : > { %v2588_v54 = vpop.permute.xlu1 %2587 }
 0x228   : > { %2609 = vst.msk [vmem:[#allocation4 + $0x50] sm:$0xff] %vm2037_vm9, %v2588_v54 }
 0x229   : > { %2664 = vst.msk [vmem:[#allocation4 + $0x50] sm:$0xff] %vm2093_vm10, %v5219_v16  ;;  %v5405_v61 = vpop.permute.xlu0 %2652 }
 0x22a   : > { %2696 = vst.msk [vmem:[#allocation4 + $0x50] sm:$0xff] %vm2129_vm11, %v5121_v2 }
 0x22b   : > { %v2074_v23 = vpop.permute.xlu1 %2073 }
 0x22c   : > { %2096 = vst.msk [vmem:[#allocation4 + $0x10] sm:$0xff] %vm2093_vm10, %v2074_v23 }
 0x22d   : > { %2132 = vst.msk [vmem:[#allocation4 + $0x10] sm:$0xff] %vm2129_vm11, %v5272_v39  ;;  %v2246_v38 = vpop.permute.xlu0 %2245 }
 0x22e   : > { %2168 = vst.msk [vmem:[#allocation4 + $0x10] sm:$0xff] %vm2165_vm12, %v5128_v36 }
 0x22f   : > { %2266 = vst.msk [vmem:[#allocation4 + $0x58] sm:$0xff] %vm1670_vm6, %v2246_v38  ;;  %v2707_v25 = vpop.permute.xlu1 %2706 }
 0x230   : > { %2546 = vst.msk [vmem:[#allocation4 + $0x58] sm:$0xff] %vm1951_vm14, %v5217_v41 }
 0x231   : > { %2728 = vst.msk [vmem:[#allocation4 + $0x50] sm:$0xff] %vm2165_vm12, %v2707_v25  ;;  %v1934_v2 = vpop.permute.xlu0 %1933 }
 0x232   : > { %2578 = vst.msk [vmem:[#allocation4 + $0x58] sm:$0xff] %vm1994_vm7, %v5083_v42 }
 0x233   : > { %2776 = vst.msk [vmem:[#allocation4 + $0x50] sm:$0xff] %vm2214_vm1, %v5227_v9  ;;  %v2195_v36 = vpop.permute.xlu1 %2194 }
 0x234   : > { %2610 = vst.msk [vmem:[#allocation4 + $0x58] sm:$0xff] %vm2037_vm9, %v2590_v55 }
 0x235   : > { %2665 = vst.msk [vmem:[#allocation4 + $0x58] sm:$0xff] %vm2093_vm10, %v5200_v4  ;;  %v5434_v42 = vpop.permute.xlu0 %2533 }
 0x236   : > { %1955 = vst.msk [vmem:[#allocation4 + $0x18] sm:$0xff] %vm1951_vm14, %v1934_v2 }
 0x237   : > { %1998 = vst.msk [vmem:[#allocation4 + $0x18] sm:$0xff] %vm1994_vm7, %v5270_v19  ;;  %v5437_v4 = vpop.permute.xlu1 %2650 }
 0x238   : > { %2697 = vst.msk [vmem:[#allocation4 + $0x58] sm:$0xff] %vm2129_vm11, %v5148_v60 }
 0x239   : > { %2217 = vst.msk [vmem:[#allocation4 + $0x10] sm:$0xff] %vm2214_vm1, %v2195_v36  ;;  %v2116_v60 = vpop.permute.xlu0 %2115 }
 0x23a   : > { %2041 = vst.msk [vmem:[#allocation4 + $0x18] sm:$0xff] %vm2037_vm9, %v5105_v8  ;;  %v2792_v41 = vld [vmem:[#allocation4 + $0x50] sm:$0xff] }
 0x23b   : > { %2097 = vst.msk [vmem:[#allocation4 + $0x18] sm:$0xff] %vm2093_vm10, %v2076_v63  ;;  %3719 = vmatprep.mubr.msk.bf16.mxu1 %vm2841_vm5, %v2792_v41  ;;  %v2197_v16 = vpop.permute.xlu1 %2196 }
 0x23c   : > { %2133 = vst.msk [vmem:[#allocation4 + $0x18] sm:$0xff] %vm2129_vm11, %v2112_v29 }
 0x23d   : > { %2169 = vst.msk [vmem:[#allocation4 + $0x18] sm:$0xff] %vm2165_vm12, %v5158_v50  ;;  %v2709_v8 = vpop.permute.xlu0 %2708 }
 0x23e   : > { %2218 = vst.msk [vmem:[#allocation4 + $0x18] sm:$0xff] %vm2214_vm1, %v2197_v16 }
 0x23f   : > { %2729 = vst.msk [vmem:[#allocation4 + $0x58] sm:$0xff] %vm2165_vm12, %v2709_v8  ;;  %v1936_v19 = vpop.permute.xlu1 %1935 }
 0x240   : > { %v2784_v9 = vld [vmem:[#allocation4 + $0x10] sm:$0xff]  ;;  %2777 = vst.msk [vmem:[#allocation4 + $0x58] sm:$0xff] %vm2214_vm1, %v5247_v20 }
 0x241   : > { %3703 = vmatprep.mubr.msk.bf16.mxu0 %vm2841_vm5, %v2784_v9  ;;  %1956 = vst.msk [vmem:[#allocation4 + $0x20] sm:$0xff] %vm1951_vm14, %v1936_v19  ;;  %v2248_v50 = vpop.permute.xlu0 %2247 }
 0x242   : > { %1999 = vst.msk [vmem:[#allocation4 + $0x20] sm:$0xff] %vm1994_vm7, %v1979_v35 }
 0x243   : > { %2042 = vst.msk [vmem:[#allocation4 + $0x20] sm:$0xff] %vm2037_vm9, %v5194_v10  ;;  %v1983_v39 = vpop.permute.xlu1 %1982 }
 0x244   : > { %2267 = vst.msk [vmem:[#allocation4 + $0x60] sm:$0xff] %vm1670_vm6, %v2248_v50 }
 0x245   : > { %v2785_v22 = vld [vmem:[#allocation4 + $0x18] sm:$0xff]  ;;  %2547 = vst.msk [vmem:[#allocation4 + $0x60] sm:$0xff] %vm1951_vm14, %v5253_v27  ;;  %v5457_v20 = vpop.permute.xlu0 %1984 }
 0x246   : > { %3704 = vmatmul.mubr.msk.bf16.gmra.mrb[20].mxu0 %vm2841_vm5, %v2785_v22  ;;  %2579 = vst.msk [vmem:[#allocation4 + $0x60] sm:$0xff] %vm1994_vm7, %v5186_v31 }
 0x247   : > { %v2793_v43 = vld [vmem:[#allocation4 + $0x58] sm:$0xff]  ;;  %v2118_v33 = vpop.permute.xlu1 %2117 }
 0x248   : > { %3720 = vmatmul.mubr.msk.bf16.gmra.mrb[20].mxu1 %vm2841_vm5, %v2793_v43 }
 0x249   : > { %v5460_v18 = vpop.permute.xlu0 %2119 }
 0x24b   : > { %v2592_v10 = vpop.permute.xlu1 %2591 }
 0x24c   : > { %2611 = vst.msk [vmem:[#allocation4 + $0x60] sm:$0xff] %vm2037_vm9, %v2592_v10 }
 0x24d   : > { %2666 = vst.msk [vmem:[#allocation4 + $0x60] sm:$0xff] %vm2093_vm10, %v5350_v14  ;;  %v2594_v27 = vpop.permute.xlu0 %2593 }
 0x24e   : > { %2698 = vst.msk [vmem:[#allocation4 + $0x60] sm:$0xff] %vm2129_vm11, %v5202_v62 }
 0x24f   : > { %v2078_v6 = vpop.permute.xlu1 %2077 }
 0x250   : > { %2098 = vst.msk [vmem:[#allocation4 + $0x20] sm:$0xff] %vm2093_vm10, %v2078_v6 }
 0x251   : > { %2134 = vst.msk [vmem:[#allocation4 + $0x20] sm:$0xff] %vm2129_vm11, %v5400_v58  ;;  %v2080_v31 = vpop.permute.xlu0 %2079 }
 0x252   : > { %2170 = vst.msk [vmem:[#allocation4 + $0x20] sm:$0xff] %vm2165_vm12, %v5211_v24 }
 0x253   : > { %v2711_v26 = vpop.permute.xlu1 %2710 }
 0x254   : > { %2730 = vst.msk [vmem:[#allocation4 + $0x60] sm:$0xff] %vm2165_vm12, %v2711_v26 }
 0x255   : > { %2778 = vst.msk [vmem:[#allocation4 + $0x60] sm:$0xff] %vm2214_vm1, %v5362_v49  ;;  %v2250_v56 = vpop.permute.xlu0 %2249 }
 0x256   : > { %2268 = vst.msk [vmem:[#allocation4 + $0x68] sm:$0xff] %vm1670_vm6, %v2250_v56 }
 0x257   : > { %v2199_v62 = vpop.permute.xlu1 %2198  ;;  %2548 = vst.msk [vmem:[#allocation4 + $0x68] sm:$0xff] %vm1951_vm14, %v5372_v13  ;;  %v5728_v13 = vld [vmem:[#allocation11_spill] sm:$0xff] }
 0x258   : > { %2219 = vst.msk [vmem:[#allocation4 + $0x20] sm:$0xff] %vm2214_vm1, %v2199_v62 }
 0x259   : > { %2580 = vst.msk [vmem:[#allocation4 + $0x68] sm:$0xff] %vm1994_vm7, %v5184_v57  ;;  %v1938_v24 = vpop.permute.xlu0 %1937 }
 0x25a   : > { %2612 = vst.msk [vmem:[#allocation4 + $0x68] sm:$0xff] %vm2037_vm9, %v2594_v27 }
 0x25b   : > { %2667 = vst.msk [vmem:[#allocation4 + $0x68] sm:$0xff] %vm2093_vm10, %v5329_v32  ;;  %v2201_v59 = vpop.permute.xlu1 %2200 }
 0x25c   : > { %1957 = vst.msk [vmem:[#allocation4 + $0x28] sm:$0xff] %vm1951_vm14, %v1938_v24  ;;  %v2794_v51 = vld [vmem:[#allocation4 + $0x60] sm:$0xff] }
 0x25d   : > { %2000 = vst.msk [vmem:[#allocation4 + $0x28] sm:$0xff] %vm1994_vm7, %v5397_v28  ;;  %3723 = vmatprep.mubr.msk.bf16.mxu1 %vm2841_vm5, %v2794_v51  ;;  %v2713_v57 = vpop.permute.xlu0 %2712  ;;  %v5554_v28 = vld [vmem:[%s5693_s5] ss:$0 sm:$0xff] }
 0x25e   : > { %2699 = vst.msk [vmem:[#allocation4 + $0x68] sm:$0xff] %vm2129_vm11, %v5235_v11 }
 0x25f   : > { %2043 = vst.msk [vmem:[#allocation4 + $0x28] sm:$0xff] %vm2037_vm9, %v5192_v40  ;;  %v1940_v32 = vpop.permute.xlu1 %1939  ;;  %v2786_v5 = vld [vmem:[#allocation4 + $0x20] sm:$0xff] }
 0x260   : > { %2099 = vst.msk [vmem:[#allocation4 + $0x28] sm:$0xff] %vm2093_vm10, %v2080_v31  ;;  %3707 = vmatprep.mubr.msk.bf16.mxu0 %vm2841_vm5, %v2786_v5 }
 0x261   : > { %2135 = vst.msk [vmem:[#allocation4 + $0x28] sm:$0xff] %vm2129_vm11, %v2116_v60  ;;  %v2252_v40 = vpop.permute.xlu0 %2251 }
 0x262   : > { %2731 = vst.msk [vmem:[#allocation4 + $0x68] sm:$0xff] %vm2165_vm12, %v2713_v57  ;;  %2171 = vst.msk [vmem:[#allocation4 + $0x28] sm:$0xff] %vm2165_vm12, %v5243_v30 }
 0x263   : > { %2779 = vst.msk [vmem:[#allocation4 + $0x68] sm:$0xff] %vm2214_vm1, %v5385_v17  ;;  %2220 = vst.msk [vmem:[#allocation4 + $0x28] sm:$0xff] %vm2214_vm1, %v2201_v59  ;;  %v2763_v11 = vpop.permute.xlu1 %2762 }
 0x264   : > { %1958 = vst.msk [vmem:[#allocation4 + $0x30] sm:$0xff] %vm1951_vm14, %v1940_v32 }
 0x265   : > { %2001 = vst.msk [vmem:[#allocation4 + $0x30] sm:$0xff] %vm1994_vm7, %v1983_v39  ;;  %v2598_v30 = vpop.permute.xlu0 %2597 }
 0x266   : > { %2044 = vst.msk [vmem:[#allocation4 + $0x30] sm:$0xff] %vm2037_vm9, %v5288_v7 }
 0x267   : > { %2269 = vst.msk [vmem:[#allocation4 + $0x70] sm:$0xff] %vm1670_vm6, %v2252_v40  ;;  %v2596_v14 = vpop.permute.xlu1 %2595 }
 0x268   : > { %2549 = vst.msk [vmem:[#allocation4 + $0x70] sm:$0xff] %vm1951_vm14, %v5391_v12 }
 0x269   : > { %2581 = vst.msk [vmem:[#allocation4 + $0x70] sm:$0xff] %vm1994_vm7, %v5280_v45  ;;  %v2084_v7 = vpop.permute.xlu0 %2083 }
 0x26a   : > { %v2795_v37 = vld [vmem:[#allocation4 + $0x68] sm:$0xff]  ;;  %2613 = vst.msk [vmem:[#allocation4 + $0x70] sm:$0xff] %vm2037_vm9, %v2596_v14 }
 0x26b   : > { %3724 = vmatmul.mubr.msk.bf16.gmra.mrb[24].mxu1 %vm2841_vm5, %v2795_v37  ;;  %v2787_v3 = vld [vmem:[#allocation4 + $0x28] sm:$0xff]  ;;  %2668 = vst.msk [vmem:[#allocation4 + $0x70] sm:$0xff] %vm2093_vm10, %v5437_v4  ;;  %v2082_v53 = vpop.permute.xlu1 %2081 }
 0x26c   : > { %3708 = vmatmul.mubr.msk.bf16.gmra.mrb[24].mxu0 %vm2841_vm5, %v2787_v3  ;;  %2700 = vst.msk [vmem:[#allocation4 + $0x70] sm:$0xff] %vm2129_vm11, %v5296_v15 }
 0x26d   : > { %2100 = vst.msk [vmem:[#allocation4 + $0x30] sm:$0xff] %vm2093_vm10, %v2082_v53  ;;  %v2254_v45 = vpop.permute.xlu0 %2253 }
 0x26e   : > { %2136 = vst.msk [vmem:[#allocation4 + $0x30] sm:$0xff] %vm2129_vm11, %v2118_v33 }
 0x26f   : > { %2172 = vst.msk [vmem:[#allocation4 + $0x30] sm:$0xff] %vm2165_vm12, %v5309_v21  ;;  %v2715_v49 = vpop.permute.xlu1 %2714 }
 0x270   : > { %2270 = vst.msk [vmem:[#allocation4 + $0x78] sm:$0xff] %vm1670_vm6, %v2254_v45  ;;  %v3188_v45 = vlaneseq }
 0x271   : > { %2550 = vst.msk [vmem:[#allocation4 + $0x78] sm:$0xff] %vm1951_vm14, %v5434_v42  ;;  %v1942_v15 = vpop.permute.xlu0 %1941 }
 0x272   : > { %2732 = vst.msk [vmem:[#allocation4 + $0x70] sm:$0xff] %vm2165_vm12, %v2715_v49 }
 0x273   : > { %2582 = vst.msk [vmem:[#allocation4 + $0x78] sm:$0xff] %vm1994_vm7, %v5727_v47  ;;  %v2203_v21 = vpop.permute.xlu1 %2202 }
 0x274   : > { %2780 = vst.msk [vmem:[#allocation4 + $0x70] sm:$0xff] %vm2214_vm1, %v2763_v11  ;;  %2221 = vst.msk [vmem:[#allocation4 + $0x30] sm:$0xff] %vm2214_vm1, %v2203_v21 }
 0x275   : > { %2614 = vst.msk [vmem:[#allocation4 + $0x78] sm:$0xff] %vm2037_vm9, %v2598_v30  ;;  %v2717_v1 = vpop.permute.xlu0 %2716 }
 0x276   : > { %2669 = vst.msk [vmem:[#allocation4 + $0x78] sm:$0xff] %vm2093_vm10, %v5405_v61 }
 0x277   : > { %1959 = vst.msk [vmem:[#allocation4 + $0x38] sm:$0xff] %vm1951_vm14, %v1942_v15  ;;  %v2765_v29 = vpop.permute.xlu1 %2764 }
 0x278   : > { %2002 = vst.msk [vmem:[#allocation4 + $0x38] sm:$0xff] %vm1994_vm7, %v5457_v20 }
 0x279   : > { %2701 = vst.msk [vmem:[#allocation4 + $0x78] sm:$0xff] %vm2129_vm11, %v5728_v13  ;;  %v2205_v17 = vpop.permute.xlu0 %2204  ;;  %v3896_v13 = vmov 1983009808  }
 0x27a   : > { %2045 = vst.msk [vmem:[#allocation4 + $0x38] sm:$0xff] %vm2037_vm9, %v5729_v44  ;;  %v3186_v44 = vunpack.c.l.s4 %v3896_v13 }
 0x27b   : > { %2101 = vst.msk [vmem:[#allocation4 + $0x38] sm:$0xff] %vm2093_vm10, %v2084_v7  ;;  %v2796_v48 = vld [vmem:[#allocation4 + $0x70] sm:$0xff] }
 0x27c   : > { %2137 = vst.msk [vmem:[#allocation4 + $0x38] sm:$0xff] %vm2129_vm11, %v5460_v18  ;;  %3727 = vmatprep.mubr.msk.bf16.mxu1 %vm2841_vm5, %v2796_v48  ;;  %v2788_v34 = vld [vmem:[#allocation4 + $0x30] sm:$0xff] }
 0x27d   : > { %2733 = vst.msk [vmem:[#allocation4 + $0x78] sm:$0xff] %vm2165_vm12, %v2717_v1  ;;  %2173 = vst.msk [vmem:[#allocation4 + $0x38] sm:$0xff] %vm2165_vm12, %v5730_v52  ;;  %3711 = vmatprep.mubr.msk.bf16.mxu0 %vm2841_vm5, %v2788_v34 }
 0x27e   : > { %2781 = vst.msk [vmem:[#allocation4 + $0x78] sm:$0xff] %vm2214_vm1, %v2765_v29  ;;  %2222 = vst.msk [vmem:[#allocation4 + $0x38] sm:$0xff] %vm2214_vm1, %v2205_v17 }
 0x285   : > { %v2797_v46 = vld [vmem:[#allocation4 + $0x78] sm:$0xff] }
 0x286   : > { %3728 = vmatmul.mubr.msk.bf16.gmra.mrb[28].mxu1 %vm2841_vm5, %v2797_v46  ;;  %v2789_v12 = vld [vmem:[#allocation4 + $0x38] sm:$0xff] }
 0x287   : > { %3712 = vmatmul.mubr.msk.bf16.gmra.mrb[28].mxu0 %vm2841_vm5, %v2789_v12 }
 0x2ed   : > { %v3701_v0 = vpop.f32.mrb[16].mxu0 }
 0x2ee   : > { %v2937_v35 = vadd.f32 %v3701_v0, %v5554_v28  ;;  %v2928_v55 = vpop.f32.mrb[17].mxu0 }
 0x2ef   : > { %v2929_v58 = vadd.f32 %v5554_v28, %v2928_v55  ;;  %v3702_v63 = vpop.f32.mrb[18].mxu0 }
 0x2f0   : > { %v2931_v54 = vpop.f32.mrb[19].mxu0  ;;  %v3089_v61 = vmul.f32 0.2, %v2937_v35  ;;  %v2940_v23 = vadd.f32 %v3702_v63, %v5554_v28  ;;  %vm3057_vm15 = vcmp.ge.f32.partialorder %v2937_v35, 0.0 }
 0x2f1   : > { %v3087_v38 = vmul.f32 0.2, %v2929_v58  ;;  %vm3055_vm0 = vcmp.ge.f32.partialorder %v2929_v58, 0.0  ;;  %v2932_v25 = vadd.f32 %v5554_v28, %v2931_v54 }
 0x2f2   : > { %v3121_v4 = vsel %vm3057_vm15, %v2937_v35, %v3089_v61  ;;  %vm3058_vm2 = vcmp.ge.f32.partialorder %v2940_v23, 0.0  ;;  %v3090_v41 = vmul.f32 0.2, %v2940_v23 }
 0x2f3   : > { %v3717_v2 = vpop.f32.mrb[16].mxu1  ;;  %v3119_v9 = vsel %vm3055_vm0, %v2929_v58, %v3087_v38  ;;  %v3088_v39 = vmul.f32 0.2, %v2932_v25  ;;  %vm3056_vm6 = vcmp.ge.f32.partialorder %v2932_v25, 0.0 }
 0x2f4   : > { %v3001_v36 = vadd.f32 %v3717_v2, %v5554_v28  ;;  %v2992_v42 = vpop.f32.mrb[17].mxu1  ;;  %v3122_v6 = vsel %vm3058_vm2, %v2940_v23, %v3090_v41 }
 0x2f5   : > { %v2993_v60 = vadd.f32 %v5554_v28, %v2992_v42  ;;  %v3718_v16 = vpop.f32.mrb[18].mxu1  ;;  %v3120_v56 = vsel %vm3056_vm6, %v2932_v25, %v3088_v39  ;;  %v3187_v42 = vunpack.c.0.s8 %v3186_v44 }
 0x2f6   : > { %vm3073_vm3 = vcmp.ge.f32.partialorder %v3001_v36, 0.0  ;;  %v3105_v8 = vmul.f32 0.2, %v3001_v36  ;;  %v3004_v19 = vadd.f32 %v3718_v16, %v5554_v28  ;;  %v2995_v50 = vpop.f32.mrb[19].mxu1 }
 0x2f7   : > { %vm3071_vm4 = vcmp.ge.f32.partialorder %v2993_v60, 0.0  ;;  %v3103_v22 = vmul.f32 0.2, %v2993_v60  ;;  %v2996_v20 = vadd.f32 %v5554_v28, %v2995_v50 }
 0x2f8   : > { %v3137_v43 = vsel %vm3073_vm3, %v3001_v36, %v3105_v8  ;;  %vm3074_vm8 = vcmp.ge.f32.partialorder %v3004_v19, 0.0  ;;  %v3106_v33 = vmul.f32 0.2, %v3004_v19 }
 0x2f9   : > { %v3153_v18 = vadd.f32 %v3137_v43, %v3121_v4  ;;  %v3135_v10 = vsel %vm3071_vm4, %v2993_v60, %v3103_v22  ;;  %vm3072_vm14 = vcmp.ge.f32.partialorder %v2996_v20, 0.0  ;;  %v3104_v27 = vmul.f32 0.2, %v2996_v20 }
 0x2fa   : > { %v3151_v31 = vadd.f32 %v3135_v10, %v3119_v9  ;;  %v3138_v26 = vsel %vm3074_vm8, %v3004_v19, %v3106_v33  ;;  %v5575_v4 = vshrl.u32 %v3188_v45, 7 }
 0x2fb   : > { %v3154_v62 = vadd.f32 %v3138_v26, %v3122_v6  ;;  %v3136_v24 = vsel %vm3072_vm14, %v2996_v20, %v3104_v27 }
 0x2fc   : > { %v3152_v59 = vadd.f32 %v3136_v24, %v3120_v56  ;;  %v5578_v50 = vsub.s32 %v3187_v42, %v5575_v4 }
 0x2fd   : > { %v3168_v51 = vadd.f32 %v3154_v62, %v3153_v18 }
 0x2fe   : > { %v3167_v57 = vadd.f32 %v3152_v59, %v3151_v31 }
 0x2ff   : > { %v3176_v8 = vmul.f32 0.25, %v3168_v51 }
 0x300   : > { %v3175_v39 = vmul.f32 0.25, %v3167_v57 }
 0x319   : > { %v3705_v32 = vpop.f32.mrb[20].mxu0 }
 0x31a   : > { %v2953_v5 = vadd.f32 %v3705_v32, %v5554_v28  ;;  %v2944_v40 = vpop.f32.mrb[21].mxu0 }
 0x31b   : > { %v2945_v11 = vadd.f32 %v5554_v28, %v2944_v40  ;;  %v3706_v30 = vpop.f32.mrb[22].mxu0  ;;  %v3721_v7 = vpop.f32.mrb[20].mxu1 }
 0x31c   : > { %vm3061_vm7 = vcmp.ge.f32.partialorder %v2953_v5, 0.0  ;;  %v3093_v37 = vmul.f32 0.2, %v2953_v5  ;;  %v2956_v14 = vadd.f32 %v3706_v30, %v5554_v28  ;;  %v2947_v3 = vpop.f32.mrb[23].mxu0  ;;  %v3017_v47 = vadd.f32 %v3721_v7, %v5554_v28  ;;  %v3008_v15 = vpop.f32.mrb[21].mxu1 }
 0x31d   : > { %vm3059_vm9 = vcmp.ge.f32.partialorder %v2945_v11, 0.0  ;;  %v3091_v53 = vmul.f32 0.2, %v2945_v11  ;;  %v2948_v49 = vadd.f32 %v5554_v28, %v2947_v3  ;;  %v3009_v29 = vadd.f32 %v5554_v28, %v3008_v15  ;;  %v3722_v52 = vpop.f32.mrb[22].mxu1 }
 0x31e   : > { %vm3062_vm10 = vcmp.ge.f32.partialorder %v2956_v14, 0.0  ;;  %v3094_v21 = vmul.f32 0.2, %v2956_v14  ;;  %v3125_v1 = vsel %vm3061_vm7, %v2953_v5, %v3093_v37  ;;  %vm3077_vm12 = vcmp.ge.f32.partialorder %v3017_v47, 0.0  ;;  %v3011_v12 = vpop.f32.mrb[23].mxu1 }
 0x31f   : > { %vm3060_vm11 = vcmp.ge.f32.partialorder %v2948_v49, 0.0  ;;  %v3092_v48 = vmul.f32 0.2, %v2948_v49  ;;  %v3109_v17 = vmul.f32 0.2, %v3017_v47  ;;  %v3123_v34 = vsel %vm3059_vm9, %v2945_v11, %v3091_v53 }
 0x320   : > { %v3020_v46 = vadd.f32 %v3722_v52, %v5554_v28  ;;  %vm3075_vm1 = vcmp.ge.f32.partialorder %v3009_v29, 0.0  ;;  %v3107_v0 = vmul.f32 0.2, %v3009_v29  ;;  %v3126_v35 = vsel %vm3062_vm10, %v2956_v14, %v3094_v21 }
 0x321   : > { %v3012_v55 = vadd.f32 %v5554_v28, %v3011_v12  ;;  %v3141_v58 = vsel %vm3077_vm12, %v3017_v47, %v3109_v17  ;;  %v3124_v54 = vsel %vm3060_vm11, %v2948_v49, %v3092_v48 }
 0x322   : > { %vm3078_vm5 = vcmp.ge.f32.partialorder %v3020_v46, 0.0  ;;  %v3110_v63 = vmul.f32 0.2, %v3020_v46  ;;  %v3157_v61 = vadd.f32 %v3141_v58, %v3125_v1  ;;  %v3139_v23 = vsel %vm3075_vm1, %v3009_v29, %v3107_v0 }
 0x323   : > { %vm3076_vm15 = vcmp.ge.f32.partialorder %v3012_v55, 0.0  ;;  %v3108_v38 = vmul.f32 0.2, %v3012_v55  ;;  %v3155_v25 = vadd.f32 %v3139_v23, %v3123_v34 }
 0x324   : > { %v3142_v2 = vsel %vm3078_vm5, %v3020_v46, %v3110_v63 }
 0x325   : > { %v3158_v36 = vadd.f32 %v3142_v2, %v3126_v35  ;;  %v3140_v41 = vsel %vm3076_vm15, %v3012_v55, %v3108_v38 }
 0x326   : > { %v3156_v60 = vadd.f32 %v3140_v41, %v3124_v54 }
 0x327   : > { %v3170_v16 = vadd.f32 %v3158_v36, %v3157_v61 }
 0x328   : > { %v3169_v9 = vadd.f32 %v3156_v60, %v3155_v25 }
 0x329   : > { %v3178_v19 = vmul.f32 0.25, %v3170_v16 }
 0x32a   : > { %v3177_v22 = vmul.f32 0.25, %v3169_v9 }
 0x32b   : > { %v3199_v20 = vcombine.low %v3176_v8, %v3178_v19  ;;  %v3200_v43 = vcombine.high %v3176_v8, %v3178_v19 }
 0x32c   : > { %v3183_v33 = vcombine.low %v3175_v39, %v3177_v22  ;;  %v3184_v18 = vcombine.high %v3175_v39, %v3177_v22 }
 0x32d   : > { %v5581_v10 = vrot.slane %v3199_v20, %v5578_v50  ;;  %v5584_v27 = vrot.slane %v3200_v43, %v5578_v50 }
 0x32e   : > { %v5587_v6 = vrot.slane %v3183_v33, %v5578_v50  ;;  %v5590_v31 = vrot.slane %v3184_v18, %v5578_v50 }
 0x330   : > { %v3248_v26 = vcombine.high %v5587_v6, %v5581_v10  ;;  %v3247_v56 = vcombine.low %v5587_v6, %v5581_v10  ;;  %v3263_v62 = vcombine.low %v5590_v31, %v5584_v27  ;;  %v3264_v24 = vcombine.high %v5590_v31, %v5584_v27 }
 0x33e   : > { %v3725_v59 = vpop.f32.mrb[24].mxu1 }
 0x33f   : > { %v3033_v51 = vadd.f32 %v3725_v59, %v5554_v28  ;;  %v3709_v57 = vpop.f32.mrb[24].mxu0  ;;  %v3024_v32 = vpop.f32.mrb[25].mxu1 }
 0x340   : > { %v2969_v5 = vadd.f32 %v3709_v57, %v5554_v28  ;;  %v3025_v40 = vadd.f32 %v5554_v28, %v3024_v32  ;;  %v2960_v11 = vpop.f32.mrb[25].mxu0  ;;  %v3726_v30 = vpop.f32.mrb[26].mxu1 }
 0x341   : > { %vm3081_vm0 = vcmp.ge.f32.partialorder %v3033_v51, 0.0  ;;  %v3113_v37 = vmul.f32 0.2, %v3033_v51  ;;  %v2961_v14 = vadd.f32 %v5554_v28, %v2960_v11  ;;  %v3036_v3 = vadd.f32 %v3726_v30, %v5554_v28  ;;  %v3710_v7 = vpop.f32.mrb[26].mxu0  ;;  %v3027_v53 = vpop.f32.mrb[27].mxu1 }
 0x342   : > { %vm3065_vm2 = vcmp.ge.f32.partialorder %v2969_v5, 0.0  ;;  %v3097_v45 = vmul.f32 0.2, %v2969_v5  ;;  %vm3079_vm3 = vcmp.ge.f32.partialorder %v3025_v40, 0.0  ;;  %v3111_v49 = vmul.f32 0.2, %v3025_v40 }
 0x343   : > { %v3145_v47 = vsel %vm3081_vm0, %v3033_v51, %v3113_v37  ;;  %vm3063_vm4 = vcmp.ge.f32.partialorder %v2961_v14, 0.0  ;;  %v3095_v15 = vmul.f32 0.2, %v2961_v14  ;;  %vm3082_vm6 = vcmp.ge.f32.partialorder %v3036_v3, 0.0  ;;  %v2963_v21 = vpop.f32.mrb[27].mxu0 }
 0x344   : > { %v3129_v13 = vsel %vm3065_vm2, %v2969_v5, %v3097_v45  ;;  %v3143_v44 = vsel %vm3079_vm3, %v3025_v40, %v3111_v49  ;;  %v3114_v1 = vmul.f32 0.2, %v3036_v3  ;;  %v2972_v29 = vadd.f32 %v3710_v7, %v5554_v28 }
 0x345   : > { %v3161_v52 = vadd.f32 %v3145_v47, %v3129_v13  ;;  %v3127_v48 = vsel %vm3063_vm4, %v2961_v14, %v3095_v15  ;;  %v3028_v17 = vadd.f32 %v5554_v28, %v3027_v53  ;;  %v2964_v34 = vadd.f32 %v5554_v28, %v2963_v21 }
 0x346   : > { %v3159_v46 = vadd.f32 %v3143_v44, %v3127_v48  ;;  %v3146_v12 = vsel %vm3082_vm6, %v3036_v3, %v3114_v1  ;;  %vm3066_vm8 = vcmp.ge.f32.partialorder %v2972_v29, 0.0  ;;  %v3098_v0 = vmul.f32 0.2, %v2972_v29 }
 0x347   : > { %vm3080_vm14 = vcmp.ge.f32.partialorder %v3028_v17, 0.0  ;;  %v3112_v35 = vmul.f32 0.2, %v3028_v17  ;;  %vm3064_vm7 = vcmp.ge.f32.partialorder %v2964_v34, 0.0  ;;  %v3096_v55 = vmul.f32 0.2, %v2964_v34 }
 0x348   : > { %v3130_v58 = vsel %vm3066_vm8, %v2972_v29, %v3098_v0  ;;  %v3897_v1 = vmov 1934713408   ;;  %vm3348_vm2 = vcmask 130048   ;;  %vm3350_vm3 = vcmask 195584  }
 0x349   : > { %v3162_v63 = vadd.f32 %v3146_v12, %v3130_v58  ;;  %v3144_v54 = vsel %vm3080_vm14, %v3028_v17, %v3112_v35  ;;  %v3128_v61 = vsel %vm3064_vm7, %v2964_v34, %v3096_v55  ;;  %v3250_v29 = vunpack.c.l.s4 %v3897_v1 }
 0x34a   : > { %v3160_v23 = vadd.f32 %v3144_v54, %v3128_v61  ;;  %vm3352_vm4 = vcmask 261120   ;;  %vm3354_vm6 = vcmask 326656   ;;  %vm3356_vm8 = vcmask 392192  }
 0x34b   : > { %v3172_v38 = vadd.f32 %v3162_v63, %v3161_v52  ;;  %vm3358_vm14 = vcmask 457728  }
 0x34c   : > { %v3171_v25 = vadd.f32 %v3160_v23, %v3159_v46  ;;  %v3251_v46 = vunpack.c.0.s8 %v3250_v29 }
 0x34e   : > { %v3179_v12 = vmul.f32 0.25, %v3171_v25  ;;  %v3254_v23 = vsub.s32 %v3251_v46, %v5575_v4 }
 0x350   : > { %v3262_v25 = vrot.slane %v3248_v26, %v3254_v23  ;;  %v3271_v4 = vrot.slane %v3263_v62, %v3254_v23 }
 0x359   : > { %v3729_v2 = vpop.f32.mrb[28].mxu1 }
 0x35a   : > { %v3049_v36 = vadd.f32 %v3729_v2, %v5554_v28  ;;  %v3040_v42 = vpop.f32.mrb[29].mxu1  ;;  %v3713_v16 = vpop.f32.mrb[28].mxu0 }
 0x35b   : > { %v3041_v41 = vadd.f32 %v5554_v28, %v3040_v42  ;;  %v3730_v60 = vpop.f32.mrb[30].mxu1  ;;  %v2985_v39 = vadd.f32 %v3713_v16, %v5554_v28  ;;  %v2976_v22 = vpop.f32.mrb[29].mxu0  ;;  %v3255_v16 = vrot.slane %v3247_v56, %v3254_v23 }
 0x35c   : > { %vm3085_vm9 = vcmp.ge.f32.partialorder %v3049_v36, 0.0  ;;  %v3117_v9 = vmul.f32 0.2, %v3049_v36  ;;  %v3052_v8 = vadd.f32 %v3730_v60, %v5554_v28  ;;  %v3043_v19 = vpop.f32.mrb[31].mxu1  ;;  %v2977_v33 = vadd.f32 %v5554_v28, %v2976_v22  ;;  %v3714_v18 = vpop.f32.mrb[30].mxu0 }
 0x35d   : > { %vm3083_vm10 = vcmp.ge.f32.partialorder %v3041_v41, 0.0  ;;  %v3115_v20 = vmul.f32 0.2, %v3041_v41  ;;  %v3044_v43 = vadd.f32 %v5554_v28, %v3043_v19  ;;  %vm3069_vm12 = vcmp.ge.f32.partialorder %v2985_v39, 0.0  ;;  %v2979_v5 = vpop.f32.mrb[31].mxu0 }
 0x35e   : > { %v3149_v59 = vsel %vm3085_vm9, %v3049_v36, %v3117_v9  ;;  %vm3086_vm11 = vcmp.ge.f32.partialorder %v3052_v8, 0.0  ;;  %v3118_v51 = vmul.f32 0.2, %v3052_v8  ;;  %v3101_v57 = vmul.f32 0.2, %v2985_v39 }
 0x35f   : > { %v2988_v32 = vadd.f32 %v3714_v18, %v5554_v28  ;;  %v3147_v40 = vsel %vm3083_vm10, %v3041_v41, %v3115_v20  ;;  %vm3067_vm1 = vcmp.ge.f32.partialorder %v2977_v33, 0.0  ;;  %v3099_v11 = vmul.f32 0.2, %v2977_v33 }
 0x360   : > { %v2980_v30 = vadd.f32 %v5554_v28, %v2979_v5  ;;  %v3150_v37 = vsel %vm3086_vm11, %v3052_v8, %v3118_v51  ;;  %v3133_v14 = vsel %vm3069_vm12, %v2985_v39, %v3101_v57  ;;  %vm3084_vm15 = vcmp.ge.f32.partialorder %v3044_v43, 0.0 }
 0x361   : > { %vm3070_vm5 = vcmp.ge.f32.partialorder %v2988_v32, 0.0  ;;  %v3102_v3 = vmul.f32 0.2, %v2988_v32  ;;  %v3131_v7 = vsel %vm3067_vm1, %v2977_v33, %v3099_v11  ;;  %v3165_v53 = vadd.f32 %v3149_v59, %v3133_v14 }
 0x362   : > { %vm3068_vm0 = vcmp.ge.f32.partialorder %v2980_v30, 0.0  ;;  %v3100_v45 = vmul.f32 0.2, %v2980_v30  ;;  %v3163_v47 = vadd.f32 %v3147_v40, %v3131_v7  ;;  %v3116_v15 = vmul.f32 0.2, %v3044_v43 }
 0x363   : > { %v3134_v49 = vsel %vm3070_vm5, %v2988_v32, %v3102_v3  ;;  %v3180_v28 = vmul.f32 0.25, %v3172_v38  ;;  %v3278_v39 = vrot.slane %v3264_v24, %v3254_v23 }
 0x364   : > { %v3166_v21 = vadd.f32 %v3150_v37, %v3134_v49  ;;  %v3132_v13 = vsel %vm3068_vm0, %v2980_v30, %v3100_v45  ;;  %v3148_v44 = vsel %vm3084_vm15, %v3044_v43, %v3116_v15 }
 0x365   : > { %v3164_v48 = vadd.f32 %v3148_v44, %v3132_v13 }
 0x366   : > { %v3174_v52 = vadd.f32 %v3166_v21, %v3165_v53 }
 0x367   : > { %v3173_v34 = vadd.f32 %v3164_v48, %v3163_v47 }
 0x368   : > { %v3182_v17 = vmul.f32 0.25, %v3174_v52 }
 0x369   : > { %v3181_v55 = vmul.f32 0.25, %v3173_v34 }
 0x36a   : > { %v3231_v0 = vcombine.low %v3180_v28, %v3182_v17  ;;  %v3232_v35 = vcombine.high %v3180_v28, %v3182_v17 }
 0x36b   : > { %v3215_v54 = vcombine.low %v3179_v12, %v3181_v55  ;;  %v3216_v61 = vcombine.high %v3179_v12, %v3181_v55 }
 0x36c   : > { %v3239_v58 = vrot.slane %v3231_v0, %v5578_v50  ;;  %v3246_v63 = vrot.slane %v3232_v35, %v5578_v50 }
 0x36d   : > { %v3223_v2 = vrot.slane %v3215_v54, %v5578_v50  ;;  %v3230_v36 = vrot.slane %v3216_v61, %v5578_v50 }
 0x36f   : > { %v3280_v38 = vcombine.high %v3223_v2, %v3239_v58  ;;  %v3279_v42 = vcombine.low %v3223_v2, %v3239_v58  ;;  %v3295_v41 = vcombine.low %v3230_v36, %v3246_v63  ;;  %v3296_v60 = vcombine.high %v3230_v36, %v3246_v63 }
 0x371   : > { %v3294_v9 = vrot.slane %v3280_v38, %v3254_v23  ;;  %v3287_v8 = vrot.slane %v3279_v42, %v3254_v23  ;;  %v3303_v19 = vrot.slane %v3295_v41, %v3254_v23  ;;  %v3310_v50 = vrot.slane %v3296_v60, %v3254_v23 }
 0x373   : > { %v3313_v22 = vcombine.low %v3262_v25, %v3294_v9  ;;  %v3312_v20 = vcombine.high %v3255_v16, %v3287_v8  ;;  %v3315_v26 = vcombine.low %v3271_v4, %v3303_v19  ;;  %v3314_v43 = vcombine.high %v3262_v25, %v3294_v9 }
 0x374   : > { %v3317_v33 = vcombine.low %v3278_v39, %v3310_v50  ;;  %v3316_v10 = vcombine.high %v3271_v4, %v3303_v19  ;;  %v3318_v6 = vcombine.high %v3278_v39, %v3310_v50  ;;  %v3311_v56 = vcombine.low %v3255_v16, %v3287_v8 }
 0x375   : > { %3324 = vrot.lane.b32.xlu1 %v3313_v22, %s3893_s13  ;;  %3320 = vrot.lane.b32.xlu0 %v3312_v20, %s3888_s29  ;;  %s3451_s13 = sshll.u32 %s257_s28, 3  ;;  %s3595_s29 = sshll.u32 %s3955_s25, 7 }
 0x379   : > { %3332 = vrot.lane.b32.xlu1 %v3315_v26, %s3890_s10  ;;  %3328 = vrot.lane.b32.xlu0 %v3314_v43, %s3889_s9  ;;  %s259_s9 = scalar_lea.vmem [#allocation5], %s3451_s13 }
 0x37a   : > { %s3376_s10 = sshll.u32 %s259_s9, 4  ;;  %s5648_s10 = int_to_ptr.vmem [resolvable:$true] %s3376_s10 }
 0x37b   : > { %s3823_s25 = scalar_lea.vmem %s5648_s10, 128  ;;  %p3830_p0 = scmp.lt.s32.totalorder %s5648_s10, %s3828_s18 }
 0x37c   : > { %p3824_p11 = scmp.ne.s32.totalorder %s5648_s10, %s3823_s25  ;;  %p3831_p1 = scmp.lt.s32.totalorder %s3829_s19, %s3823_s25 }
 0x37d   : > { %3340 = vrot.lane.b32.xlu1 %v3317_v33, %s3891_s11  ;;  %3336 = vrot.lane.b32.xlu0 %v3316_v10, %s3894_s14  ;;  %s5646_s14 = scalar_lea.hbm %s5694_s6, %s3595_s29 }
 0x37e   : > { %p3825_p12 = pnand %p3824_p11, %p3972_p5  ;;  %p3832_p2 = por %p3831_p1, %p3830_p0 }
 0x380   : > { %p3826_p13 = pneg %p3825_p12 }
 0x381   : > { %3344 = vrot.lane.b32.xlu0 %v3318_v6, %s3892_s12 }
 0x382   : > { %p3833_p3 = pnand %p3832_p2, %p3826_p13 }
 0x3e7   : > { %v3325_v27 = vpop.permute.xlu1 %3324  ;;  %v3321_v31 = vpop.permute.xlu0 %3320 }
 0x3e8   : > { %v3347_v62 = vsel %vm1597_vm13, %v3311_v56, %v3321_v31  ;;  %vm3360_vm13 = vcmask 523264  }
 0x3e9   : > { %v3349_v59 = vsel %vm3348_vm2, %v3347_v62, %v3325_v27 }
 0x3eb   : > { %v3333_v24 = vpop.permute.xlu1 %3332  ;;  %v3329_v18 = vpop.permute.xlu0 %3328 }
 0x3ec   : > { %v3351_v51 = vsel %vm3350_vm3, %v3349_v59, %v3329_v18 }
 0x3ed   : > { %v3353_v32 = vsel %vm3352_vm4, %v3351_v51, %v3333_v24 }
 0x3ef   : > { %v3337_v57 = vpop.permute.xlu0 %3336  ;;  %v3341_v5 = vpop.permute.xlu1 %3340 }
 0x3f0   : > { %v3355_v40 = vsel %vm3354_vm6, %v3353_v32, %v3337_v57 }
 0x3f1   : > { %v3357_v30 = vsel %vm3356_vm8, %v3355_v40, %v3341_v5 }
 0x3f3   : > { %v3345_v11 = vpop.permute.xlu0 %3344 }
 0x3f4   : > { %v3359_v37 = vsel %vm3358_vm14, %v3357_v30, %v3345_v11 }
 0x3f5   : > { %3361 = vst.msk [vmem:[%s259_s9] sm:$0xff] %vm3360_vm13, %v3359_v37 }
 0x3f6   : > { %3836 = shalt.err (!%p3833_p3)
}
 0x3f7   : > { %s3837_s20 = scalar_lea.hbm %s5646_s14, 128  ;;  %s3841_s28 = scalar_lea.hbm %s5694_s6, 256 }
 0x3f8   : > { %p3838_p4 = scmp.ne.s32.totalorder %s5646_s14, %s3837_s20  ;;  %p3842_p9 = scmp.lt.u32.totalorder %s5646_s14, %s5694_s6 }
 0x3f9   : > { %p3843_p10 = scmp.lt.u32.totalorder %s3841_s28, %s3837_s20  ;;  %p3845_p12 = scmp.lt.u32.totalorder %s3837_s20, %s5646_s14 }
 0x3fa   : > { %p3839_p7 = pnand %p3838_p4, %p3972_p5 }
 0x3fb   : > { %p3844_p11 = por %p3843_p10, %p3842_p9 }
 0x3fc   : > { %p3840_p8 = pneg %p3839_p7 }
 0x3fd   : > { %p3846_p13 = por %p3845_p12, %p3844_p11 }
 0x3ff   : > { %p3847_p0 = pnand %p3846_p13, %p3840_p8 }
 0x401   : > { %3850 = shalt.err (!%p3847_p0)
}
 0x402   : > { %3746 = dma.vmem_to_hbm [thread:$0]  (%p3972_p5), %s5648_s10, 128, %s5646_s14, %s3363_s16  }
 0x403 PF: > { %p3752_p1 = scmp.ge.s32.totalorder %s3885_s24, 2  ;;  %s3388_s9 = sand.u32 1, %s3873_s21  }
 0x404   : > { %s3389_s11 = scalar_lea.sflag [#allocation6], %s3388_s9 }
 0x405   : > { %p3749_p2 = pnand %p3752_p1, %p3976_p6 }
 0x407   : > { %3868 = dma.done.wait (!%p3749_p2), %s3389_s11, 128  }
 0x408   : > { %3870 = vsyncadd (!%p3749_p2), %s3389_s11, 4294967168  ;;  %p16_p3 = scmp.ge.s32.totalorder %s3959_s27, 4   ;;  %s5731_s21 = smov %s3877_s22 }
 0x409   : > { %s5732_s22 = smov %s3881_s23  ;;  %s5733_s23 = smov %s3970_s30 }
 0x40a   : > { %s5734_s24 = smov %s3959_s27  ;;  %18 = sbr.rel (!%p16_p3) target bundleno = 3 (0x3), region = 84 }
 0x411   :  { %3394 = vsyncpa [#allocation6], 1 }
 0x412   :  { %3396 = vsyncpa [#allocation6 + $0x1], 1 }

</bundles_post_ra>
